<compile_context>
chip_gen: v7x
topology: tpu7x:2x2x1
jax: 0.10.0
libtpu: 0.0.40
codegen_flags: <defaults>
</compile_context>

<pallas_src>
import jax
import jax.numpy as jnp
from jax.experimental import pallas as pl
from jax.experimental.pallas import tpu as pltpu

_BB = 8       # batch block (sublane-aligned)
_LANE = 128   # lane width


def _round_up(x, m):
    return (x + m - 1) // m * m


def _pick_time_chunk(T, max_chunk=32):
    """Largest chunk <= max_chunk dividing T, preferring sublane-aligned (multiple of 8)."""
    for c in range(min(T, max_chunk), 7, -1):
        if T % c == 0 and c % 8 == 0:
            return c
    if T <= max_chunk:
        return T
    for c in range(min(T, max_chunk), 0, -1):
        if T % c == 0:
            return c
    return 1


# ----------------------------------------------------------------------------
# Shared chunk body: one big gi GEMM + fully-unrolled per-timestep recurrence.
# ----------------------------------------------------------------------------
def _run_gru_chunk(x_ref, wih_ref, whh_ref, bi_ref, bhn_ref, h0, y_ref=None):
    Bb, Tc, D = x_ref.shape
    Hp = h0.shape[-1]

    # Time-parallel input projection for the whole chunk (one MXU GEMM).
    gi = (jnp.dot(x_ref[...].reshape(Bb * Tc, D), wih_ref[...],
                  preferred_element_type=jnp.float32)
          + bi_ref[...]).reshape(Bb, Tc, 3 * Hp)

    whh = whh_ref[...]
    b_hn = bhn_ref[...]

    h = h0
    # Fully-unrolled recurrence over the chunk (Tc is a small static constant);
    # only the small h @ W_hh GEMM lives inside the sequential loop.
    for t in range(Tc):
        gh = jnp.dot(h, whh, preferred_element_type=jnp.float32)
        gi_t = gi[:, t, :]
        r = jax.nn.sigmoid(gi_t[:, 0:Hp] + gh[:, 0:Hp])
        z = jax.nn.sigmoid(gi_t[:, Hp:2 * Hp] + gh[:, Hp:2 * Hp])
        n = jnp.tanh(gi_t[:, 2 * Hp:3 * Hp] + r * (gh[:, 2 * Hp:3 * Hp] + b_hn))
        h = (1.0 - z) * n + z * h
        if y_ref is not None:
            y_ref[:, t, :] = h.astype(y_ref.dtype)
    return h


# ----------------------------------------------------------------------------
# Kernel 1: one GRU layer emitting the full hidden sequence (used for all but
# the last layer).  Grid = (batch_blocks, time_chunks); recurrence carried in
# VMEM scratch across the (sequential) time-chunk axis.
# ----------------------------------------------------------------------------
def _gru_seq_kernel(x_ref, wih_ref, whh_ref, bi_ref, bhn_ref, y_ref, h_scr):
    c = pl.program_id(1)

    @pl.when(c == 0)
    def _init():
        h_scr[...] = jnp.zeros_like(h_scr)   # h0 = zeros (matches forward())

    h = _run_gru_chunk(x_ref, wih_ref, whh_ref, bi_ref, bhn_ref, h_scr[...], y_ref)
    h_scr[...] = h


def gru_layer_seq(x_p, wih, whh, bi, bhn, Hp, Tc):
    """x_p: (Bp, T, D) -> y: (Bp, T, Hp) full hidden sequence (padded layout)."""
    Bp, T, D = x_p.shape
    nb, nc = Bp // _BB, T // Tc
    return pl.pallas_call(
        _gru_seq_kernel,
        out_shape=jax.ShapeDtypeStruct((Bp, T, Hp), x_p.dtype),
        grid_spec=pltpu.PrefetchScalarGridSpec(
            num_scalar_prefetch=0,
            grid=(nb, nc),
            in_specs=[
                pl.BlockSpec((_BB, Tc, D), lambda b, c: (b, c, 0)),
                pl.BlockSpec((D, 3 * Hp), lambda b, c: (0, 0)),
                pl.BlockSpec((Hp, 3 * Hp), lambda b, c: (0, 0)),
                pl.BlockSpec((1, 3 * Hp), lambda b, c: (0, 0)),
                pl.BlockSpec((1, Hp), lambda b, c: (0, 0)),
            ],
            out_specs=pl.BlockSpec((_BB, Tc, Hp), lambda b, c: (b, c, 0)),
            scratch_shapes=[pltpu.VMEM((_BB, Hp), jnp.float32)],
        ),
        compiler_params=pltpu.CompilerParams(
            dimension_semantics=("parallel", "arbitrary")),
    )(x_p, wih, whh, bi, bhn)


# ----------------------------------------------------------------------------
# Kernel 2: last GRU layer fused with the Linear head.  Emits only the final
# (Bp, O_pad) logits; the (B, T, H) sequence never touches HBM.
# ----------------------------------------------------------------------------
def _gru_last_fc_kernel(x_ref, wih_ref, whh_ref, bi_ref, bhn_ref,
                        wfc_ref, bfc_ref, o_ref, h_scr):
    c = pl.program_id(1)

    @pl.when(c == 0)
    def _init():
        h_scr[...] = jnp.zeros_like(h_scr)

    h = _run_gru_chunk(x_ref, wih_ref, whh_ref, bi_ref, bhn_ref, h_scr[...], None)
    h_scr[...] = h

    @pl.when(c == pl.num_programs(1) - 1)
    def _fc():
        out = jnp.dot(h, wfc_ref[...], preferred_element_type=jnp.float32) + bfc_ref[...]
        o_ref[...] = out.astype(o_ref.dtype)


def gru_last_layer_fc(x_p, wih, whh, bi, bhn, wfc, bfc, Hp, Tc):
    Bp, T, D = x_p.shape
    Op = wfc.shape[1]
    nb, nc = Bp // _BB, T // Tc
    return pl.pallas_call(
        _gru_last_fc_kernel,
        out_shape=jax.ShapeDtypeStruct((Bp, Op), x_p.dtype),
        grid_spec=pltpu.PrefetchScalarGridSpec(
            num_scalar_prefetch=0,
            grid=(nb, nc),
            in_specs=[
                pl.BlockSpec((_BB, Tc, D), lambda b, c: (b, c, 0)),
                pl.BlockSpec((D, 3 * Hp), lambda b, c: (0, 0)),
                pl.BlockSpec((Hp, 3 * Hp), lambda b, c: (0, 0)),
                pl.BlockSpec((1, 3 * Hp), lambda b, c: (0, 0)),
                pl.BlockSpec((1, Hp), lambda b, c: (0, 0)),
                pl.BlockSpec((Hp, Op), lambda b, c: (0, 0)),
                pl.BlockSpec((1, Op), lambda b, c: (0, 0)),
            ],
            out_specs=pl.BlockSpec((_BB, Op), lambda b, c: (b, 0)),
            scratch_shapes=[pltpu.VMEM((_BB, Hp), jnp.float32)],
        ),
        compiler_params=pltpu.CompilerParams(
            dimension_semantics=("parallel", "arbitrary")),
    )(x_p, wih, whh, bi, bhn, wfc, bfc)


# ----------------------------------------------------------------------------
# Host-side parameter packing: pad H -> Hp (multiple of 128), lane-align the
# (r, z, n) gate slabs, and pre-fold b_ih + b_hh for the r/z gates.
# Padded hidden lanes stay exactly 0 through the recurrence.
# ----------------------------------------------------------------------------
def prepare_padded_params(params, input_dim, hidden_dim, output_dim):
    H = hidden_dim
    Hp = _round_up(H, _LANE)
    Op = _round_up(output_dim, _LANE)
    layers = []
    for l, lp in enumerate(params["gru_layers"]):
        d = input_dim if l == 0 else H
        d_pad = input_dim if l == 0 else Hp
        wih = jnp.zeros((d_pad, 3 * Hp), jnp.float32)
        whh = jnp.zeros((Hp, 3 * Hp), jnp.float32)
        bi = jnp.zeros((3 * Hp,), jnp.float32)
        bhn = jnp.zeros((Hp,), jnp.float32)
        for g in range(3):
            wih = wih.at[:d, g * Hp:g * Hp + H].set(lp["w_ih_t"][:, g * H:(g + 1) * H])
            whh = whh.at[:H, g * Hp:g * Hp + H].set(lp["w_hh_t"][:, g * H:(g + 1) * H])
        # r/z gates: fold both biases into the gi GEMM bias; n gate: b_ih only.
        bi = bi.at[0:H].set(lp["b_ih"][0:H] + lp["b_hh"][0:H])
        bi = bi.at[Hp:Hp + H].set(lp["b_ih"][H:2 * H] + lp["b_hh"][H:2 * H])
        bi = bi.at[2 * Hp:2 * Hp + H].set(lp["b_ih"][2 * H:3 * H])
        bhn = bhn.at[:H].set(lp["b_hh"][2 * H:3 * H])
        layers.append(dict(wih=wih, whh=whh,
                           bi=bi.reshape(1, 3 * Hp), bhn=bhn.reshape(1, Hp)))
    wfc = jnp.zeros((Hp, Op), jnp.float32).at[:H, :output_dim].set(params["fc_w_t"])
    bfc = jnp.zeros((1, Op), jnp.float32).at[0, :output_dim].set(params["fc_b"])
    return dict(layers=layers, wfc=wfc, bfc=bfc, Hp=Hp, Op=Op)


# ----------------------------------------------------------------------------
# Full model forward: stacked GRU layers + FC fused into the last layer.
# ----------------------------------------------------------------------------
def gru_model_forward(x, padded, output_dim):
    B, T, D_in = x.shape
    Bp = _round_up(B, _BB)
    Tc = _pick_time_chunk(T)
    Hp = padded["Hp"]

    h_seq = jnp.zeros((Bp, T, D_in), x.dtype).at[:B].set(x)
    for lp in padded["layers"][:-1]:
        h_seq = gru_layer_seq(h_seq, lp["wih"], lp["whh"], lp["bi"], lp["bhn"], Hp, Tc)
        # TODO(synk): inter-layer dropout is a no-op (eval-mode semantics).
    lp = padded["layers"][-1]
    out_p = gru_last_layer_fc(h_seq, lp["wih"], lp["whh"], lp["bi"], lp["bhn"],
                              padded["wfc"], padded["bfc"], Hp, Tc)
    return out_p[:B, :output_dim]


# ----------------------------------------------------------------------------
# Pure-JAX reference (unpadded) for correctness checking.
# ----------------------------------------------------------------------------
def gru_model_reference(x, params):
    h_seq = x.astype(jnp.float32)
    for lp in params["gru_layers"]:
        B, T, _ = h_seq.shape
        H = lp["w_hh_t"].shape[0]
        h = jnp.zeros((B, H), jnp.float32)
        outs = []
        for t in range(T):
            xt = h_seq[:, t, :]
            gi = xt @ lp["w_ih_t"] + lp["b_ih"]
            gh = h @ lp["w_hh_t"] + lp["b_hh"]
            i_r, i_z, i_n = jnp.split(gi, 3, axis=-1)
            h_r, h_z, h_n = jnp.split(gh, 3, axis=-1)
            r = jax.nn.sigmoid(i_r + h_r)
            z = jax.nn.sigmoid(i_z + h_z)
            n = jnp.tanh(i_n + r * h_n)
            h = (1.0 - z) * n + z * h
            outs.append(h)
        h_seq = jnp.stack(outs, axis=1)
    last = h_seq[:, -1, :]
    return last @ params["fc_w_t"] + params["fc_b"]


# ----------------------------------------------------------------------------
# Deterministic parameter init (uniform(-1/sqrt(H), 1/sqrt(H)) like PyTorch).
# ----------------------------------------------------------------------------
def init_params(key, input_dim, hidden_dim, layer_dim, output_dim):
    bound = 1.0 / (hidden_dim ** 0.5)
    layers = []
    for l in range(layer_dim):
        d_in = input_dim if l == 0 else hidden_dim
        key, k1, k2, k3, k4 = jax.random.split(key, 5)
        layers.append(dict(
            w_ih_t=jax.random.uniform(k1, (d_in, 3 * hidden_dim), jnp.float32, -bound, bound),
            w_hh_t=jax.random.uniform(k2, (hidden_dim, 3 * hidden_dim), jnp.float32, -bound, bound),
            b_ih=jax.random.uniform(k3, (3 * hidden_dim,), jnp.float32, -bound, bound),
            b_hh=jax.random.uniform(k4, (3 * hidden_dim,), jnp.float32, -bound, bound),
        ))
    key, k5, k6 = jax.random.split(key, 3)
    fc_w_t = jax.random.uniform(k5, (hidden_dim, output_dim), jnp.float32, -bound, bound)
    fc_b = jax.random.uniform(k6, (output_dim,), jnp.float32, -bound, bound)
    return dict(gru_layers=layers, fc_w_t=fc_w_t, fc_b=fc_b)


if __name__ == "__main__":
    # Small shapes consistent with the module's forward: x is (B, T, input_dim).
    B, T = 2, 8
    input_dim, hidden_dim, layer_dim, output_dim = 16, 32, 2, 4

    key = jax.random.PRNGKey(0)
    key, kx = jax.random.split(key)
    x = jax.random.normal(kx, (B, T, input_dim), jnp.float32)
    params = init_params(key, input_dim, hidden_dim, layer_dim, output_dim)
    padded = prepare_padded_params(params, input_dim, hidden_dim, output_dim)

    out = gru_model_forward(x, padded, output_dim)
    out = jax.block_until_ready(out)

    ref = gru_model_reference(x, params)
    assert out.shape == (B, output_dim), out.shape
    assert jnp.allclose(out, ref, atol=1e-3, rtol=1e-3), (out, ref)

    print("KERNEL_OK")
</pallas_src>

<mosaic_0001>
module attributes {stable_mosaic.version = 11 : i64} {
  func.func @_gru_seq_kernel(%arg0: i32, %arg1: i32, %arg2: memref<8x8x16xf32, #tpu.memory_space<vmem>>, %arg3: memref<16x384xf32, #tpu.memory_space<vmem>>, %arg4: memref<128x384xf32, #tpu.memory_space<vmem>>, %arg5: memref<1x384xf32, #tpu.memory_space<vmem>>, %arg6: memref<1x128xf32, #tpu.memory_space<vmem>>, %arg7: memref<8x8x128xf32, #tpu.memory_space<vmem>>, %arg8: memref<8x128xf32, #tpu.memory_space<vmem>>) attributes {dimension_semantics = [#tpu.dimension_semantics<parallel>, #tpu.dimension_semantics<arbitrary>], iteration_bounds = array<i64: 1, 1>, scalar_prefetch = 0 : i64, scratch_operands = 1 : i64, tpu.core_type = #tpu.core_type<tc>, window_params = [{transform_indices = @transform_0, window_bounds = array<i64: 8, 8, 16>}, {pipeline_mode = #tpu.pipeline_mode<synchronous>, transform_indices = @transform_1, window_bounds = array<i64: 16, 384>}, {pipeline_mode = #tpu.pipeline_mode<synchronous>, transform_indices = @transform_2, window_bounds = array<i64: 128, 384>}, {pipeline_mode = #tpu.pipeline_mode<synchronous>, transform_indices = @transform_3, window_bounds = array<i64: 1, 384>}, {pipeline_mode = #tpu.pipeline_mode<synchronous>, transform_indices = @transform_4, window_bounds = array<i64: 1, 128>}, {transform_indices = @transform_5, window_bounds = array<i64: 8, 8, 128>}]} {
    %c0_i32 = arith.constant 0 : i32
    %0 = arith.cmpi eq, %arg1, %c0_i32 : i32
    %1 = arith.extui %0 : i1 to i32
    %c0_i32_0 = arith.constant 0 : i32
    %2 = arith.cmpi ne, %1, %c0_i32_0 : i32
    scf.if %2 {
      %cst_64 = arith.constant 0.000000e+00 : f32
      %287 = vector.broadcast %cst_64 : f32 to vector<8x128xf32>
      %c0_65 = arith.constant 0 : index
      %c0_66 = arith.constant 0 : index
      %288 = vector.load %arg8[%c0_65, %c0_66] : memref<8x128xf32, #tpu.memory_space<vmem>>, vector<8x128xf32>
      tpu.vector_store %arg8[%c0_65, %c0_66], %287 {strides = array<i32>} : memref<8x128xf32, #tpu.memory_space<vmem>>, vector<8x128xf32>,
    } else {
    }
    %c0 = arith.constant 0 : index
    %c0_1 = arith.constant 0 : index
    %3 = vector.load %arg8[%c0, %c0_1] : memref<8x128xf32, #tpu.memory_space<vmem>>, vector<8x128xf32>
    %c0_2 = arith.constant 0 : index
    %c0_3 = arith.constant 0 : index
    %c0_4 = arith.constant 0 : index
    %4 = vector.load %arg2[%c0_2, %c0_3, %c0_4] : memref<8x8x16xf32, #tpu.memory_space<vmem>>, vector<8x8x16xf32>
    %5 = vector.shape_cast %4 : vector<8x8x16xf32> to vector<64x16xf32>
    %c0_5 = arith.constant 0 : index
    %c0_6 = arith.constant 0 : index
    %6 = vector.load %arg3[%c0_5, %c0_6] : memref<16x384xf32, #tpu.memory_space<vmem>>, vector<16x384xf32>
    %cst = arith.constant dense<0.000000e+00> : vector<64x384xf32>
    %7 = tpu.matmul %5, %6, %cst {dimension_numbers = #tpu.dot_dimension_numbers<[1], [0], [0], [1], [0, 0, 1, 1], [], []>} : vector<64x16xf32>, vector<16x384xf32>, vector<64x384xf32> -> vector<64x384xf32>
    %c0_7 = arith.constant 0 : index
    %c0_8 = arith.constant 0 : index
    %8 = vector.load %arg5[%c0_7, %c0_8] : memref<1x384xf32, #tpu.memory_space<vmem>>, vector<1x384xf32>
    %9 = vector.broadcast %8 : vector<1x384xf32> to vector<64x384xf32>
    %10 = arith.addf %7, %9 : vector<64x384xf32>
    %11 = vector.shape_cast %10 : vector<64x384xf32> to vector<8x8x384xf32>
    %c0_9 = arith.constant 0 : index
    %c0_10 = arith.constant 0 : index
    %12 = vector.load %arg4[%c0_9, %c0_10] : memref<128x384xf32, #tpu.memory_space<vmem>>, vector<128x384xf32>
    %c0_11 = arith.constant 0 : index
    %c0_12 = arith.constant 0 : index
    %13 = vector.load %arg6[%c0_11, %c0_12] : memref<1x128xf32, #tpu.memory_space<vmem>>, vector<1x128xf32>
    %cst_13 = arith.constant dense<0.000000e+00> : vector<8x384xf32>
    %14 = tpu.matmul %3, %12, %cst_13 {dimension_numbers = #tpu.dot_dimension_numbers<[1], [0], [0], [1], [0, 0, 1, 1], [], []>} : vector<8x128xf32>, vector<128x384xf32>, vector<8x384xf32> -> vector<8x384xf32>
    %15 = vector.extract_strided_slice %11 {offsets = [0, 0, 0], sizes = [8, 1, 384], strides = [1, 1, 1]} : vector<8x8x384xf32> to vector<8x1x384xf32>
    %16 = vector.shape_cast %15 : vector<8x1x384xf32> to vector<8x384xf32>
    %17 = vector.extract_strided_slice %16 {offsets = [0, 0], sizes = [8, 128], strides = [1, 1]} : vector<8x384xf32> to vector<8x128xf32>
    %18 = vector.extract_strided_slice %14 {offsets = [0, 0], sizes = [8, 128], strides = [1, 1]} : vector<8x384xf32> to vector<8x128xf32>
    %19 = arith.addf %17, %18 : vector<8x128xf32>
    %20 = arith.negf %19 : vector<8x128xf32>
    %21 = math.exp %20 : vector<8x128xf32>
    %cst_14 = arith.constant 1.000000e+00 : f32
    %22 = vector.broadcast %cst_14 : f32 to vector<8x128xf32>
    %23 = arith.addf %22, %21 : vector<8x128xf32>
    %24 = arith.divf %22, %23 : vector<8x128xf32>
    %25 = vector.extract_strided_slice %16 {offsets = [0, 128], sizes = [8, 128], strides = [1, 1]} : vector<8x384xf32> to vector<8x128xf32>
    %26 = vector.extract_strided_slice %14 {offsets = [0, 128], sizes = [8, 128], strides = [1, 1]} : vector<8x384xf32> to vector<8x128xf32>
    %27 = arith.addf %25, %26 : vector<8x128xf32>
    %28 = arith.negf %27 : vector<8x128xf32>
    %29 = math.exp %28 : vector<8x128xf32>
    %cst_15 = arith.constant 1.000000e+00 : f32
    %30 = vector.broadcast %cst_15 : f32 to vector<8x128xf32>
    %31 = arith.addf %30, %29 : vector<8x128xf32>
    %32 = arith.divf %30, %31 : vector<8x128xf32>
    %33 = vector.extract_strided_slice %16 {offsets = [0, 256], sizes = [8, 128], strides = [1, 1]} : vector<8x384xf32> to vector<8x128xf32>
    %34 = vector.extract_strided_slice %14 {offsets = [0, 256], sizes = [8, 128], strides = [1, 1]} : vector<8x384xf32> to vector<8x128xf32>
    %35 = vector.broadcast %13 : vector<1x128xf32> to vector<8x128xf32>
    %36 = arith.addf %34, %35 : vector<8x128xf32>
    %37 = arith.mulf %24, %36 : vector<8x128xf32>
    %38 = arith.addf %33, %37 : vector<8x128xf32>
    %39 = math.tanh %38 : vector<8x128xf32>
    %cst_16 = arith.constant 1.000000e+00 : f32
    %40 = vector.broadcast %cst_16 : f32 to vector<8x128xf32>
    %41 = arith.subf %40, %32 : vector<8x128xf32>
    %42 = arith.mulf %41, %39 : vector<8x128xf32>
    %43 = arith.mulf %32, %3 : vector<8x128xf32>
    %44 = arith.addf %42, %43 : vector<8x128xf32>
    %c0_17 = arith.constant 0 : index
    %c0_18 = arith.constant 0 : index
    %c0_19 = arith.constant 0 : index
    %45 = vector.load %arg7[%c0_17, %c0_18, %c0_19] : memref<8x8x128xf32, #tpu.memory_space<vmem>>, vector<8x1x128xf32>
    %46 = vector.shape_cast %45 : vector<8x1x128xf32> to vector<8x128xf32>
    %47 = vector.shape_cast %44 : vector<8x128xf32> to vector<8x1x128xf32>
    tpu.vector_store %arg7[%c0_17, %c0_18, %c0_19], %47 {strides = array<i32>} : memref<8x8x128xf32, #tpu.memory_space<vmem>>, vector<8x1x128xf32>,
    %cst_20 = arith.constant dense<0.000000e+00> : vector<8x384xf32>
    %48 = tpu.matmul %44, %12, %cst_20 {dimension_numbers = #tpu.dot_dimension_numbers<[1], [0], [0], [1], [0, 0, 1, 1], [], []>} : vector<8x128xf32>, vector<128x384xf32>, vector<8x384xf32> -> vector<8x384xf32>
    %49 = vector.extract_strided_slice %11 {offsets = [0, 1, 0], sizes = [8, 1, 384], strides = [1, 1, 1]} : vector<8x8x384xf32> to vector<8x1x384xf32>
    %50 = vector.shape_cast %49 : vector<8x1x384xf32> to vector<8x384xf32>
    %51 = vector.extract_strided_slice %50 {offsets = [0, 0], sizes = [8, 128], strides = [1, 1]} : vector<8x384xf32> to vector<8x128xf32>
    %52 = vector.extract_strided_slice %48 {offsets = [0, 0], sizes = [8, 128], strides = [1, 1]} : vector<8x384xf32> to vector<8x128xf32>
    %53 = arith.addf %51, %52 : vector<8x128xf32>
    %54 = arith.negf %53 : vector<8x128xf32>
    %55 = math.exp %54 : vector<8x128xf32>
    %cst_21 = arith.constant 1.000000e+00 : f32
    %56 = vector.broadcast %cst_21 : f32 to vector<8x128xf32>
    %57 = arith.addf %56, %55 : vector<8x128xf32>
    %58 = arith.divf %56, %57 : vector<8x128xf32>
    %59 = vector.extract_strided_slice %50 {offsets = [0, 128], sizes = [8, 128], strides = [1, 1]} : vector<8x384xf32> to vector<8x128xf32>
    %60 = vector.extract_strided_slice %48 {offsets = [0, 128], sizes = [8, 128], strides = [1, 1]} : vector<8x384xf32> to vector<8x128xf32>
    %61 = arith.addf %59, %60 : vector<8x128xf32>
    %62 = arith.negf %61 : vector<8x128xf32>
    %63 = math.exp %62 : vector<8x128xf32>
    %cst_22 = arith.constant 1.000000e+00 : f32
    %64 = vector.broadcast %cst_22 : f32 to vector<8x128xf32>
    %65 = arith.addf %64, %63 : vector<8x128xf32>
    %66 = arith.divf %64, %65 : vector<8x128xf32>
    %67 = vector.extract_strided_slice %50 {offsets = [0, 256], sizes = [8, 128], strides = [1, 1]} : vector<8x384xf32> to vector<8x128xf32>
    %68 = vector.extract_strided_slice %48 {offsets = [0, 256], sizes = [8, 128], strides = [1, 1]} : vector<8x384xf32> to vector<8x128xf32>
    %69 = vector.broadcast %13 : vector<1x128xf32> to vector<8x128xf32>
    %70 = arith.addf %68, %69 : vector<8x128xf32>
    %71 = arith.mulf %58, %70 : vector<8x128xf32>
    %72 = arith.addf %67, %71 : vector<8x128xf32>
    %73 = math.tanh %72 : vector<8x128xf32>
    %cst_23 = arith.constant 1.000000e+00 : f32
    %74 = vector.broadcast %cst_23 : f32 to vector<8x128xf32>
    %75 = arith.subf %74, %66 : vector<8x128xf32>
    %76 = arith.mulf %75, %73 : vector<8x128xf32>
    %77 = arith.mulf %66, %44 : vector<8x128xf32>
    %78 = arith.addf %76, %77 : vector<8x128xf32>
    %c0_24 = arith.constant 0 : index
    %c1 = arith.constant 1 : index
    %c0_25 = arith.constant 0 : index
    %79 = vector.load %arg7[%c0_24, %c1, %c0_25] : memref<8x8x128xf32, #tpu.memory_space<vmem>>, vector<8x1x128xf32>
    %80 = vector.shape_cast %79 : vector<8x1x128xf32> to vector<8x128xf32>
    %81 = vector.shape_cast %78 : vector<8x128xf32> to vector<8x1x128xf32>
    tpu.vector_store %arg7[%c0_24, %c1, %c0_25], %81 {strides = array<i32>} : memref<8x8x128xf32, #tpu.memory_space<vmem>>, vector<8x1x128xf32>,
    %cst_26 = arith.constant dense<0.000000e+00> : vector<8x384xf32>
    %82 = tpu.matmul %78, %12, %cst_26 {dimension_numbers = #tpu.dot_dimension_numbers<[1], [0], [0], [1], [0, 0, 1, 1], [], []>} : vector<8x128xf32>, vector<128x384xf32>, vector<8x384xf32> -> vector<8x384xf32>
    %83 = vector.extract_strided_slice %11 {offsets = [0, 2, 0], sizes = [8, 1, 384], strides = [1, 1, 1]} : vector<8x8x384xf32> to vector<8x1x384xf32>
    %84 = vector.shape_cast %83 : vector<8x1x384xf32> to vector<8x384xf32>
    %85 = vector.extract_strided_slice %84 {offsets = [0, 0], sizes = [8, 128], strides = [1, 1]} : vector<8x384xf32> to vector<8x128xf32>
    %86 = vector.extract_strided_slice %82 {offsets = [0, 0], sizes = [8, 128], strides = [1, 1]} : vector<8x384xf32> to vector<8x128xf32>
    %87 = arith.addf %85, %86 : vector<8x128xf32>
    %88 = arith.negf %87 : vector<8x128xf32>
    %89 = math.exp %88 : vector<8x128xf32>
    %cst_27 = arith.constant 1.000000e+00 : f32
    %90 = vector.broadcast %cst_27 : f32 to vector<8x128xf32>
    %91 = arith.addf %90, %89 : vector<8x128xf32>
    %92 = arith.divf %90, %91 : vector<8x128xf32>
    %93 = vector.extract_strided_slice %84 {offsets = [0, 128], sizes = [8, 128], strides = [1, 1]} : vector<8x384xf32> to vector<8x128xf32>
    %94 = vector.extract_strided_slice %82 {offsets = [0, 128], sizes = [8, 128], strides = [1, 1]} : vector<8x384xf32> to vector<8x128xf32>
    %95 = arith.addf %93, %94 : vector<8x128xf32>
    %96 = arith.negf %95 : vector<8x128xf32>
    %97 = math.exp %96 : vector<8x128xf32>
    %cst_28 = arith.constant 1.000000e+00 : f32
    %98 = vector.broadcast %cst_28 : f32 to vector<8x128xf32>
    %99 = arith.addf %98, %97 : vector<8x128xf32>
    %100 = arith.divf %98, %99 : vector<8x128xf32>
    %101 = vector.extract_strided_slice %84 {offsets = [0, 256], sizes = [8, 128], strides = [1, 1]} : vector<8x384xf32> to vector<8x128xf32>
    %102 = vector.extract_strided_slice %82 {offsets = [0, 256], sizes = [8, 128], strides = [1, 1]} : vector<8x384xf32> to vector<8x128xf32>
    %103 = vector.broadcast %13 : vector<1x128xf32> to vector<8x128xf32>
    %104 = arith.addf %102, %103 : vector<8x128xf32>
    %105 = arith.mulf %92, %104 : vector<8x128xf32>
    %106 = arith.addf %101, %105 : vector<8x128xf32>
    %107 = math.tanh %106 : vector<8x128xf32>
    %cst_29 = arith.constant 1.000000e+00 : f32
    %108 = vector.broadcast %cst_29 : f32 to vector<8x128xf32>
    %109 = arith.subf %108, %100 : vector<8x128xf32>
    %110 = arith.mulf %109, %107 : vector<8x128xf32>
    %111 = arith.mulf %100, %78 : vector<8x128xf32>
    %112 = arith.addf %110, %111 : vector<8x128xf32>
    %c0_30 = arith.constant 0 : index
    %c2 = arith.constant 2 : index
    %c0_31 = arith.constant 0 : index
    %113 = vector.load %arg7[%c0_30, %c2, %c0_31] : memref<8x8x128xf32, #tpu.memory_space<vmem>>, vector<8x1x128xf32>
    %114 = vector.shape_cast %113 : vector<8x1x128xf32> to vector<8x128xf32>
    %115 = vector.shape_cast %112 : vector<8x128xf32> to vector<8x1x128xf32>
    tpu.vector_store %arg7[%c0_30, %c2, %c0_31], %115 {strides = array<i32>} : memref<8x8x128xf32, #tpu.memory_space<vmem>>, vector<8x1x128xf32>,
    %cst_32 = arith.constant dense<0.000000e+00> : vector<8x384xf32>
    %116 = tpu.matmul %112, %12, %cst_32 {dimension_numbers = #tpu.dot_dimension_numbers<[1], [0], [0], [1], [0, 0, 1, 1], [], []>} : vector<8x128xf32>, vector<128x384xf32>, vector<8x384xf32> -> vector<8x384xf32>
    %117 = vector.extract_strided_slice %11 {offsets = [0, 3, 0], sizes = [8, 1, 384], strides = [1, 1, 1]} : vector<8x8x384xf32> to vector<8x1x384xf32>
    %118 = vector.shape_cast %117 : vector<8x1x384xf32> to vector<8x384xf32>
    %119 = vector.extract_strided_slice %118 {offsets = [0, 0], sizes = [8, 128], strides = [1, 1]} : vector<8x384xf32> to vector<8x128xf32>
    %120 = vector.extract_strided_slice %116 {offsets = [0, 0], sizes = [8, 128], strides = [1, 1]} : vector<8x384xf32> to vector<8x128xf32>
    %121 = arith.addf %119, %120 : vector<8x128xf32>
    %122 = arith.negf %121 : vector<8x128xf32>
    %123 = math.exp %122 : vector<8x128xf32>
    %cst_33 = arith.constant 1.000000e+00 : f32
    %124 = vector.broadcast %cst_33 : f32 to vector<8x128xf32>
    %125 = arith.addf %124, %123 : vector<8x128xf32>
    %126 = arith.divf %124, %125 : vector<8x128xf32>
    %127 = vector.extract_strided_slice %118 {offsets = [0, 128], sizes = [8, 128], strides = [1, 1]} : vector<8x384xf32> to vector<8x128xf32>
    %128 = vector.extract_strided_slice %116 {offsets = [0, 128], sizes = [8, 128], strides = [1, 1]} : vector<8x384xf32> to vector<8x128xf32>
    %129 = arith.addf %127, %128 : vector<8x128xf32>
    %130 = arith.negf %129 : vector<8x128xf32>
    %131 = math.exp %130 : vector<8x128xf32>
    %cst_34 = arith.constant 1.000000e+00 : f32
    %132 = vector.broadcast %cst_34 : f32 to vector<8x128xf32>
    %133 = arith.addf %132, %131 : vector<8x128xf32>
    %134 = arith.divf %132, %133 : vector<8x128xf32>
    %135 = vector.extract_strided_slice %118 {offsets = [0, 256], sizes = [8, 128], strides = [1, 1]} : vector<8x384xf32> to vector<8x128xf32>
    %136 = vector.extract_strided_slice %116 {offsets = [0, 256], sizes = [8, 128], strides = [1, 1]} : vector<8x384xf32> to vector<8x128xf32>
    %137 = vector.broadcast %13 : vector<1x128xf32> to vector<8x128xf32>
    %138 = arith.addf %136, %137 : vector<8x128xf32>
    %139 = arith.mulf %126, %138 : vector<8x128xf32>
    %140 = arith.addf %135, %139 : vector<8x128xf32>
    %141 = math.tanh %140 : vector<8x128xf32>
    %cst_35 = arith.constant 1.000000e+00 : f32
    %142 = vector.broadcast %cst_35 : f32 to vector<8x128xf32>
    %143 = arith.subf %142, %134 : vector<8x128xf32>
    %144 = arith.mulf %143, %141 : vector<8x128xf32>
    %145 = arith.mulf %134, %112 : vector<8x128xf32>
    %146 = arith.addf %144, %145 : vector<8x128xf32>
    %c0_36 = arith.constant 0 : index
    %c3 = arith.constant 3 : index
    %c0_37 = arith.constant 0 : index
    %147 = vector.load %arg7[%c0_36, %c3, %c0_37] : memref<8x8x128xf32, #tpu.memory_space<vmem>>, vector<8x1x128xf32>
    %148 = vector.shape_cast %147 : vector<8x1x128xf32> to vector<8x128xf32>
    %149 = vector.shape_cast %146 : vector<8x128xf32> to vector<8x1x128xf32>
    tpu.vector_store %arg7[%c0_36, %c3, %c0_37], %149 {strides = array<i32>} : memref<8x8x128xf32, #tpu.memory_space<vmem>>, vector<8x1x128xf32>,
    %cst_38 = arith.constant dense<0.000000e+00> : vector<8x384xf32>
    %150 = tpu.matmul %146, %12, %cst_38 {dimension_numbers = #tpu.dot_dimension_numbers<[1], [0], [0], [1], [0, 0, 1, 1], [], []>} : vector<8x128xf32>, vector<128x384xf32>, vector<8x384xf32> -> vector<8x384xf32>
    %151 = vector.extract_strided_slice %11 {offsets = [0, 4, 0], sizes = [8, 1, 384], strides = [1, 1, 1]} : vector<8x8x384xf32> to vector<8x1x384xf32>
    %152 = vector.shape_cast %151 : vector<8x1x384xf32> to vector<8x384xf32>
    %153 = vector.extract_strided_slice %152 {offsets = [0, 0], sizes = [8, 128], strides = [1, 1]} : vector<8x384xf32> to vector<8x128xf32>
    %154 = vector.extract_strided_slice %150 {offsets = [0, 0], sizes = [8, 128], strides = [1, 1]} : vector<8x384xf32> to vector<8x128xf32>
    %155 = arith.addf %153, %154 : vector<8x128xf32>
    %156 = arith.negf %155 : vector<8x128xf32>
    %157 = math.exp %156 : vector<8x128xf32>
    %cst_39 = arith.constant 1.000000e+00 : f32
    %158 = vector.broadcast %cst_39 : f32 to vector<8x128xf32>
    %159 = arith.addf %158, %157 : vector<8x128xf32>
    %160 = arith.divf %158, %159 : vector<8x128xf32>
    %161 = vector.extract_strided_slice %152 {offsets = [0, 128], sizes = [8, 128], strides = [1, 1]} : vector<8x384xf32> to vector<8x128xf32>
    %162 = vector.extract_strided_slice %150 {offsets = [0, 128], sizes = [8, 128], strides = [1, 1]} : vector<8x384xf32> to vector<8x128xf32>
    %163 = arith.addf %161, %162 : vector<8x128xf32>
    %164 = arith.negf %163 : vector<8x128xf32>
    %165 = math.exp %164 : vector<8x128xf32>
    %cst_40 = arith.constant 1.000000e+00 : f32
    %166 = vector.broadcast %cst_40 : f32 to vector<8x128xf32>
    %167 = arith.addf %166, %165 : vector<8x128xf32>
    %168 = arith.divf %166, %167 : vector<8x128xf32>
    %169 = vector.extract_strided_slice %152 {offsets = [0, 256], sizes = [8, 128], strides = [1, 1]} : vector<8x384xf32> to vector<8x128xf32>
    %170 = vector.extract_strided_slice %150 {offsets = [0, 256], sizes = [8, 128], strides = [1, 1]} : vector<8x384xf32> to vector<8x128xf32>
    %171 = vector.broadcast %13 : vector<1x128xf32> to vector<8x128xf32>
    %172 = arith.addf %170, %171 : vector<8x128xf32>
    %173 = arith.mulf %160, %172 : vector<8x128xf32>
    %174 = arith.addf %169, %173 : vector<8x128xf32>
    %175 = math.tanh %174 : vector<8x128xf32>
    %cst_41 = arith.constant 1.000000e+00 : f32
    %176 = vector.broadcast %cst_41 : f32 to vector<8x128xf32>
    %177 = arith.subf %176, %168 : vector<8x128xf32>
    %178 = arith.mulf %177, %175 : vector<8x128xf32>
    %179 = arith.mulf %168, %146 : vector<8x128xf32>
    %180 = arith.addf %178, %179 : vector<8x128xf32>
    %c0_42 = arith.constant 0 : index
    %c4 = arith.constant 4 : index
    %c0_43 = arith.constant 0 : index
    %181 = vector.load %arg7[%c0_42, %c4, %c0_43] : memref<8x8x128xf32, #tpu.memory_space<vmem>>, vector<8x1x128xf32>
    %182 = vector.shape_cast %181 : vector<8x1x128xf32> to vector<8x128xf32>
    %183 = vector.shape_cast %180 : vector<8x128xf32> to vector<8x1x128xf32>
    tpu.vector_store %arg7[%c0_42, %c4, %c0_43], %183 {strides = array<i32>} : memref<8x8x128xf32, #tpu.memory_space<vmem>>, vector<8x1x128xf32>,
    %cst_44 = arith.constant dense<0.000000e+00> : vector<8x384xf32>
    %184 = tpu.matmul %180, %12, %cst_44 {dimension_numbers = #tpu.dot_dimension_numbers<[1], [0], [0], [1], [0, 0, 1, 1], [], []>} : vector<8x128xf32>, vector<128x384xf32>, vector<8x384xf32> -> vector<8x384xf32>
    %185 = vector.extract_strided_slice %11 {offsets = [0, 5, 0], sizes = [8, 1, 384], strides = [1, 1, 1]} : vector<8x8x384xf32> to vector<8x1x384xf32>
    %186 = vector.shape_cast %185 : vector<8x1x384xf32> to vector<8x384xf32>
    %187 = vector.extract_strided_slice %186 {offsets = [0, 0], sizes = [8, 128], strides = [1, 1]} : vector<8x384xf32> to vector<8x128xf32>
    %188 = vector.extract_strided_slice %184 {offsets = [0, 0], sizes = [8, 128], strides = [1, 1]} : vector<8x384xf32> to vector<8x128xf32>
    %189 = arith.addf %187, %188 : vector<8x128xf32>
    %190 = arith.negf %189 : vector<8x128xf32>
    %191 = math.exp %190 : vector<8x128xf32>
    %cst_45 = arith.constant 1.000000e+00 : f32
    %192 = vector.broadcast %cst_45 : f32 to vector<8x128xf32>
    %193 = arith.addf %192, %191 : vector<8x128xf32>
    %194 = arith.divf %192, %193 : vector<8x128xf32>
    %195 = vector.extract_strided_slice %186 {offsets = [0, 128], sizes = [8, 128], strides = [1, 1]} : vector<8x384xf32> to vector<8x128xf32>
    %196 = vector.extract_strided_slice %184 {offsets = [0, 128], sizes = [8, 128], strides = [1, 1]} : vector<8x384xf32> to vector<8x128xf32>
    %197 = arith.addf %195, %196 : vector<8x128xf32>
    %198 = arith.negf %197 : vector<8x128xf32>
    %199 = math.exp %198 : vector<8x128xf32>
    %cst_46 = arith.constant 1.000000e+00 : f32
    %200 = vector.broadcast %cst_46 : f32 to vector<8x128xf32>
    %201 = arith.addf %200, %199 : vector<8x128xf32>
    %202 = arith.divf %200, %201 : vector<8x128xf32>
    %203 = vector.extract_strided_slice %186 {offsets = [0, 256], sizes = [8, 128], strides = [1, 1]} : vector<8x384xf32> to vector<8x128xf32>
    %204 = vector.extract_strided_slice %184 {offsets = [0, 256], sizes = [8, 128], strides = [1, 1]} : vector<8x384xf32> to vector<8x128xf32>
    %205 = vector.broadcast %13 : vector<1x128xf32> to vector<8x128xf32>
    %206 = arith.addf %204, %205 : vector<8x128xf32>
    %207 = arith.mulf %194, %206 : vector<8x128xf32>
    %208 = arith.addf %203, %207 : vector<8x128xf32>
    %209 = math.tanh %208 : vector<8x128xf32>
    %cst_47 = arith.constant 1.000000e+00 : f32
    %210 = vector.broadcast %cst_47 : f32 to vector<8x128xf32>
    %211 = arith.subf %210, %202 : vector<8x128xf32>
    %212 = arith.mulf %211, %209 : vector<8x128xf32>
    %213 = arith.mulf %202, %180 : vector<8x128xf32>
    %214 = arith.addf %212, %213 : vector<8x128xf32>
    %c0_48 = arith.constant 0 : index
    %c5 = arith.constant 5 : index
    %c0_49 = arith.constant 0 : index
    %215 = vector.load %arg7[%c0_48, %c5, %c0_49] : memref<8x8x128xf32, #tpu.memory_space<vmem>>, vector<8x1x128xf32>
    %216 = vector.shape_cast %215 : vector<8x1x128xf32> to vector<8x128xf32>
    %217 = vector.shape_cast %214 : vector<8x128xf32> to vector<8x1x128xf32>
    tpu.vector_store %arg7[%c0_48, %c5, %c0_49], %217 {strides = array<i32>} : memref<8x8x128xf32, #tpu.memory_space<vmem>>, vector<8x1x128xf32>,
    %cst_50 = arith.constant dense<0.000000e+00> : vector<8x384xf32>
    %218 = tpu.matmul %214, %12, %cst_50 {dimension_numbers = #tpu.dot_dimension_numbers<[1], [0], [0], [1], [0, 0, 1, 1], [], []>} : vector<8x128xf32>, vector<128x384xf32>, vector<8x384xf32> -> vector<8x384xf32>
    %219 = vector.extract_strided_slice %11 {offsets = [0, 6, 0], sizes = [8, 1, 384], strides = [1, 1, 1]} : vector<8x8x384xf32> to vector<8x1x384xf32>
    %220 = vector.shape_cast %219 : vector<8x1x384xf32> to vector<8x384xf32>
    %221 = vector.extract_strided_slice %220 {offsets = [0, 0], sizes = [8, 128], strides = [1, 1]} : vector<8x384xf32> to vector<8x128xf32>
    %222 = vector.extract_strided_slice %218 {offsets = [0, 0], sizes = [8, 128], strides = [1, 1]} : vector<8x384xf32> to vector<8x128xf32>
    %223 = arith.addf %221, %222 : vector<8x128xf32>
    %224 = arith.negf %223 : vector<8x128xf32>
    %225 = math.exp %224 : vector<8x128xf32>
    %cst_51 = arith.constant 1.000000e+00 : f32
    %226 = vector.broadcast %cst_51 : f32 to vector<8x128xf32>
    %227 = arith.addf %226, %225 : vector<8x128xf32>
    %228 = arith.divf %226, %227 : vector<8x128xf32>
    %229 = vector.extract_strided_slice %220 {offsets = [0, 128], sizes = [8, 128], strides = [1, 1]} : vector<8x384xf32> to vector<8x128xf32>
    %230 = vector.extract_strided_slice %218 {offsets = [0, 128], sizes = [8, 128], strides = [1, 1]} : vector<8x384xf32> to vector<8x128xf32>
    %231 = arith.addf %229, %230 : vector<8x128xf32>
    %232 = arith.negf %231 : vector<8x128xf32>
    %233 = math.exp %232 : vector<8x128xf32>
    %cst_52 = arith.constant 1.000000e+00 : f32
    %234 = vector.broadcast %cst_52 : f32 to vector<8x128xf32>
    %235 = arith.addf %234, %233 : vector<8x128xf32>
    %236 = arith.divf %234, %235 : vector<8x128xf32>
    %237 = vector.extract_strided_slice %220 {offsets = [0, 256], sizes = [8, 128], strides = [1, 1]} : vector<8x384xf32> to vector<8x128xf32>
    %238 = vector.extract_strided_slice %218 {offsets = [0, 256], sizes = [8, 128], strides = [1, 1]} : vector<8x384xf32> to vector<8x128xf32>
    %239 = vector.broadcast %13 : vector<1x128xf32> to vector<8x128xf32>
    %240 = arith.addf %238, %239 : vector<8x128xf32>
    %241 = arith.mulf %228, %240 : vector<8x128xf32>
    %242 = arith.addf %237, %241 : vector<8x128xf32>
    %243 = math.tanh %242 : vector<8x128xf32>
    %cst_53 = arith.constant 1.000000e+00 : f32
    %244 = vector.broadcast %cst_53 : f32 to vector<8x128xf32>
    %245 = arith.subf %244, %236 : vector<8x128xf32>
    %246 = arith.mulf %245, %243 : vector<8x128xf32>
    %247 = arith.mulf %236, %214 : vector<8x128xf32>
    %248 = arith.addf %246, %247 : vector<8x128xf32>
    %c0_54 = arith.constant 0 : index
    %c6 = arith.constant 6 : index
    %c0_55 = arith.constant 0 : index
    %249 = vector.load %arg7[%c0_54, %c6, %c0_55] : memref<8x8x128xf32, #tpu.memory_space<vmem>>, vector<8x1x128xf32>
    %250 = vector.shape_cast %249 : vector<8x1x128xf32> to vector<8x128xf32>
    %251 = vector.shape_cast %248 : vector<8x128xf32> to vector<8x1x128xf32>
    tpu.vector_store %arg7[%c0_54, %c6, %c0_55], %251 {strides = array<i32>} : memref<8x8x128xf32, #tpu.memory_space<vmem>>, vector<8x1x128xf32>,
    %cst_56 = arith.constant dense<0.000000e+00> : vector<8x384xf32>
    %252 = tpu.matmul %248, %12, %cst_56 {dimension_numbers = #tpu.dot_dimension_numbers<[1], [0], [0], [1], [0, 0, 1, 1], [], []>} : vector<8x128xf32>, vector<128x384xf32>, vector<8x384xf32> -> vector<8x384xf32>
    %253 = vector.extract_strided_slice %11 {offsets = [0, 7, 0], sizes = [8, 1, 384], strides = [1, 1, 1]} : vector<8x8x384xf32> to vector<8x1x384xf32>
    %254 = vector.shape_cast %253 : vector<8x1x384xf32> to vector<8x384xf32>
    %255 = vector.extract_strided_slice %254 {offsets = [0, 0], sizes = [8, 128], strides = [1, 1]} : vector<8x384xf32> to vector<8x128xf32>
    %256 = vector.extract_strided_slice %252 {offsets = [0, 0], sizes = [8, 128], strides = [1, 1]} : vector<8x384xf32> to vector<8x128xf32>
    %257 = arith.addf %255, %256 : vector<8x128xf32>
    %258 = arith.negf %257 : vector<8x128xf32>
    %259 = math.exp %258 : vector<8x128xf32>
    %cst_57 = arith.constant 1.000000e+00 : f32
    %260 = vector.broadcast %cst_57 : f32 to vector<8x128xf32>
    %261 = arith.addf %260, %259 : vector<8x128xf32>
    %262 = arith.divf %260, %261 : vector<8x128xf32>
    %263 = vector.extract_strided_slice %254 {offsets = [0, 128], sizes = [8, 128], strides = [1, 1]} : vector<8x384xf32> to vector<8x128xf32>
    %264 = vector.extract_strided_slice %252 {offsets = [0, 128], sizes = [8, 128], strides = [1, 1]} : vector<8x384xf32> to vector<8x128xf32>
    %265 = arith.addf %263, %264 : vector<8x128xf32>
    %266 = arith.negf %265 : vector<8x128xf32>
    %267 = math.exp %266 : vector<8x128xf32>
    %cst_58 = arith.constant 1.000000e+00 : f32
    %268 = vector.broadcast %cst_58 : f32 to vector<8x128xf32>
    %269 = arith.addf %268, %267 : vector<8x128xf32>
    %270 = arith.divf %268, %269 : vector<8x128xf32>
    %271 = vector.extract_strided_slice %254 {offsets = [0, 256], sizes = [8, 128], strides = [1, 1]} : vector<8x384xf32> to vector<8x128xf32>
    %272 = vector.extract_strided_slice %252 {offsets = [0, 256], sizes = [8, 128], strides = [1, 1]} : vector<8x384xf32> to vector<8x128xf32>
    %273 = vector.broadcast %13 : vector<1x128xf32> to vector<8x128xf32>
    %274 = arith.addf %272, %273 : vector<8x128xf32>
    %275 = arith.mulf %262, %274 : vector<8x128xf32>
    %276 = arith.addf %271, %275 : vector<8x128xf32>
    %277 = math.tanh %276 : vector<8x128xf32>
    %cst_59 = arith.constant 1.000000e+00 : f32
    %278 = vector.broadcast %cst_59 : f32 to vector<8x128xf32>
    %279 = arith.subf %278, %270 : vector<8x128xf32>
    %280 = arith.mulf %279, %277 : vector<8x128xf32>
    %281 = arith.mulf %270, %248 : vector<8x128xf32>
    %282 = arith.addf %280, %281 : vector<8x128xf32>
    %c0_60 = arith.constant 0 : index
    %c7 = arith.constant 7 : index
    %c0_61 = arith.constant 0 : index
    %283 = vector.load %arg7[%c0_60, %c7, %c0_61] : memref<8x8x128xf32, #tpu.memory_space<vmem>>, vector<8x1x128xf32>
    %284 = vector.shape_cast %283 : vector<8x1x128xf32> to vector<8x128xf32>
    %285 = vector.shape_cast %282 : vector<8x128xf32> to vector<8x1x128xf32>
    tpu.vector_store %arg7[%c0_60, %c7, %c0_61], %285 {strides = array<i32>} : memref<8x8x128xf32, #tpu.memory_space<vmem>>, vector<8x1x128xf32>,
    %c0_62 = arith.constant 0 : index
    %c0_63 = arith.constant 0 : index
    %286 = vector.load %arg8[%c0_62, %c0_63] : memref<8x128xf32, #tpu.memory_space<vmem>>, vector<8x128xf32>
    tpu.vector_store %arg8[%c0_62, %c0_63], %282 {strides = array<i32>} : memref<8x128xf32, #tpu.memory_space<vmem>>, vector<8x128xf32>,
    return
  }
  func.func @transform_0(%arg0: i32, %arg1: i32) -> (i32, i32, i32) {
    %c0_i32 = arith.constant 0 : i32
    %c0_i32_0 = arith.constant 0 : i32
    return %arg0, %arg1, %c0_i32 : i32, i32, i32
  }
  func.func @transform_1(%arg0: i32, %arg1: i32) -> (i32, i32) {
    %c0_i32 = arith.constant 0 : i32
    %c0_i32_0 = arith.constant 0 : i32
    %c0_i32_1 = arith.constant 0 : i32
    return %c0_i32, %c0_i32_0 : i32, i32
  }
  func.func @transform_2(%arg0: i32, %arg1: i32) -> (i32, i32) {
    %c0_i32 = arith.constant 0 : i32
    %c0_i32_0 = arith.constant 0 : i32
    %c0_i32_1 = arith.constant 0 : i32
    return %c0_i32, %c0_i32_0 : i32, i32
  }
  func.func @transform_3(%arg0: i32, %arg1: i32) -> (i32, i32) {
    %c0_i32 = arith.constant 0 : i32
    %c0_i32_0 = arith.constant 0 : i32
    %c0_i32_1 = arith.constant 0 : i32
    return %c0_i32, %c0_i32_0 : i32, i32
  }
  func.func @transform_4(%arg0: i32, %arg1: i32) -> (i32, i32) {
    %c0_i32 = arith.constant 0 : i32
    %c0_i32_0 = arith.constant 0 : i32
    %c0_i32_1 = arith.constant 0 : i32
    return %c0_i32, %c0_i32_0 : i32, i32
  }
  func.func @transform_5(%arg0: i32, %arg1: i32) -> (i32, i32, i32) {
    %c0_i32 = arith.constant 0 : i32
    %c0_i32_0 = arith.constant 0 : i32
    return %arg0, %arg1, %c0_i32 : i32, i32, i32
  }
}

</mosaic_0001>

<bundles_post_ra>
// kernel: tpu_custom_call.1
= control target key start
LH: loop header
LB: loop body
LE: loop exit
PB: predicated region body
PF: predicated region fallthrough
CT: control target
= control target key end

     0   :  { %10 = vsyncpa [#allocation4], 0  ;;  %s6707_s0 = inlined_call_operand.hbm [shape: f32[8,8,16], index: 0, kind: input, shape index: {}]   ;;  %s6708_s1 = inlined_call_operand.hbm [shape: f32[16,384], index: 1, kind: input, shape index: {}]   ;;  %s6709_s2 = inlined_call_operand.hbm [shape: f32[128,384], index: 2, kind: input, shape index: {}]   ;;  %s6710_s3 = inlined_call_operand.vmem [shape: f32[1,384], index: 3, kind: input, shape index: {}]   ;;  %s6711_s4 = inlined_call_operand.vmem [shape: f32[1,128], index: 4, kind: input, shape index: {}]   ;;  %s6712_s5 = inlined_call_operand.hbm [shape: f32[8,8,128], index: 5, kind: output, shape index: {}]  }
   0x1   :  { %11 = vsyncpa [#allocation7], 0 }
   0x2   :  { %12 = vsyncpa [#allocation5], 0  ;;  %s5451_s18 = smov [#allocation6]   ;;  %s5357_s22 = scalar_lea.hbm %s6708_s1, 768 }
   0x3   :  { %s30_s19 = sshll.u32 %s5451_s18, 4  ;;  %p5358_p0 = scmp.ne.s32.totalorder %s6708_s1, %s5357_s22  ;;  %s31_s19 = int_to_ptr.vmem [resolvable:$true] %s30_s19 }
   0x4   :  { %p5361_p1 = scmp.lt.u32.totalorder %s5357_s22, %s6708_s1 }
   0x6   :  { %p5363_p2 = pnand %p5361_p1, %p5358_p0 }
   0x8   :  { %5366 = shalt.err (!%p5363_p2)
}
   0x9   :  { %s5367_s27 = scalar_lea.vmem %s31_s19, 768  ;;  %p5372_p4 = scmp.lt.s32.totalorder %s31_s19, %s31_s19 }
   0xa   :  { %p5368_p3 = scmp.ne.s32.totalorder %s31_s19, %s5367_s27  ;;  %p5373_p5 = scmp.lt.s32.totalorder %s5367_s27, %s5367_s27 }
   0xc   :  { %p5374_p6 = por %p5373_p5, %p5372_p4 }
   0xe   :  { %p5375_p7 = pnand %p5374_p6, %p5368_p3 }
  0x10   :  { %5378 = shalt.err (!%p5375_p7)
}
  0x11   :  { %s5452_s28 = smov 384   ;;  %s5453_s29 = smov 24  }
  0x12   :  { %36 = dma.hbm_to_vmem [thread:$0]  %s6708_s1, 768, %s31_s19, [#allocation7], %s5452_s28, %s5452_s28, %s5453_s29  }
  0x13   :  { %s5454_s7 = smov [#allocation3]   ;;  %s5379_s11 = scalar_lea.hbm %s6707_s0, 1024 }
  0x14   :  { %s18_s8 = sshll.u32 %s5454_s7, 4  ;;  %p5380_p8 = scmp.ne.s32.totalorder %s6707_s0, %s5379_s11  ;;  %s19_s8 = int_to_ptr.vmem [resolvable:$true] %s18_s8 }
  0x15   :  { %p5383_p9 = scmp.lt.u32.totalorder %s5379_s11, %s6707_s0 }
  0x17   :  { %p5385_p10 = pnand %p5383_p9, %p5380_p8 }
  0x19   :  { %5388 = shalt.err (!%p5385_p10)
}
  0x1a   :  { %s5389_s16 = scalar_lea.vmem %s19_s8, 1024  ;;  %p5394_p12 = scmp.lt.s32.totalorder %s19_s8, %s19_s8 }
  0x1b   :  { %p5390_p11 = scmp.ne.s32.totalorder %s19_s8, %s5389_s16  ;;  %p5395_p13 = scmp.lt.s32.totalorder %s5389_s16, %s5389_s16 }
  0x1d   :  { %p5396_p0 = por %p5395_p13, %p5394_p12 }
  0x1f   :  { %p5397_p1 = pnand %p5396_p0, %p5390_p11 }
  0x21   :  { %5400 = shalt.err (!%p5397_p1)
}
  0x22   :  { %s5455_s1 = smov 128   ;;  %s5456_s17 = smov 8  }
  0x23   :  { %24 = dma.hbm_to_vmem [thread:$0]  %s6707_s0, 1024, %s19_s8, [#allocation4], %s5455_s1, %s5455_s1, %s5456_s17  }
  0x24   :  { %s5457_s20 = smov [#allocation8]   ;;  %s5401_s24 = scalar_lea.hbm %s6709_s2, 6144 }
  0x25   :  { %s42_s21 = sshll.u32 %s5457_s20, 4  ;;  %p5402_p2 = scmp.ne.s32.totalorder %s6709_s2, %s5401_s24  ;;  %s43_s21 = int_to_ptr.vmem [resolvable:$true] %s42_s21 }
  0x26   :  { %p5405_p3 = scmp.lt.u32.totalorder %s5401_s24, %s6709_s2 }
  0x28   :  { %p5407_p4 = pnand %p5405_p3, %p5402_p2 }
  0x2a   :  { %5410 = shalt.err (!%p5407_p4)
}
  0x2b   :  { %s5411_s6 = scalar_lea.vmem %s43_s21, 6144  ;;  %p5416_p6 = scmp.lt.s32.totalorder %s43_s21, %s43_s21 }
  0x2c   :  { %p5412_p5 = scmp.ne.s32.totalorder %s43_s21, %s5411_s6  ;;  %p5417_p7 = scmp.lt.s32.totalorder %s5411_s6, %s5411_s6 }
  0x2e   :  { %p5418_p8 = por %p5417_p7, %p5416_p6 }
  0x30   :  { %p5419_p9 = pnand %p5418_p8, %p5412_p5 }
  0x32   :  { %5422 = shalt.err (!%p5419_p9)
}
  0x33   :  { %48 = dma.hbm_to_vmem [thread:$0]  %s6709_s2, 6144, %s43_s21, [#allocation7], %s5452_s28, %s5452_s28, %s5453_s29  }
  0x34   :  { %5445 = dma.done.wait [#allocation4], 1024  }
  0x35   :  { %5446 = vsyncadd [#allocation4], 4294966272 }
  0x36   :  { %5447 = dma.done.wait [#allocation7], 6912  }
  0x37   :  { %5448 = vsyncadd [#allocation7], 4294960384  ;;  %v6715_v0 = vmov 0.0   ;;  %v77_v1 = vld [vmem:[#allocation6 + $0x8] sm:$0xff]  ;;  %v80_v2 = vld [vmem:[#allocation6 + $0x20] sm:$0xff]  ;;  %vm99_vm0 = vcmask 130048  }
  0x38   :  { %188 = vmatprep.mubr.f32.mxu0 %v6715_v0  ;;  %66 = vst [vmem:[#allocation2] sm:$0xff] %v6715_v0  ;;  %v76_v3 = vld [vmem:[#allocation6] sm:$0xff]  ;;  %v4244_v4 = vpack.c.bf16 %v80_v2, %v77_v1  ;;  %v79_v5 = vld [vmem:[#allocation6 + $0x18] sm:$0xff]  ;;  %v346_v9 = vld [vmem:[#allocation8 + $0x20] sm:$0xff]  ;;  %v6713_v48 = vmov 0.0|0.0   ;;  %vm5460_vm1 = vmmov 0  }
  0x39   :  { %v68_v6 = vld [vmem:[#allocation3] sm:$0xff]  ;;  %v343_v7 = vld [vmem:[#allocation8 + $0x8] sm:$0xff]  ;;  %v4246_v8 = vpack.c.bf16 %v79_v5, %v76_v3  ;;  %v342_v10 = vld [vmem:[#allocation8] sm:$0xff]  ;;  %vm788_vm2 = vcmask 1041409   ;;  %vm791_vm3 = vcmask 1042434   ;;  %vm794_vm4 = vcmask 1043459  }
  0x3a   :  { %v345_v11 = vld [vmem:[#allocation8 + $0x18] sm:$0xff]  ;;  %3952 = vmatprep.mubr.msk.f32.mxu1 %vm99_vm0, %v68_v6  ;;  %4245 = vmatprep.subr.bf16.mxu0 %v4244_v4  ;;  %v5540_v12 = vpack.c.bf16 %v346_v9, %v343_v7  ;;  %v352_v14 = vld [vmem:[#allocation8 + $0x50] sm:$0xff]  ;;  %v351_v18 = vld [vmem:[#allocation8 + $0x48] sm:$0xff]  ;;  %vm797_vm5 = vcmask 1044484   ;;  %vm800_vm6 = vcmask 1045509   ;;  %vm803_vm7 = vcmask 1046534  }
  0x3b   :  { %v349_v13 = vld [vmem:[#allocation8 + $0x38] sm:$0xff]  ;;  %4247 = vmatpush1.bf16.msra.mxu0 %v4246_v8  ;;  %v5542_v15 = vpack.c.bf16 %v345_v11, %v342_v10  ;;  %v348_v17 = vld [vmem:[#allocation8 + $0x30] sm:$0xff]  ;;  %v355_v19 = vld [vmem:[#allocation8 + $0x68] sm:$0xff]  ;;  %vm806_vm8 = vcmask 1047559  }
  0x3c   :  { %6789 = vst [vmem:[#allocation13_spill] sm:$0xff] %v5540_v12  ;;  %4253 = vmatprep.subr.bf16.mxu0 %v5540_v12  ;;  %v5545_v16 = vpack.c.bf16 %v352_v14, %v349_v13  ;;  %v358_v20 = vld [vmem:[#allocation8 + $0x80] sm:$0xff]  ;;  %v69_v21 = vld [vmem:[#allocation3 + $0x8] sm:$0xff]  ;;  %v5550_v22 = vpack.c.bf16 %v351_v18, %v348_v17  ;;  %v364_v27 = vld [vmem:[#allocation8 + $0xb0] sm:$0xff] }
  0x3d   :  { %v5553_v23 = vpack.c.bf16 %v358_v20, %v355_v19  ;;  %v354_v24 = vld [vmem:[#allocation8 + $0x60] sm:$0xff]  ;;  %v357_v25 = vld [vmem:[#allocation8 + $0x78] sm:$0xff]  ;;  %v360_v34 = vld [vmem:[#allocation8 + $0x90] sm:$0xff] }
  0x3e   :  { %3657 = vmatmul.mubr.msk.f32.vlgmr.msra.gmra.mrb[0].mxu0 %vm99_vm0, %v68_v6  ;;  %v361_v26 = vld [vmem:[#allocation8 + $0x98] sm:$0xff]  ;;  %v78_v28 = vld [vmem:[#allocation6 + $0x10] sm:$0xff]  ;;  %v5558_v31 = vpack.c.bf16 %v357_v25, %v354_v24  ;;  %v363_v35 = vld [vmem:[#allocation8 + $0xa8] sm:$0xff] }
  0x3f   :  { %4255 = vmatpush1.bf16.msra.mxu0 %v5542_v15  ;;  %194 = vmatprep.mubr.f32.mxu0 %v6715_v0  ;;  %v81_v29 = vld [vmem:[#allocation6 + $0x28] sm:$0xff]  ;;  %v70_v30 = vld [vmem:[#allocation3 + $0x10] sm:$0xff]  ;;  %v5561_v33 = vpack.c.bf16 %v364_v27, %v361_v26  ;;  %v344_v36 = vld [vmem:[#allocation8 + $0x10] sm:$0xff]  ;;  %v5568_v42 = vpack.c.bf16 %v363_v35, %v360_v34 }
  0x40   :  { %4257 = vmatprep.subr.bf16.mxu0 %v5545_v16  ;;  %v4248_v32 = vpack.c.bf16 %v81_v29, %v78_v28  ;;  %v367_v37 = vld [vmem:[#allocation8 + $0xc8] sm:$0xff]  ;;  %v370_v38 = vld [vmem:[#allocation8 + $0xe0] sm:$0xff]  ;;  %v353_v44 = vld [vmem:[#allocation8 + $0x58] sm:$0xff] }
  0x41   :  { %v347_v39 = vld [vmem:[#allocation8 + $0x28] sm:$0xff]  ;;  %v350_v43 = vld [vmem:[#allocation8 + $0x40] sm:$0xff]  ;;  %v5571_v45 = vpack.c.bf16 %v370_v38, %v367_v37  ;;  %v369_v47 = vld [vmem:[#allocation8 + $0xd8] sm:$0xff] }
  0x42   :  { %3658 = vmatmul.mubr.msk.f32.gmra.mrb[2].mxu0 %vm99_vm0, %v69_v21  ;;  %4249 = vmatprep.subr.bf16.mxu1 %v4248_v32  ;;  %v5564_v40 = vpack.c.bf16 %v347_v39, %v344_v36  ;;  %v71_v41 = vld [vmem:[#allocation3 + $0x18] sm:$0xff]  ;;  %v366_v46 = vld [vmem:[#allocation8 + $0xc0] sm:$0xff]  ;;  %v373_v49 = vld [vmem:[#allocation8 + $0xf8] sm:$0xff]  ;;  %v5577_v51 = vpack.c.bf16 %v353_v44, %v350_v43 }
  0x43   :  { %4259 = vmatpush1.bf16.msra.mxu0 %v5550_v22  ;;  %200 = vmatprep.mubr.f32.mxu0 %v6715_v0  ;;  %v376_v50 = vld [vmem:[#allocation8 + $0x110] sm:$0xff]  ;;  %v5581_v53 = vpack.c.bf16 %v369_v47, %v366_v46  ;;  %v359_v55 = vld [vmem:[#allocation8 + $0x88] sm:$0xff]  ;;  %v382_v60 = vld [vmem:[#allocation8 + $0x140] sm:$0xff] }
  0x44   :  { %4261 = vmatprep.subr.bf16.mxu0 %v5553_v23  ;;  %4251 = vmatpush3.bf16.msra.mxu1 %v4248_v32  ;;  %v72_v52 = vld [vmem:[#allocation3 + $0x20] sm:$0xff]  ;;  %v5584_v56 = vpack.c.bf16 %v376_v50, %v373_v49  ;;  %v375_v58 = vld [vmem:[#allocation8 + $0x108] sm:$0xff]  ;;  %v73_v62 = vld [vmem:[#allocation3 + $0x28] sm:$0xff]  ;;  %v84_v49 = vlaneseq }
  0x45   :  { %4284 = vmatprep.subr.bf16.mxu1 %v6713_v48  ;;  %v356_v54 = vld [vmem:[#allocation8 + $0x70] sm:$0xff]  ;;  %v379_v59 = vld [vmem:[#allocation8 + $0x128] sm:$0xff]  ;;  %v362_v1 = vld [vmem:[#allocation8 + $0xa0] sm:$0xff] }
  0x46   :  { %3659 = vmatmul.mubr.msk.f32.gmra.mrb[4].mxu0 %vm99_vm0, %v70_v30  ;;  %v372_v57 = vld [vmem:[#allocation8 + $0xf0] sm:$0xff]  ;;  %v5590_v61 = vpack.c.bf16 %v359_v55, %v356_v54  ;;  %v365_v2 = vld [vmem:[#allocation8 + $0xb8] sm:$0xff]  ;;  %v5597_v3 = vpack.c.bf16 %v382_v60, %v379_v59  ;;  %v378_v4 = vld [vmem:[#allocation8 + $0x120] sm:$0xff]  ;;  %v5688_v54 = vshrl.u32 %v84_v49, 7 }
  0x47   :  { %4263 = vmatpush1.bf16.msra.mxu0 %v5558_v31  ;;  %206 = vmatprep.mubr.f32.mxu0 %v6715_v0  ;;  %v5594_v63 = vpack.c.bf16 %v375_v58, %v372_v57  ;;  %v381_v5 = vld [vmem:[#allocation8 + $0x138] sm:$0xff]  ;;  %v388_v7 = vld [vmem:[#allocation8 + $0x170] sm:$0xff]  ;;  %v5603_v8 = vpack.c.bf16 %v365_v2, %v362_v1  ;;  %v74_v9 = vld [vmem:[#allocation3 + $0x30] sm:$0xff] }
  0x48   :  { %4265 = vmatprep.subr.bf16.mxu0 %v5561_v33  ;;  %3953 = vmatmul.mubr.msk.f32.vlgmr.msra.gmra.mrb[0].mxu1 %vm99_vm0, %v69_v21  ;;  %6790 = vst [vmem:[#allocation14_spill] sm:$0xff] %v5597_v3  ;;  %v385_v6 = vld [vmem:[#allocation8 + $0x158] sm:$0xff]  ;;  %v5607_v10 = vpack.c.bf16 %v381_v5, %v378_v4  ;;  %v368_v11 = vld [vmem:[#allocation8 + $0xd0] sm:$0xff]  ;;  %v371_v13 = vld [vmem:[#allocation8 + $0xe8] sm:$0xff]  ;;  %v86_v60 = vsub.s32 0, %v5688_v54 }
  0x49   :  { %4286 = vmatpush3.bf16.msra.mxu1 %v5564_v40  ;;  %3955 = vmatprep.mubr.msk.f32.mxu1 %vm99_vm0, %v70_v30  ;;  %v5610_v14 = vpack.c.bf16 %v388_v7, %v385_v6  ;;  %v384_v17 = vld [vmem:[#allocation8 + $0x150] sm:$0xff]  ;;  %v387_v18 = vld [vmem:[#allocation8 + $0x168] sm:$0xff]  ;;  %v5616_v19 = vpack.c.bf16 %v371_v13, %v368_v11  ;;  %v374_v24 = vld [vmem:[#allocation8 + $0x100] sm:$0xff] }
  0x4a   :  { %3660 = vmatmul.mubr.msk.f32.gmra.mrb[6].mxu0 %vm99_vm0, %v71_v41  ;;  %4287 = vmatprep.subr.bf16.mxu1 %v6713_v48  ;;  %6791 = vst [vmem:[#allocation15_spill] sm:$0xff] %v5607_v10  ;;  %v75_v20 = vld [vmem:[#allocation3 + $0x38] sm:$0xff]  ;;  %v5620_v21 = vpack.c.bf16 %v387_v18, %v384_v17  ;;  %v377_v25 = vld [vmem:[#allocation8 + $0x118] sm:$0xff]  ;;  %v380_v27 = vld [vmem:[#allocation8 + $0x130] sm:$0xff] }
  0x4b   :  { %4267 = vmatpush1.bf16.msra.mxu0 %v5568_v42  ;;  %212 = vmatprep.mubr.f32.mxu0 %v6715_v0  ;;  %6792 = vst [vmem:[#allocation16_spill] sm:$0xff] %v5610_v14  ;;  %v5627_v26 = vpack.c.bf16 %v377_v25, %v374_v24  ;;  %v383_v28 = vld [vmem:[#allocation8 + $0x148] sm:$0xff]  ;;  %v386_v30 = vld [vmem:[#allocation8 + $0x160] sm:$0xff]  ;;  %v389_v32 = vld [vmem:[#allocation8 + $0x178] sm:$0xff] }
  0x4c   :  { %4269 = vmatprep.subr.bf16.mxu0 %v5571_v45  ;;  %3956 = vmatmul.mubr.msk.f32.gmra.mrb[2].mxu1 %vm99_vm0, %v71_v41  ;;  %6793 = vst [vmem:[#allocation17_spill] sm:$0xff] %v5620_v21  ;;  %v5637_v29 = vpack.c.bf16 %v383_v28, %v380_v27  ;;  %v5646_v34 = vpack.c.bf16 %v389_v32, %v386_v30  ;;  %v5701_v1 = vld [vmem:[%s6710_s3] sm:$0x7] }
  0x4d   :  { %4289 = vmatpush3.bf16.msra.mxu1 %v5577_v51  ;;  %3958 = vmatprep.mubr.msk.f32.mxu1 %vm99_vm0, %v72_v52  ;;  %6794 = vst [vmem:[#allocation18_spill] sm:$0xff] %v5627_v26  ;;  %v87_v5 = vrot.slane %v5701_v1, %v86_v60 }
  0x4e   :  { %3661 = vmatmul.mubr.msk.f32.gmra.mrb[8].mxu0 %vm99_vm0, %v72_v52  ;;  %4290 = vmatprep.subr.bf16.mxu1 %v6713_v48  ;;  %6795 = vst [vmem:[#allocation19_spill] sm:$0xff] %v5637_v29  ;;  %6796 = vst [vmem:[#allocation20_spill] sm:$0xff] %v5646_v34 }
  0x4f   :  { %4271 = vmatpush1.bf16.msra.mxu0 %v5581_v53  ;;  %218 = vmatprep.mubr.f32.mxu0 %v6715_v0 }
  0x50   :  { %4273 = vmatprep.subr.bf16.mxu0 %v5584_v56  ;;  %3959 = vmatmul.mubr.msk.f32.gmra.mrb[4].mxu1 %vm99_vm0, %v73_v62 }
  0x51   :  { %4292 = vmatpush3.bf16.msra.mxu1 %v5590_v61  ;;  %3961 = vmatprep.mubr.msk.f32.mxu1 %vm99_vm0, %v74_v9 }
  0x52   :  { %3662 = vmatmul.mubr.msk.f32.gmra.mrb[10].mxu0 %vm99_vm0, %v73_v62  ;;  %4293 = vmatprep.subr.bf16.mxu1 %v6713_v48  ;;  %v90_v62 = vsub.s32 1, %v5688_v54 }
  0x53   :  { %4275 = vmatpush1.bf16.msra.mxu0 %v5594_v63  ;;  %224 = vmatprep.mubr.f32.mxu0 %v6715_v0 }
  0x54   :  { %4277 = vmatprep.subr.bf16.mxu0 %v5597_v3  ;;  %3962 = vmatmul.mubr.msk.f32.gmra.mrb[6].mxu1 %vm99_vm0, %v75_v20  ;;  %v5707_v6 = vrot.slane %v5701_v1, %v90_v62 }
  0x55   :  { %4295 = vmatpush3.bf16.msra.mxu1 %v5603_v8  ;;  %3996 = vmatprep.mubr.msk.f32.mxu1 %vm5460_vm1, %v6715_v0 }
  0x56   :  { %3663 = vmatmul.mubr.msk.f32.gmra.mrb[12].mxu0 %vm99_vm0, %v74_v9  ;;  %4296 = vmatprep.subr.bf16.mxu1 %v6713_v48 }
  0x57   :  { %4279 = vmatpush1.bf16.msra.mxu0 %v5607_v10  ;;  %230 = vmatprep.mubr.f32.mxu0 %v6715_v0 }
  0x58   :  { %4281 = vmatprep.subr.bf16.mxu0 %v5610_v14 }
  0x59   :  { %4298 = vmatpush3.bf16.msra.mxu1 %v5616_v19 }
  0x5a   :  { %3664 = vmatmul.mubr.msk.f32.gmra.mrb[14].mxu0 %vm99_vm0, %v75_v20  ;;  %4299 = vmatprep.subr.bf16.mxu1 %v6713_v48 }
  0x5b   :  { %4283 = vmatpush1.bf16.msra.mxu0 %v5620_v21  ;;  %455 = vmatprep.mubr.f32.mxu0 %v6715_v0 }
  0x5c   :  { %4309 = vmatprep.subr.bf16.mxu0 %v5540_v12 }
  0x5d   :  { %4301 = vmatpush3.bf16.msra.mxu1 %v5627_v26 }
  0x5e   :  { %456 = vmatmul.mubr.f32.vlgmr.msra.gmra.mrb[16].mxu0 %v6715_v0  ;;  %4302 = vmatprep.subr.bf16.mxu1 %v6713_v48 }
  0x5f   :  { %4311 = vmatpush1.bf16.msra.mxu0 %v5542_v15  ;;  %873 = vmatprep.mubr.f32.mxu0 %v6715_v0 }
  0x60   :  { %4313 = vmatprep.subr.bf16.mxu0 %v5545_v16 }
  0x61   :  { %4304 = vmatpush3.bf16.msra.mxu1 %v5637_v29 }
  0x62   :  { %4305 = vmatprep.subr.bf16.mxu1 %v6713_v48 }
  0x63   :  { %4315 = vmatpush1.bf16.msra.mxu0 %v5550_v22 }
  0x64   :  { %4317 = vmatprep.subr.bf16.mxu0 %v5553_v23 }
  0x65   :  { %4307 = vmatpush3.bf16.msra.mxu1 %v5646_v34 }
  0x66   :  { %4340 = vmatprep.subr.bf16.mxu1 %v6713_v48 }
  0x67   :  { %4319 = vmatpush1.bf16.msra.mxu0 %v5558_v31 }
  0x68   :  { %3997 = vmatmul.mubr.f32.vlgmr.msra.gmra.mrb[8].mxu1 %v6715_v0  ;;  %4321 = vmatprep.subr.bf16.mxu0 %v5561_v33 }
  0x69   :  { %4342 = vmatpush3.bf16.msra.mxu1 %v5564_v40  ;;  %4031 = vmatprep.mubr.msk.f32.mxu1 %vm5460_vm1, %v6715_v0 }
  0x6a   :  { %4343 = vmatprep.subr.bf16.mxu1 %v6713_v48 }
  0x6b   :  { %4323 = vmatpush1.bf16.msra.mxu0 %v5568_v42 }
  0x6c   :  { %4325 = vmatprep.subr.bf16.mxu0 %v5571_v45 }
  0x6d   :  { %4345 = vmatpush3.bf16.msra.mxu1 %v5577_v51 }
  0x6e   :  { %4346 = vmatprep.subr.bf16.mxu1 %v6713_v48 }
  0x6f   :  { %4327 = vmatpush1.bf16.msra.mxu0 %v5581_v53 }
  0x70   :  { %4329 = vmatprep.subr.bf16.mxu0 %v5584_v56 }
  0x71   :  { %4348 = vmatpush3.bf16.msra.mxu1 %v5590_v61 }
  0x72   :  { %4349 = vmatprep.subr.bf16.mxu1 %v6713_v48 }
  0x73   :  { %4331 = vmatpush1.bf16.msra.mxu0 %v5594_v63 }
  0x74   :  { %4333 = vmatprep.subr.bf16.mxu0 %v5597_v3 }
  0x75   :  { %4351 = vmatpush3.bf16.msra.mxu1 %v5603_v8 }
  0x76   :  { %4352 = vmatprep.subr.bf16.mxu1 %v6713_v48 }
  0x77   :  { %4335 = vmatpush1.bf16.msra.mxu0 %v5607_v10 }
  0x78   :  { %4337 = vmatprep.subr.bf16.mxu0 %v5610_v14 }
  0x79   :  { %4354 = vmatpush3.bf16.msra.mxu1 %v5616_v19 }
  0x7a   :  { %4355 = vmatprep.subr.bf16.mxu1 %v6713_v48 }
  0x7b   :  { %4339 = vmatpush1.bf16.msra.mxu0 %v5620_v21 }
  0x7c   :  { %4365 = vmatprep.subr.bf16.mxu0 %v5540_v12 }
  0x7d   :  { %4357 = vmatpush3.bf16.msra.mxu1 %v5627_v26 }
  0x7e   :  { %4358 = vmatprep.subr.bf16.mxu1 %v6713_v48 }
  0x81   :  { %4360 = vmatpush3.bf16.msra.mxu1 %v5637_v29 }
  0x82   :  { %4361 = vmatprep.subr.bf16.mxu1 %v6713_v48 }
  0x85   :  { %4363 = vmatpush3.bf16.msra.mxu1 %v5646_v34 }
  0x86   :  { %4396 = vmatprep.subr.bf16.mxu1 %v6713_v48 }
 0x111   :  { %v190_v35 = vpop.f32.mrb[0].mxu0 }
 0x112   :  { %v192_v36 = vpop.f32.mrb[1].mxu0  ;;  %v5715_v17 = vadd.f32 %v190_v35, %v87_v5 }
 0x113   :  { %v5718_v18 = vadd.f32 %v192_v36, %v5707_v6 }
 0x114   :  { %6797 = vst [vmem:[#allocation21_spill] sm:$0xff] %v5715_v17 }
 0x115   :  { %v196_v37 = vpop.f32.mrb[2].mxu0  ;;  %6798 = vst [vmem:[#allocation22_spill] sm:$0xff] %v5718_v18 }
 0x116   :  { %v198_v38 = vpop.f32.mrb[3].mxu0  ;;  %v5720_v20 = vadd.f32 %v196_v37, %v87_v5 }
 0x117   :  { %v5723_v24 = vadd.f32 %v198_v38, %v5707_v6 }
 0x119   :  { %v202_v39 = vpop.f32.mrb[4].mxu0  ;;  %6799 = vst [vmem:[#allocation23_spill] sm:$0xff] %v5723_v24 }
 0x11a   :  { %v204_v41 = vpop.f32.mrb[5].mxu0  ;;  %v5725_v25 = vadd.f32 %v202_v39, %v87_v5 }
 0x11b   :  { %v5684_v43 = vpop.f32.mrb[0].mxu1  ;;  %v5728_v27 = vadd.f32 %v204_v41, %v5707_v6 }
 0x11c   :  { %v5686_v46 = vpop.f32.mrb[1].mxu1 }
 0x11d   :  { %v208_v44 = vpop.f32.mrb[6].mxu0  ;;  %6800 = vst [vmem:[#allocation24_spill] sm:$0xff] %v5728_v27 }
 0x11e   :  { %v210_v47 = vpop.f32.mrb[7].mxu0  ;;  %v5730_v28 = vadd.f32 %v208_v44, %v87_v5 }
 0x11f   :  { %v5690_v55 = vpop.f32.mrb[2].mxu1  ;;  %v5752_v34 = vadd.f32 %v210_v47, %v5707_v6 }
 0x120   :  { %v5692_v58 = vpop.f32.mrb[3].mxu1  ;;  %6801 = vst [vmem:[#allocation25_spill] sm:$0xff] %v5730_v28 }
 0x121   :  { %v214_v50 = vpop.f32.mrb[8].mxu0  ;;  %6805 = vst [vmem:[#allocation29_spill] sm:$0xff] %v5752_v34 }
 0x122   :  { %v216_v52 = vpop.f32.mrb[9].mxu0  ;;  %v5734_v32 = vadd.f32 %v214_v50, %v87_v5 }
 0x123   :  { %v5709_v7 = vpop.f32.mrb[4].mxu1 }
 0x124   :  { %v5711_v11 = vpop.f32.mrb[5].mxu1 }
 0x125   :  { %v220_v57 = vpop.f32.mrb[10].mxu0 }
 0x126   :  { %v5694_v59 = vpop.f32.mrb[11].mxu0  ;;  %v5736_v35 = vadd.f32 %v220_v57, %v87_v5 }
 0x127   :  { %v5732_v30 = vpop.f32.mrb[6].mxu1 }
 0x128   :  { %6802 = vst [vmem:[#allocation26_spill] sm:$0xff] %v5736_v35  ;;  %v5742_v38 = vpop.f32.mrb[7].mxu1 }
 0x129   :  { %v226_v2 = vpop.f32.mrb[12].mxu0 }
 0x12a   :  { %v5703_v4 = vpop.f32.mrb[13].mxu0  ;;  %v5738_v36 = vadd.f32 %v226_v2, %v87_v5 }
 0x12c   :  { %6803 = vst [vmem:[#allocation27_spill] sm:$0xff] %v5738_v36 }
 0x12d   :  { %v232_v9 = vpop.f32.mrb[14].mxu0 }
 0x12e   :  { %v5713_v13 = vpop.f32.mrb[15].mxu0  ;;  %v5740_v37 = vadd.f32 %v232_v9, %v87_v5 }
 0x130   :  { %6804 = vst [vmem:[#allocation28_spill] sm:$0xff] %v5740_v37 }
 0x131   :  { %v457_v49 = vpop.f32.mrb[16].mxu0 }
 0x132   :  { %v533_v39 = vrot.slane %v457_v49, 1  ;;  %v534_v60 = vrot.slane %v457_v49, 2  ;;  %v535_v62 = vrot.slane %v457_v49, 3  ;;  %v536_v41 = vrot.slane %v457_v49, 4  ;;  %v5744_v48 = vpop.f32.mrb[17].mxu0 }
 0x133   :  { %v537_v44 = vrot.slane %v457_v49, 5  ;;  %v538_v0 = vrot.slane %v457_v49, 6  ;;  %v539_v12 = vrot.slane %v457_v49, 7  ;;  %v548_v50 = vadd.f32 %v457_v49, %v5715_v17 }
 0x134   :  { %v549_v57 = vadd.f32 %v533_v39, %v5720_v20  ;;  %v550_v2 = vadd.f32 %v534_v60, %v5725_v25  ;;  %v551_v5 = vadd.f32 %v535_v62, %v5730_v28  ;;  %v552_v9 = vadd.f32 %v536_v41, %v5734_v32 }
 0x135   :  { %v553_v21 = vadd.f32 %v537_v44, %v5736_v35  ;;  %v554_v14 = vadd.f32 %v538_v0, %v5738_v36  ;;  %v3673_v29 = vmul.f32 -1.442695, %v548_v50  ;;  %v555_v10 = vadd.f32 %v539_v12, %v5740_v37 }
 0x136   :  { %v3674_v3 = vmul.f32 -1.442695, %v549_v57  ;;  %v3675_v49 = vmul.f32 -1.442695, %v550_v2  ;;  %v3676_v17 = vmul.f32 -1.442695, %v551_v5  ;;  %v5758_v39 = vadd.f32 %v216_v52, %v5707_v6 }
 0x137   :  { %4711 = vpow2.f32 %v3673_v29  ;;  %v3677_v60 = vmul.f32 -1.442695, %v552_v9  ;;  %v620_v62 = vadd.f32 %v5744_v48, %v5718_v18  ;;  %v3678_v47 = vmul.f32 -1.442695, %v553_v21 }
 0x138   :  { %6806 = vst [vmem:[#allocation30_spill] sm:$0xff] %v5758_v39  ;;  %4713 = vpow2.f32 %v3674_v3  ;;  %v605_v41 = vrot.slane %v5744_v48, 1  ;;  %v606_v0 = vrot.slane %v5744_v48, 2  ;;  %v3679_v44 = vmul.f32 -1.442695, %v554_v14 }
 0x139   :  { %4715 = vpow2.f32 %v3675_v49  ;;  %v607_v12 = vrot.slane %v5744_v48, 3  ;;  %v608_v50 = vrot.slane %v5744_v48, 4  ;;  %v3680_v52 = vmul.f32 -1.442695, %v555_v10 }
 0x13a   :  { %4717 = vpow2.f32 %v3676_v17  ;;  %v621_v29 = vadd.f32 %v605_v41, %v5723_v24  ;;  %v622_v57 = vadd.f32 %v606_v0, %v5728_v27  ;;  %v3681_v5 = vmul.f32 -1.442695, %v620_v62 }
 0x13b   :  { %4719 = vpow2.f32 %v3677_v60  ;;  %v623_v3 = vadd.f32 %v607_v12, %v5752_v34  ;;  %v624_v21 = vadd.f32 %v608_v50, %v5758_v39  ;;  %v528_v2 = vpop.f32.mrb[8].mxu1  ;;  %v609_v41 = vrot.slane %v5744_v48, 5 }
 0x13c   :  { %4721 = vpow2.f32 %v3678_v47  ;;  %v3682_v14 = vmul.f32 -1.442695, %v621_v29  ;;  %v3683_v9 = vmul.f32 -1.442695, %v622_v57  ;;  %v3998_v10 = vpop.f32.mrb[9].mxu1  ;;  %v610_v0 = vrot.slane %v5744_v48, 6 }
 0x13d   :  { %4723 = vpow2.f32 %v3679_v44  ;;  %v3684_v49 = vmul.f32 -1.442695, %v623_v3  ;;  %v3685_v17 = vmul.f32 -1.442695, %v624_v21  ;;  %v5774_v47 = vadd.f32 %v5694_v59, %v5707_v6 }
 0x13e   :  { %4725 = vpow2.f32 %v3680_v52  ;;  %v611_v44 = vrot.slane %v5744_v48, 7  ;;  %v5779_v52 = vadd.f32 %v5703_v4, %v5707_v6  ;;  %v94_v29 = vsub.s32 2, %v5688_v54  ;;  %v5791_v54 = vld [vmem:[%s6711_s4] ss:$0 sm:$0xff] }
 0x13f   :  { %4727 = vpow2.f32 %v3681_v5  ;;  %6807 = vst [vmem:[#allocation31_spill] sm:$0xff] %v5774_v47  ;;  %v5784_v21 = vadd.f32 %v5713_v13, %v5707_v6  ;;  %v625_v5 = vadd.f32 %v609_v41, %v5774_v47  ;;  %6810 = vst [vmem:[#allocation34_spill] sm:$0xff] %v5791_v54 }
 0x140   :  { %4729 = vpow2.f32 %v3682_v14  ;;  %6808 = vst [vmem:[#allocation32_spill] sm:$0xff] %v5779_v52 }
 0x141   :  { %v4712_v60 = vpop.eup %4711  ;;  %4731 = vpow2.f32 %v3683_v9  ;;  %6809 = vst [vmem:[#allocation33_spill] sm:$0xff] %v5784_v21  ;;  %v626_v9 = vadd.f32 %v610_v0, %v5779_v52  ;;  %v627_v6 = vadd.f32 %v611_v44, %v5784_v21  ;;  %v3686_v0 = vmul.f32 -1.442695, %v625_v5 }
 0x142   :  { %v4714_v12 = vpop.eup %4713  ;;  %v580_v62 = vadd.f32 1.0, %v4712_v60  ;;  %4733 = vpow2.f32 %v3684_v49 }
 0x143   :  { %v4716_v50 = vpop.eup %4715  ;;  %v581_v57 = vadd.f32 1.0, %v4714_v12  ;;  %4735 = vpow2.f32 %v3685_v17  ;;  %v5795_v17 = vrot.slane %v5701_v1, %v94_v29  ;;  %v682_v12 = vadd.f32 %v5791_v54, %v528_v2 }
 0x144   :  { %v4718_v3 = vpop.eup %4717  ;;  %v582_v59 = vadd.f32 1.0, %v4716_v50  ;;  %4737 = vrcp.f32 %v580_v62 }
 0x145   :  { %v4720_v48 = vpop.eup %4719  ;;  %v583_v14 = vadd.f32 1.0, %v4718_v3  ;;  %4739 = vrcp.f32 %v581_v57  ;;  %v3687_v57 = vmul.f32 -1.442695, %v626_v9  ;;  %v5800_v29 = vadd.f32 %v5684_v43, %v5795_v17 }
 0x146   :  { %v4722_v4 = vpop.eup %4721  ;;  %v584_v49 = vadd.f32 1.0, %v4720_v48  ;;  %4741 = vrcp.f32 %v582_v59  ;;  %v3688_v59 = vmul.f32 -1.442695, %v627_v6  ;;  %v684_v5 = vrot.slane %v682_v12, 1 }
 0x147   :  { %v4724_v13 = vpop.eup %4723  ;;  %v585_v10 = vadd.f32 1.0, %v4722_v4  ;;  %4743 = vrcp.f32 %v583_v14  ;;  %6811 = vst [vmem:[#allocation35_spill] sm:$0xff] %v5800_v29  ;;  %v5804_v2 = vadd.f32 %v5686_v46, %v5795_v17  ;;  %v686_v43 = vrot.slane %v682_v12, 3 }
 0x148   :  { %v4726_v41 = vpop.eup %4725  ;;  %v586_v60 = vadd.f32 1.0, %v4724_v13  ;;  %4745 = vrcp.f32 %v584_v49  ;;  %v685_v49 = vrot.slane %v682_v12, 2  ;;  %v5812_v46 = vadd.f32 %v5692_v58, %v5795_v17 }
 0x149   :  { %v4728_v62 = vpop.eup %4727  ;;  %v587_v50 = vadd.f32 1.0, %v4726_v41  ;;  %4747 = vrcp.f32 %v585_v10  ;;  %6812 = vst [vmem:[#allocation36_spill] sm:$0xff] %v5804_v2  ;;  %v5808_v10 = vadd.f32 %v5690_v55, %v5795_v17  ;;  %v5818_v58 = vadd.f32 %v5711_v11, %v5795_v17 }
 0x14a   :  { %v4730_v3 = vpop.eup %4729  ;;  %4749 = vrcp.f32 %v586_v60  ;;  %v652_v48 = vadd.f32 1.0, %v4728_v62  ;;  %6814 = vst [vmem:[#allocation38_spill] sm:$0xff] %v5812_v46 }
 0x14b   :  { %v4732_v44 = vpop.eup %4731  ;;  %4751 = vrcp.f32 %v587_v50  ;;  %v653_v14 = vadd.f32 1.0, %v4730_v3  ;;  %6813 = vst [vmem:[#allocation37_spill] sm:$0xff] %v5808_v10  ;;  %6815 = vst [vmem:[#allocation39_spill] sm:$0xff] %v5818_v58 }
 0x14c   :  { %v4734_v1 = vpop.eup %4733  ;;  %4753 = vpow2.f32 %v3686_v0  ;;  %v654_v9 = vadd.f32 1.0, %v4732_v44  ;;  %v687_v0 = vrot.slane %v682_v12, 4 }
 0x14d   :  { %v4736_v4 = vpop.eup %4735  ;;  %4755 = vpow2.f32 %v3687_v57  ;;  %v655_v13 = vadd.f32 1.0, %v4734_v1  ;;  %v688_v57 = vrot.slane %v682_v12, 5  ;;  %v689_v1 = vrot.slane %v682_v12, 6 }
 0x14e   :  { %v4738_v6 = vpop.eup %4737  ;;  %4757 = vpow2.f32 %v3688_v59  ;;  %v656_v60 = vadd.f32 1.0, %v4736_v4 }
 0x14f   :  { %v4740_v41 = vpop.eup %4739  ;;  %4759 = vrcp.f32 %v652_v48  ;;  %v699_v62 = vmul.f32 %v4738_v6, %v682_v12  ;;  %v690_v6 = vrot.slane %v682_v12, 7 }
 0x150   :  { %v4742_v50 = vpop.eup %4741  ;;  %4761 = vrcp.f32 %v653_v14  ;;  %v700_v3 = vmul.f32 %v4740_v41, %v684_v5 }
 0x151   :  { %v4744_v59 = vpop.eup %4743  ;;  %4763 = vrcp.f32 %v654_v9  ;;  %v701_v44 = vmul.f32 %v4742_v50, %v685_v49  ;;  %v707_v55 = vadd.f32 %v699_v62, %v5804_v2 }
 0x152   :  { %v4746_v54 = vpop.eup %4745  ;;  %4765 = vrcp.f32 %v655_v13  ;;  %v702_v4 = vmul.f32 %v4744_v59, %v686_v43  ;;  %v708_v48 = vadd.f32 %v700_v3, %v5800_v29  ;;  %v5833_v3 = vadd.f32 %v5732_v30, %v5795_v17 }
 0x153   :  { %v4748_v21 = vpop.eup %4747  ;;  %4767 = vrcp.f32 %v656_v60  ;;  %v703_v14 = vmul.f32 %v4746_v54, %v687_v0  ;;  %v709_v5 = vadd.f32 %v701_v44, %v5812_v46  ;;  %v5825_v60 = vadd.f32 %v5709_v7, %v5795_v17 }
 0x154   :  { %v4750_v9 = vpop.eup %4749  ;;  %v704_v49 = vmul.f32 %v4748_v21, %v688_v57  ;;  %v710_v41 = vadd.f32 %v702_v4, %v5808_v10  ;;  %4769 = vtanh.f32 %v707_v55  ;;  %v5829_v21 = vadd.f32 %v5742_v38, %v5795_v17  ;;  %6818 = vst [vmem:[#allocation42_spill] sm:$0xff] %v5833_v3 }
 0x155   :  { %v4752_v62 = vpop.eup %4751  ;;  %v705_v13 = vmul.f32 %v4750_v9, %v689_v1  ;;  %v711_v43 = vadd.f32 %v703_v14, %v5818_v58  ;;  %4771 = vtanh.f32 %v708_v48  ;;  %6816 = vst [vmem:[#allocation40_spill] sm:$0xff] %v5825_v60 }
 0x156   :  { %v4754_v12 = vpop.eup %4753  ;;  %v706_v11 = vmul.f32 %v4752_v62, %v690_v6  ;;  %4773 = vtanh.f32 %v709_v5  ;;  %6817 = vst [vmem:[#allocation41_spill] sm:$0xff] %v5829_v21  ;;  %v712_v59 = vadd.f32 %v704_v49, %v5825_v60  ;;  %v6819_v6 = vmov 0.0  }
 0x157   :  { %v4756_v54 = vpop.eup %4755  ;;  %v657_v0 = vadd.f32 1.0, %v4754_v12  ;;  %4775 = vtanh.f32 %v710_v41  ;;  %v713_v55 = vadd.f32 %v705_v13, %v5829_v21  ;;  %v740_v14 = vrot.slane %v6819_v6, 1 }
 0x158   :  { %v4758_v50 = vpop.eup %4757  ;;  %v658_v57 = vadd.f32 1.0, %v4756_v54  ;;  %4777 = vtanh.f32 %v711_v43  ;;  %v714_v38 = vadd.f32 %v706_v11, %v5833_v3  ;;  %v741_v5 = vrot.slane %v6819_v6, 2 }
 0x159   :  { %v4760_v7 = vpop.eup %4759  ;;  %v659_v44 = vadd.f32 1.0, %v4758_v50  ;;  %4779 = vrcp.f32 %v657_v0  ;;  %v742_v41 = vrot.slane %v6819_v6, 3  ;;  %v743_v62 = vrot.slane %v6819_v6, 4 }
 0x15a   :  { %v4762_v1 = vpop.eup %4761  ;;  %4781 = vrcp.f32 %v658_v57  ;;  %v723_v17 = vsub.f32 1.0, %v4760_v7  ;;  %v744_v11 = vrot.slane %v6819_v6, 5  ;;  %v755_v54 = vmul.f32 0.0, %v4760_v7 }
 0x15b   :  { %v4764_v4 = vpop.eup %4763  ;;  %4783 = vrcp.f32 %v659_v44  ;;  %v724_v49 = vsub.f32 1.0, %v4762_v1  ;;  %v756_v44 = vmul.f32 %v4762_v1, %v740_v14  ;;  %v746_v46 = vrot.slane %v6819_v6, 7 }
 0x15c   :  { %v4766_v48 = vpop.eup %4765  ;;  %4785 = vtanh.f32 %v712_v59  ;;  %v725_v43 = vsub.f32 1.0, %v4764_v4  ;;  %v745_v59 = vrot.slane %v6819_v6, 6  ;;  %v757_v21 = vmul.f32 %v4764_v4, %v741_v5 }
 0x15d   :  { %v4768_v30 = vpop.eup %4767  ;;  %4787 = vtanh.f32 %v713_v55  ;;  %v726_v50 = vsub.f32 1.0, %v4766_v48 }
 0x15e   :  { %v4770_v9 = vpop.eup %4769  ;;  %4789 = vtanh.f32 %v714_v38  ;;  %v727_v3 = vsub.f32 1.0, %v4768_v30  ;;  %v759_v29 = vmul.f32 %v4768_v30, %v743_v62 }
 0x15f   :  { %v4772_v13 = vpop.eup %4771  ;;  %v731_v12 = vmul.f32 %v4770_v9, %v723_v17  ;;  %v758_v17 = vmul.f32 %v4766_v48, %v742_v41 }
 0x160   :  { %v4774_v0 = vpop.eup %4773  ;;  %v732_v57 = vmul.f32 %v4772_v13, %v724_v49 }
 0x161   :  { %v4776_v55 = vpop.eup %4775  ;;  %v733_v38 = vmul.f32 %v4774_v0, %v725_v43  ;;  %v5844_v60 = vadd.f32 %v755_v54, %v731_v12 }
 0x162   :  { %v4778_v58 = vpop.eup %4777  ;;  %v734_v10 = vmul.f32 %v4776_v55, %v726_v50  ;;  %v5847_v9 = vadd.f32 %v756_v44, %v732_v57 }
 0x163   :  { %v4780_v7 = vpop.eup %4779  ;;  %v735_v2 = vmul.f32 %v4778_v58, %v727_v3  ;;  %v5849_v49 = vadd.f32 %v757_v21, %v733_v38  ;;  %771 = vst [vmem:[#allocation9] sm:$0x1] %v5844_v60 }
 0x164   :  { %v4782_v1 = vpop.eup %4781  ;;  %v5852_v14 = vadd.f32 %v758_v17, %v734_v10  ;;  %772 = vst [vmem:[#allocation9 + $0x8] sm:$0x1] %v5847_v9  ;;  %v6752_v4 = vrot.slane %v5847_v9, 7  ;;  %v728_v5 = vsub.f32 1.0, %v4780_v7  ;;  %v760_v30 = vmul.f32 %v4780_v7, %v744_v11 }
 0x165   :  { %v4784_v48 = vpop.eup %4783  ;;  %v5856_v41 = vadd.f32 %v759_v29, %v735_v2  ;;  %773 = vst [vmem:[#allocation9 + $0x10] sm:$0x1] %v5849_v49  ;;  %v790_v58 = vrot.slane %v5849_v49, 6  ;;  %v729_v3 = vsub.f32 1.0, %v4782_v1  ;;  %v761_v0 = vmul.f32 %v4782_v1, %v745_v59 }
 0x166   :  { %v4786_v21 = vpop.eup %4785  ;;  %774 = vst [vmem:[#allocation9 + $0x18] sm:$0x1] %v5852_v14  ;;  %v789_v10 = vsel %vm788_vm2, %v6752_v4, %v5844_v60  ;;  %v793_v62 = vrot.slane %v5852_v14, 5  ;;  %v730_v29 = vsub.f32 1.0, %v4784_v48  ;;  %v762_v44 = vmul.f32 %v4784_v48, %v746_v46 }
 0x167   :  { %v4788_v13 = vpop.eup %4787  ;;  %v736_v2 = vmul.f32 %v4786_v21, %v728_v5  ;;  %775 = vst [vmem:[#allocation9 + $0x20] sm:$0x1] %v5856_v41  ;;  %v792_v43 = vsel %vm791_vm3, %v790_v58, %v789_v10  ;;  %v796_v12 = vrot.slane %v5856_v41, 4  ;;  %v6820_v21 = vmov 0.0|0.0   ;;  %v6824_v10 = vld [vmem:[#allocation16_spill] sm:$0xff] }
 0x168   :  { %v4790_v54 = vpop.eup %4789  ;;  %v737_v11 = vmul.f32 %v4788_v13, %v729_v3  ;;  %v795_v50 = vsel %vm794_vm4, %v793_v62, %v792_v43  ;;  %v6822_v3 = vld [vmem:[#allocation15_spill] sm:$0xff]  ;;  %v6825_v62 = vld [vmem:[#allocation17_spill] sm:$0xff]  ;;  %v6826_v13 = vld [vmem:[#allocation20_spill] sm:$0xff] }
 0x169   :  { %v738_v57 = vmul.f32 %v4790_v54, %v730_v29  ;;  %v5870_v55 = vadd.f32 %v760_v30, %v736_v2  ;;  %v798_v38 = vsel %vm797_vm5, %v796_v12, %v795_v50  ;;  %v6823_v30 = vld [vmem:[#allocation19_spill] sm:$0xff]  ;;  %v6827_v29 = vld [vmem:[#allocation13_spill] sm:$0xff] }
 0x16a   :  { %v5873_v17 = vadd.f32 %v761_v0, %v737_v11 }
 0x16b   :  { %v5875_v7 = vadd.f32 %v762_v44, %v738_v57  ;;  %776 = vst [vmem:[#allocation9 + $0x28] sm:$0x1] %v5870_v55  ;;  %v799_v5 = vrot.slane %v5870_v55, 3 }
 0x16c   :  { %777 = vst [vmem:[#allocation9 + $0x30] sm:$0x1] %v5873_v17  ;;  %v802_v59 = vrot.slane %v5873_v17, 2 }
 0x16d   :  { %778 = vst [vmem:[#allocation9 + $0x38] sm:$0x1] %v5875_v7  ;;  %v801_v46 = vsel %vm800_vm6, %v799_v5, %v798_v38  ;;  %v805_v1 = vrot.slane %v5875_v7, 1 }
 0x16e   :  { %v804_v48 = vsel %vm803_vm7, %v802_v59, %v801_v46  ;;  %v6828_v46 = vld [vmem:[#allocation21_spill] sm:$0xff] }
 0x16f   :  { %v807_v58 = vsel %vm806_vm8, %v805_v1, %v804_v48 }
 0x170   :  { %874 = vmatmul.mubr.f32.vlgmr.msra.gmra.mrb[18].mxu0 %v807_v58  ;;  %4032 = vmatmul.mubr.f32.vlgmr.msra.gmra.mrb[10].mxu1 %v807_v58 }
 0x171   :  { %4367 = vmatpush1.bf16.msra.mxu0 %v5542_v15  ;;  %4398 = vmatpush3.bf16.msra.mxu1 %v5564_v40 }
 0x172   :  { %4369 = vmatprep.subr.bf16.mxu0 %v5545_v16  ;;  %4399 = vmatprep.subr.bf16.mxu1 %v6820_v21 }
 0x173   :  { %1277 = vmatprep.mubr.f32.mxu0 %v6819_v6  ;;  %4066 = vmatprep.mubr.msk.f32.mxu1 %vm5460_vm1, %v6819_v6  ;;  %v6821_v6 = vld [vmem:[#allocation14_spill] sm:$0xff] }
 0x175   :  { %4371 = vmatpush1.bf16.msra.mxu0 %v5550_v22  ;;  %4401 = vmatpush3.bf16.msra.mxu1 %v5577_v51 }
 0x176   :  { %4373 = vmatprep.subr.bf16.mxu0 %v5553_v23  ;;  %4402 = vmatprep.subr.bf16.mxu1 %v6820_v21 }
 0x179   :  { %4375 = vmatpush1.bf16.msra.mxu0 %v5558_v31  ;;  %4404 = vmatpush3.bf16.msra.mxu1 %v5590_v61 }
 0x17a   :  { %4377 = vmatprep.subr.bf16.mxu0 %v5561_v33  ;;  %4405 = vmatprep.subr.bf16.mxu1 %v6820_v21 }
 0x17d   :  { %4379 = vmatpush1.bf16.msra.mxu0 %v5568_v42  ;;  %4407 = vmatpush3.bf16.msra.mxu1 %v5603_v8 }
 0x17e   :  { %4381 = vmatprep.subr.bf16.mxu0 %v5571_v45  ;;  %4408 = vmatprep.subr.bf16.mxu1 %v6820_v21 }
 0x181   :  { %4383 = vmatpush1.bf16.msra.mxu0 %v5581_v53  ;;  %4410 = vmatpush3.bf16.msra.mxu1 %v5616_v19 }
 0x182   :  { %4385 = vmatprep.subr.bf16.mxu0 %v5584_v56  ;;  %4411 = vmatprep.subr.bf16.mxu1 %v6820_v21 }
 0x185   :  { %4387 = vmatpush1.bf16.msra.mxu0 %v5594_v63  ;;  %4413 = vmatpush3.bf16.msra.mxu1 %v5627_v26 }
 0x186   :  { %4389 = vmatprep.subr.bf16.mxu0 %v6821_v6  ;;  %4414 = vmatprep.subr.bf16.mxu1 %v6820_v21 }
 0x189   :  { %4391 = vmatpush1.bf16.msra.mxu0 %v6822_v3  ;;  %4416 = vmatpush3.bf16.msra.mxu1 %v6823_v30 }
 0x18a   :  { %4393 = vmatprep.subr.bf16.mxu0 %v6824_v10  ;;  %4417 = vmatprep.subr.bf16.mxu1 %v6820_v21 }
 0x18d   :  { %4395 = vmatpush1.bf16.msra.mxu0 %v6825_v62  ;;  %4419 = vmatpush3.bf16.msra.mxu1 %v6826_v13 }
 0x18e   :  { %4421 = vmatprep.subr.bf16.mxu0 %v6827_v29  ;;  %4452 = vmatprep.subr.bf16.mxu1 %v6820_v21 }
 0x243   :  { %v875_v2 = vpop.f32.mrb[18].mxu0  ;;  %v5921_v43 = vpop.f32.mrb[10].mxu1 }
 0x244   :  { %v951_v12 = vrot.slane %v875_v2, 7  ;;  %v952_v54 = vrot.slane %v875_v2, 1  ;;  %v953_v11 = vrot.slane %v875_v2, 2  ;;  %v954_v0 = vrot.slane %v875_v2, 3  ;;  %v5923_v50 = vpop.f32.mrb[19].mxu0  ;;  %v4033_v57 = vpop.f32.mrb[11].mxu1 }
 0x245   :  { %v955_v44 = vrot.slane %v875_v2, 4  ;;  %v956_v38 = vrot.slane %v875_v2, 5  ;;  %v957_v5 = vrot.slane %v875_v2, 6  ;;  %v967_v59 = vadd.f32 %v875_v2, %v5720_v20 }
 0x246   :  { %v966_v1 = vadd.f32 %v951_v12, %v6828_v46  ;;  %v968_v48 = vadd.f32 %v952_v54, %v5725_v25  ;;  %v969_v58 = vadd.f32 %v953_v11, %v5730_v28  ;;  %v970_v4 = vadd.f32 %v954_v0, %v5734_v32 }
 0x247   :  { %v971_v29 = vadd.f32 %v955_v44, %v5736_v35  ;;  %v972_v13 = vadd.f32 %v956_v38, %v5738_v36  ;;  %v3691_v62 = vmul.f32 -1.442695, %v967_v59  ;;  %v973_v57 = vadd.f32 %v957_v5, %v5740_v37 }
 0x248   :  { %v3690_v10 = vmul.f32 -1.442695, %v966_v1  ;;  %v3692_v30 = vmul.f32 -1.442695, %v968_v48  ;;  %v3693_v3 = vmul.f32 -1.442695, %v969_v58  ;;  %v1039_v5 = vadd.f32 %v5923_v50, %v5723_v24 }
 0x249   :  { %4791 = vpow2.f32 %v3691_v62  ;;  %v3694_v2 = vmul.f32 -1.442695, %v970_v4  ;;  %v3695_v12 = vmul.f32 -1.442695, %v971_v29  ;;  %v3696_v54 = vmul.f32 -1.442695, %v972_v13 }
 0x24a   :  { %4793 = vpow2.f32 %v3690_v10  ;;  %v3697_v11 = vmul.f32 -1.442695, %v973_v57  ;;  %v1023_v0 = vrot.slane %v5923_v50, 7  ;;  %v1024_v44 = vrot.slane %v5923_v50, 1 }
 0x24b   :  { %4795 = vpow2.f32 %v3692_v30  ;;  %v3699_v30 = vmul.f32 -1.442695, %v1039_v5  ;;  %v1026_v29 = vrot.slane %v5923_v50, 3  ;;  %v1027_v48 = vrot.slane %v5923_v50, 4 }
 0x24c   :  { %4797 = vpow2.f32 %v3693_v3  ;;  %v1038_v38 = vadd.f32 %v1023_v0, %v5718_v18  ;;  %v1040_v4 = vadd.f32 %v1024_v44, %v5728_v27  ;;  %v1025_v3 = vrot.slane %v5923_v50, 2 }
 0x24d   :  { %4799 = vpow2.f32 %v3694_v2  ;;  %v1028_v2 = vrot.slane %v5923_v50, 5  ;;  %v1042_v5 = vadd.f32 %v1026_v29, %v5758_v39  ;;  %v6830_v29 = vld [vmem:[#allocation34_spill] sm:$0xff] }
 0x24e   :  { %4801 = vpow2.f32 %v3695_v12  ;;  %v3698_v10 = vmul.f32 -1.442695, %v1038_v38  ;;  %v3700_v62 = vmul.f32 -1.442695, %v1040_v4  ;;  %v1041_v0 = vadd.f32 %v1025_v3, %v5752_v34 }
 0x24f   :  { %4803 = vpow2.f32 %v3696_v54 }
 0x250   :  { %4805 = vpow2.f32 %v3697_v11  ;;  %v1029_v11 = vrot.slane %v5923_v50, 6  ;;  %v6829_v50 = vld [vmem:[#allocation33_spill] sm:$0xff]  ;;  %v3701_v34 = vmul.f32 -1.442695, %v1041_v0 }
 0x251   :  { %4807 = vpow2.f32 %v3698_v10 }
 0x252   :  { %4809 = vpow2.f32 %v3699_v30  ;;  %v1043_v30 = vadd.f32 %v1027_v48, %v5774_v47  ;;  %v1045_v3 = vadd.f32 %v1029_v11, %v6829_v50 }
 0x253   :  { %v4792_v13 = vpop.eup %4791  ;;  %4811 = vpow2.f32 %v3700_v62  ;;  %v1044_v62 = vadd.f32 %v1028_v2, %v5779_v52 }
 0x254   :  { %v4794_v59 = vpop.eup %4793  ;;  %v999_v1 = vadd.f32 1.0, %v4792_v13  ;;  %v3705_v2 = vmul.f32 -1.442695, %v1045_v3  ;;  %v6831_v3 = vld [vmem:[#allocation35_spill] sm:$0xff] }
 0x255   :  { %v4796_v58 = vpop.eup %4795  ;;  %v998_v57 = vadd.f32 1.0, %v4794_v59 }
 0x256   :  { %v4798_v12 = vpop.eup %4797  ;;  %v1000_v54 = vadd.f32 1.0, %v4796_v58  ;;  %4813 = vrcp.f32 %v999_v1 }
 0x257   :  { %v4800_v44 = vpop.eup %4799  ;;  %v1001_v38 = vadd.f32 1.0, %v4798_v12  ;;  %4815 = vrcp.f32 %v998_v57  ;;  %v3702_v57 = vmul.f32 -1.442695, %v1042_v5 }
 0x258   :  { %v4802_v4 = vpop.eup %4801  ;;  %v1002_v10 = vadd.f32 1.0, %v4800_v44  ;;  %4817 = vrcp.f32 %v1000_v54  ;;  %v1094_v54 = vadd.f32 %v6830_v29, %v5921_v43  ;;  %v3703_v44 = vmul.f32 -1.442695, %v1043_v30 }
 0x259   :  { %v4804_v13 = vpop.eup %4803  ;;  %v1003_v59 = vadd.f32 1.0, %v4802_v4  ;;  %4819 = vrcp.f32 %v1001_v38  ;;  %v3704_v4 = vmul.f32 -1.442695, %v1044_v62 }
 0x25a   :  { %v4806_v1 = vpop.eup %4805  ;;  %v1004_v58 = vadd.f32 1.0, %v4804_v13  ;;  %4821 = vrcp.f32 %v1002_v10  ;;  %v1096_v11 = vrot.slane %v1094_v54, 7  ;;  %v1097_v5 = vrot.slane %v1094_v54, 1 }
 0x25b   :  { %v1005_v12 = vadd.f32 1.0, %v4806_v1  ;;  %4823 = vrcp.f32 %v1003_v59  ;;  %v4808_v48 = vpop.eup %4807  ;;  %v1098_v30 = vrot.slane %v1094_v54, 2 }
 0x25c   :  { %4825 = vrcp.f32 %v1004_v58  ;;  %v4810_v38 = vpop.eup %4809  ;;  %v1070_v10 = vadd.f32 1.0, %v4808_v48  ;;  %v1100_v48 = vrot.slane %v1094_v54, 4 }
 0x25d   :  { %4827 = vrcp.f32 %v1005_v12  ;;  %v4812_v52 = vpop.eup %4811  ;;  %v1071_v0 = vadd.f32 1.0, %v4810_v38  ;;  %v1099_v12 = vrot.slane %v1094_v54, 3 }
 0x25e   :  { %4829 = vpow2.f32 %v3701_v34  ;;  %v1072_v58 = vadd.f32 1.0, %v4812_v52  ;;  %v1101_v52 = vrot.slane %v1094_v54, 5 }
 0x25f   :  { %4831 = vpow2.f32 %v3702_v57 }
 0x260   :  { %v4814_v13 = vpop.eup %4813  ;;  %4833 = vpow2.f32 %v3703_v44  ;;  %v6832_v44 = vld [vmem:[#allocation36_spill] sm:$0xff] }
 0x261   :  { %v4816_v59 = vpop.eup %4815  ;;  %v1112_v1 = vmul.f32 %v4814_v13, %v1094_v54  ;;  %4835 = vpow2.f32 %v3704_v4  ;;  %v6833_v4 = vld [vmem:[#allocation38_spill] sm:$0xff] }
 0x262   :  { %v4818_v43 = vpop.eup %4817  ;;  %v1111_v29 = vmul.f32 %v4816_v59, %v1096_v11  ;;  %4837 = vpow2.f32 %v3705_v2  ;;  %v1102_v2 = vrot.slane %v1094_v54, 6 }
 0x263   :  { %v4820_v62 = vpop.eup %4819  ;;  %v1113_v34 = vmul.f32 %v4818_v43, %v1097_v5  ;;  %v1120_v50 = vadd.f32 %v1112_v1, %v6831_v3  ;;  %4839 = vrcp.f32 %v1070_v10  ;;  %v6834_v5 = vld [vmem:[#allocation37_spill] sm:$0xff]  ;;  %v6835_v3 = vld [vmem:[#allocation39_spill] sm:$0xff] }
 0x264   :  { %v4822_v57 = vpop.eup %4821  ;;  %v1114_v47 = vmul.f32 %v4820_v62, %v1098_v30  ;;  %v1119_v38 = vadd.f32 %v1111_v29, %v6832_v44  ;;  %4841 = vrcp.f32 %v1071_v0 }
 0x265   :  { %v4824_v39 = vpop.eup %4823  ;;  %v1115_v13 = vmul.f32 %v4822_v57, %v1099_v12  ;;  %4843 = vrcp.f32 %v1072_v58  ;;  %v1121_v27 = vadd.f32 %v1113_v34, %v6833_v4 }
 0x266   :  { %v4826_v11 = vpop.eup %4825  ;;  %4845 = vtanh.f32 %v1119_v38  ;;  %v1116_v59 = vmul.f32 %v4824_v39, %v1100_v48  ;;  %v1122_v43 = vadd.f32 %v1114_v47, %v6834_v5  ;;  %v1151_v47 = vrot.slane %v5844_v60, 7  ;;  %v6836_v48 = vld [vmem:[#allocation40_spill] sm:$0xff] }
 0x267   :  { %v4828_v1 = vpop.eup %4827  ;;  %v1117_v10 = vmul.f32 %v4826_v11, %v1101_v52  ;;  %v1123_v24 = vadd.f32 %v1115_v13, %v6835_v3  ;;  %4847 = vtanh.f32 %v1120_v50 }
 0x268   :  { %v4830_v30 = vpop.eup %4829  ;;  %v1118_v29 = vmul.f32 %v4828_v1, %v1102_v2  ;;  %4849 = vtanh.f32 %v1121_v27  ;;  %v1124_v38 = vadd.f32 %v1116_v59, %v6836_v48  ;;  %v6837_v27 = vld [vmem:[#allocation41_spill] sm:$0xff]  ;;  %v6838_v2 = vld [vmem:[#allocation42_spill] sm:$0xff] }
 0x269   :  { %v4832_v0 = vpop.eup %4831  ;;  %v1073_v62 = vadd.f32 1.0, %v4830_v30  ;;  %4851 = vtanh.f32 %v1122_v43  ;;  %v1125_v52 = vadd.f32 %v1117_v10, %v6837_v27 }
 0x26a   :  { %v4834_v58 = vpop.eup %4833  ;;  %v1074_v12 = vadd.f32 1.0, %v4832_v0  ;;  %4853 = vtanh.f32 %v1123_v24  ;;  %v1126_v43 = vadd.f32 %v1118_v29, %v6838_v2  ;;  %v1152_v24 = vrot.slane %v5849_v49, 7 }
 0x26b   :  { %v4836_v34 = vpop.eup %4835  ;;  %v1075_v57 = vadd.f32 1.0, %v4834_v58  ;;  %4855 = vrcp.f32 %v1073_v62 }
 0x26c   :  { %v4838_v39 = vpop.eup %4837  ;;  %v1076_v54 = vadd.f32 1.0, %v4836_v34  ;;  %4857 = vrcp.f32 %v1074_v12 }
 0x26d   :  { %v4840_v50 = vpop.eup %4839  ;;  %v1077_v13 = vadd.f32 1.0, %v4838_v39  ;;  %4859 = vrcp.f32 %v1075_v57  ;;  %v6839_v39 = vrot.slane %v5847_v9, 7 }
 0x26e   :  { %v4842_v11 = vpop.eup %4841  ;;  %4861 = vrcp.f32 %v1076_v54  ;;  %v1166_v1 = vmul.f32 %v4840_v50, %v1151_v47  ;;  %v1135_v0 = vsub.f32 1.0, %v4840_v50  ;;  %v1153_v50 = vrot.slane %v5852_v14, 7 }
 0x26f   :  { %v4844_v30 = vpop.eup %4843  ;;  %4863 = vrcp.f32 %v1077_v13  ;;  %v1136_v62 = vsub.f32 1.0, %v4842_v11  ;;  %v1167_v29 = vmul.f32 %v4842_v11, %v6839_v39 }
 0x270   :  { %v4846_v60 = vpop.eup %4845  ;;  %4865 = vtanh.f32 %v1124_v38  ;;  %v1168_v58 = vmul.f32 %v4844_v30, %v1152_v24  ;;  %v1137_v12 = vsub.f32 1.0, %v4844_v30 }
 0x271   :  { %v4848_v59 = vpop.eup %4847  ;;  %4867 = vtanh.f32 %v1125_v52  ;;  %v1143_v34 = vmul.f32 %v4846_v60, %v1135_v0  ;;  %v1154_v52 = vrot.slane %v5856_v41, 7  ;;  %v1155_v0 = vrot.slane %v5870_v55, 7 }
 0x272   :  { %v4850_v57 = vpop.eup %4849  ;;  %4869 = vtanh.f32 %v1126_v43  ;;  %v1144_v10 = vmul.f32 %v4848_v59, %v1136_v62 }
 0x273   :  { %v4852_v54 = vpop.eup %4851  ;;  %v1145_v49 = vmul.f32 %v4850_v57, %v1137_v12  ;;  %v5963_v47 = vadd.f32 %v1166_v1, %v1143_v34  ;;  %v1156_v1 = vrot.slane %v5873_v17, 7  ;;  %v1157_v57 = vrot.slane %v5875_v7, 7 }
 0x274   :  { %v4854_v13 = vpop.eup %4853  ;;  %v5966_v38 = vadd.f32 %v1167_v29, %v1144_v10 }
 0x275   :  { %v4856_v24 = vpop.eup %4855  ;;  %v5969_v30 = vadd.f32 %v1168_v58, %v1145_v49  ;;  %1182 = vst [vmem:[#allocation9] sm:$0x2] %v5963_v47  ;;  %v1198_v43 = vrot.slane %v5963_v47, 1 }
 0x276   :  { %v4858_v9 = vpop.eup %4857  ;;  %v1138_v11 = vsub.f32 1.0, %v4856_v24  ;;  %v1169_v60 = vmul.f32 %v4856_v24, %v1153_v50  ;;  %1183 = vst [vmem:[#allocation9 + $0x8] sm:$0x2] %v5966_v38 }
 0x277   :  { %v4860_v14 = vpop.eup %4859  ;;  %v1139_v62 = vsub.f32 1.0, %v4858_v9  ;;  %v1170_v59 = vmul.f32 %v4858_v9, %v1154_v52  ;;  %1184 = vst [vmem:[#allocation9 + $0x10] sm:$0x2] %v5969_v30  ;;  %v1199_v41 = vsel %vm788_vm2, %v5966_v38, %v1198_v43  ;;  %v6765_v58 = vrot.slane %v5969_v30, 7 }
 0x278   :  { %v4862_v12 = vpop.eup %4861  ;;  %v1146_v34 = vmul.f32 %v4852_v54, %v1138_v11  ;;  %v1171_v55 = vmul.f32 %v4860_v14, %v1155_v0  ;;  %v1140_v17 = vsub.f32 1.0, %v4860_v14 }
 0x279   :  { %v4864_v10 = vpop.eup %4863  ;;  %v1147_v39 = vmul.f32 %v4854_v13, %v1139_v62  ;;  %v1172_v29 = vmul.f32 %v4862_v12, %v1156_v1  ;;  %v1141_v50 = vsub.f32 1.0, %v4862_v12  ;;  %v1201_v54 = vsel %vm791_vm3, %v6765_v58, %v1199_v41 }
 0x27a   :  { %v4866_v49 = vpop.eup %4865  ;;  %v1173_v24 = vmul.f32 %v4864_v10, %v1157_v57  ;;  %v5981_v52 = vadd.f32 %v1169_v60, %v1146_v34  ;;  %v1142_v2 = vsub.f32 1.0, %v4864_v10  ;;  %v6013_v10 = vld [vmem:[#allocation2] sm:$0xff] }
 0x27b   :  { %v4868_v9 = vpop.eup %4867  ;;  %v1148_v27 = vmul.f32 %v4866_v49, %v1140_v17  ;;  %v5983_v43 = vadd.f32 %v1170_v59, %v1147_v39  ;;  %v6840_v17 = vld [vmem:[#allocation15_spill] sm:$0xff]  ;;  %v6843_v49 = vld [vmem:[#allocation17_spill] sm:$0xff] }
 0x27c   :  { %v4870_v7 = vpop.eup %4869  ;;  %v1149_v11 = vmul.f32 %v4868_v9, %v1141_v50  ;;  %1185 = vst [vmem:[#allocation9 + $0x18] sm:$0x2] %v5981_v52  ;;  %v1202_v13 = vrot.slane %v5981_v52, 6  ;;  %v6841_v39 = vld [vmem:[#allocation19_spill] sm:$0xff]  ;;  %v6844_v50 = vld [vmem:[#allocation20_spill] sm:$0xff] }
 0x27d   :  { %v1150_v0 = vmul.f32 %v4870_v7, %v1142_v2  ;;  %v5990_v1 = vadd.f32 %v1171_v55, %v1148_v27  ;;  %1186 = vst [vmem:[#allocation9 + $0x20] sm:$0x2] %v5983_v43  ;;  %v1204_v60 = vrot.slane %v5983_v43, 5 }
 0x27e   :  { %v5994_v14 = vadd.f32 %v1172_v29, %v1149_v11  ;;  %v1203_v62 = vsel %vm794_vm4, %v1202_v13, %v1201_v54  ;;  %v6842_v29 = vld [vmem:[#allocation16_spill] sm:$0xff] }
 0x27f   :  { %v5997_v59 = vadd.f32 %v1173_v24, %v1150_v0  ;;  %1187 = vst [vmem:[#allocation9 + $0x28] sm:$0x2] %v5990_v1  ;;  %v1205_v41 = vsel %vm797_vm5, %v1204_v60, %v1203_v62  ;;  %v1206_v12 = vrot.slane %v5990_v1, 4  ;;  %v6845_v24 = vld [vmem:[#allocation13_spill] sm:$0xff] }
 0x280   :  { %1188 = vst [vmem:[#allocation9 + $0x30] sm:$0x2] %v5994_v14  ;;  %v1208_v27 = vrot.slane %v5994_v14, 3 }
 0x281   :  { %1189 = vst [vmem:[#allocation9 + $0x38] sm:$0x2] %v5997_v59  ;;  %v1207_v2 = vsel %vm800_vm6, %v1206_v12, %v1205_v41  ;;  %v1210_v34 = vrot.slane %v5997_v59, 2 }
 0x282   :  { %v1209_v57 = vsel %vm803_vm7, %v1208_v27, %v1207_v2 }
 0x283   :  { %v1211_v55 = vsel %vm806_vm8, %v1210_v34, %v1209_v57 }
 0x284   :  { %1278 = vmatmul.mubr.f32.vlgmr.msra.gmra.mrb[20].mxu0 %v1211_v55  ;;  %4067 = vmatmul.mubr.f32.vlgmr.msra.gmra.mrb[12].mxu1 %v1211_v55 }
 0x285   :  { %4423 = vmatpush1.bf16.msra.mxu0 %v5542_v15  ;;  %4454 = vmatpush3.bf16.msra.mxu1 %v5564_v40 }
 0x286   :  { %4425 = vmatprep.subr.bf16.mxu0 %v5545_v16  ;;  %4455 = vmatprep.subr.bf16.mxu1 %v6820_v21 }
 0x287   :  { %1681 = vmatprep.mubr.f32.mxu0 %v6013_v10  ;;  %4101 = vmatprep.mubr.msk.f32.mxu1 %vm5460_vm1, %v6013_v10 }
 0x289   :  { %4427 = vmatpush1.bf16.msra.mxu0 %v5550_v22  ;;  %4457 = vmatpush3.bf16.msra.mxu1 %v5577_v51 }
 0x28a   :  { %4429 = vmatprep.subr.bf16.mxu0 %v5553_v23  ;;  %4458 = vmatprep.subr.bf16.mxu1 %v6820_v21 }
 0x28d   :  { %4431 = vmatpush1.bf16.msra.mxu0 %v5558_v31  ;;  %4460 = vmatpush3.bf16.msra.mxu1 %v5590_v61 }
 0x28e   :  { %4433 = vmatprep.subr.bf16.mxu0 %v5561_v33  ;;  %4461 = vmatprep.subr.bf16.mxu1 %v6820_v21 }
 0x291   :  { %4435 = vmatpush1.bf16.msra.mxu0 %v5568_v42  ;;  %4463 = vmatpush3.bf16.msra.mxu1 %v5603_v8 }
 0x292   :  { %4437 = vmatprep.subr.bf16.mxu0 %v5571_v45  ;;  %4464 = vmatprep.subr.bf16.mxu1 %v6820_v21 }
 0x295   :  { %4439 = vmatpush1.bf16.msra.mxu0 %v5581_v53  ;;  %4466 = vmatpush3.bf16.msra.mxu1 %v5616_v19 }
 0x296   :  { %4441 = vmatprep.subr.bf16.mxu0 %v5584_v56  ;;  %4467 = vmatprep.subr.bf16.mxu1 %v6820_v21 }
 0x299   :  { %4443 = vmatpush1.bf16.msra.mxu0 %v5594_v63  ;;  %4469 = vmatpush3.bf16.msra.mxu1 %v5627_v26 }
 0x29a   :  { %4445 = vmatprep.subr.bf16.mxu0 %v6821_v6  ;;  %4470 = vmatprep.subr.bf16.mxu1 %v6820_v21 }
 0x29d   :  { %4447 = vmatpush1.bf16.msra.mxu0 %v6840_v17  ;;  %4472 = vmatpush3.bf16.msra.mxu1 %v6841_v39 }
 0x29e   :  { %4449 = vmatprep.subr.bf16.mxu0 %v6842_v29  ;;  %4473 = vmatprep.subr.bf16.mxu1 %v6820_v21 }
 0x2a1   :  { %4451 = vmatpush1.bf16.msra.mxu0 %v6843_v49  ;;  %4475 = vmatpush3.bf16.msra.mxu1 %v6844_v50 }
 0x2a2   :  { %4477 = vmatprep.subr.bf16.mxu0 %v6845_v24  ;;  %4508 = vmatprep.subr.bf16.mxu1 %v6820_v21 }
 0x357   :  { %v1279_v9 = vpop.f32.mrb[20].mxu0  ;;  %v6046_v54 = vpop.f32.mrb[12].mxu1 }
 0x358   :  { %v1355_v7 = vrot.slane %v1279_v9, 6  ;;  %v1356_v11 = vrot.slane %v1279_v9, 7  ;;  %v1357_v13 = vrot.slane %v1279_v9, 1  ;;  %v1358_v0 = vrot.slane %v1279_v9, 2  ;;  %v6048_v60 = vpop.f32.mrb[21].mxu0  ;;  %v4068_v62 = vpop.f32.mrb[13].mxu1 }
 0x359   :  { %v1359_v41 = vrot.slane %v1279_v9, 3  ;;  %v1360_v12 = vrot.slane %v1279_v9, 4  ;;  %v1361_v27 = vrot.slane %v1279_v9, 5  ;;  %v1372_v2 = vadd.f32 %v1279_v9, %v5725_v25 }
 0x35a   :  { %v1370_v34 = vadd.f32 %v1355_v7, %v6828_v46  ;;  %v1371_v57 = vadd.f32 %v1356_v11, %v5720_v20  ;;  %v1373_v55 = vadd.f32 %v1357_v13, %v5730_v28  ;;  %v1374_v58 = vadd.f32 %v1358_v0, %v5734_v32 }
 0x35b   :  { %v1375_v24 = vadd.f32 %v1359_v41, %v5736_v35  ;;  %v1376_v50 = vadd.f32 %v1360_v12, %v5738_v36  ;;  %v3708_v49 = vmul.f32 -1.442695, %v1372_v2  ;;  %v1377_v62 = vadd.f32 %v1361_v27, %v5740_v37  ;;  %v6846_v27 = vld [vmem:[#allocation23_spill] sm:$0xff] }
 0x35c   :  { %v3706_v29 = vmul.f32 -1.442695, %v1370_v34  ;;  %v3707_v39 = vmul.f32 -1.442695, %v1371_v57  ;;  %v3709_v17 = vmul.f32 -1.442695, %v1373_v55 }
 0x35d   :  { %4871 = vpow2.f32 %v3708_v49  ;;  %v3710_v9 = vmul.f32 -1.442695, %v1374_v58  ;;  %v3711_v7 = vmul.f32 -1.442695, %v1375_v24  ;;  %v3712_v11 = vmul.f32 -1.442695, %v1376_v50 }
 0x35e   :  { %4873 = vpow2.f32 %v3706_v29  ;;  %v3713_v13 = vmul.f32 -1.442695, %v1377_v62  ;;  %v1427_v0 = vrot.slane %v6048_v60, 6  ;;  %v1428_v41 = vrot.slane %v6048_v60, 7  ;;  %v6847_v34 = vld [vmem:[#allocation24_spill] sm:$0xff] }
 0x35f   :  { %4875 = vpow2.f32 %v3707_v39  ;;  %v1444_v58 = vadd.f32 %v6048_v60, %v6847_v34  ;;  %v1430_v24 = vrot.slane %v6048_v60, 2  ;;  %v1431_v62 = vrot.slane %v6048_v60, 3 }
 0x360   :  { %4877 = vpow2.f32 %v3709_v17  ;;  %v1442_v12 = vadd.f32 %v1427_v0, %v5718_v18  ;;  %v1443_v2 = vadd.f32 %v1428_v41, %v6846_v27  ;;  %v1429_v17 = vrot.slane %v6048_v60, 1 }
 0x361   :  { %4879 = vpow2.f32 %v3710_v9  ;;  %v3716_v49 = vmul.f32 -1.442695, %v1444_v58  ;;  %v1433_v41 = vrot.slane %v6048_v60, 5 }
 0x362   :  { %4881 = vpow2.f32 %v3711_v7  ;;  %v3714_v29 = vmul.f32 -1.442695, %v1442_v12  ;;  %v3715_v39 = vmul.f32 -1.442695, %v1443_v2  ;;  %v6848_v12 = vld [vmem:[#allocation29_spill] sm:$0xff] }
 0x363   :  { %4883 = vpow2.f32 %v3712_v11  ;;  %v1432_v11 = vrot.slane %v6048_v60, 4  ;;  %v1445_v2 = vadd.f32 %v1429_v17, %v6848_v12  ;;  %v6852_v60 = vld [vmem:[#allocation33_spill] sm:$0xff] }
 0x364   :  { %4885 = vpow2.f32 %v3713_v13  ;;  %v1449_v17 = vadd.f32 %v1433_v41, %v6852_v60 }
 0x365   :  { %4887 = vpow2.f32 %v3714_v29  ;;  %v6849_v29 = vld [vmem:[#allocation30_spill] sm:$0xff]  ;;  %v3717_v12 = vmul.f32 -1.442695, %v1445_v2 }
 0x366   :  { %4889 = vpow2.f32 %v3715_v39  ;;  %v6850_v39 = vld [vmem:[#allocation31_spill] sm:$0xff] }
 0x367   :  { %v4872_v50 = vpop.eup %4871  ;;  %4891 = vpow2.f32 %v3716_v49  ;;  %v6851_v49 = vld [vmem:[#allocation32_spill] sm:$0xff] }
 0x368   :  { %v4874_v57 = vpop.eup %4873  ;;  %v1404_v55 = vadd.f32 1.0, %v4872_v50  ;;  %v1446_v50 = vadd.f32 %v1430_v24, %v6849_v29  ;;  %v6077_v24 = vld [vmem:[%s6711_s4] ss:$0 sm:$0xff] }
 0x369   :  { %v4876_v9 = vpop.eup %4875  ;;  %v1402_v7 = vadd.f32 1.0, %v4874_v57  ;;  %v1447_v57 = vadd.f32 %v1431_v62, %v6850_v39  ;;  %6853 = vst [vmem:[#allocation21_spill] sm:$0xff] %v6077_v24 }
 0x36a   :  { %v4878_v13 = vpop.eup %4877  ;;  %v1403_v0 = vadd.f32 1.0, %v4876_v9  ;;  %4893 = vrcp.f32 %v1404_v55  ;;  %v1448_v9 = vadd.f32 %v1432_v11, %v6851_v49  ;;  %v3721_v11 = vmul.f32 -1.442695, %v1449_v17 }
 0x36b   :  { %v4880_v58 = vpop.eup %4879  ;;  %v1405_v34 = vadd.f32 1.0, %v4878_v13  ;;  %4895 = vrcp.f32 %v1402_v7  ;;  %v3718_v7 = vmul.f32 -1.442695, %v1446_v50 }
 0x36c   :  { %v4882_v27 = vpop.eup %4881  ;;  %v1406_v18 = vadd.f32 1.0, %v4880_v58  ;;  %4897 = vrcp.f32 %v1403_v0 }
 0x36d   :  { %v4884_v37 = vpop.eup %4883  ;;  %v1407_v36 = vadd.f32 1.0, %v4882_v27  ;;  %4899 = vrcp.f32 %v1405_v34  ;;  %v1498_v27 = vadd.f32 %v6077_v24, %v6046_v54  ;;  %v3719_v34 = vmul.f32 -1.442695, %v1447_v57 }
 0x36e   :  { %v4886_v55 = vpop.eup %4885  ;;  %v1408_v35 = vadd.f32 1.0, %v4884_v37  ;;  %4901 = vrcp.f32 %v1406_v18  ;;  %v3720_v37 = vmul.f32 -1.442695, %v1448_v9 }
 0x36f   :  { %v1409_v13 = vadd.f32 1.0, %v4886_v55  ;;  %4903 = vrcp.f32 %v1407_v36  ;;  %v4888_v62 = vpop.eup %4887  ;;  %v1501_v50 = vrot.slane %v1498_v27, 7  ;;  %v1502_v57 = vrot.slane %v1498_v27, 1 }
 0x370   :  { %4905 = vrcp.f32 %v1408_v35  ;;  %v4890_v18 = vpop.eup %4889  ;;  %v1474_v36 = vadd.f32 1.0, %v4888_v62  ;;  %v1500_v35 = vrot.slane %v1498_v27, 6  ;;  %v1505_v39 = vrot.slane %v1498_v27, 4 }
 0x371   :  { %4907 = vrcp.f32 %v1409_v13  ;;  %v4892_v0 = vpop.eup %4891  ;;  %v1475_v2 = vadd.f32 1.0, %v4890_v18  ;;  %v1503_v13 = vrot.slane %v1498_v27, 2 }
 0x372   :  { %4909 = vpow2.f32 %v3717_v12  ;;  %v1476_v60 = vadd.f32 1.0, %v4892_v0  ;;  %v1504_v12 = vrot.slane %v1498_v27, 3 }
 0x373   :  { %4911 = vpow2.f32 %v3718_v7 }
 0x374   :  { %v4894_v41 = vpop.eup %4893  ;;  %4913 = vpow2.f32 %v3719_v34 }
 0x375   :  { %v4896_v58 = vpop.eup %4895  ;;  %v1517_v55 = vmul.f32 %v4894_v41, %v1498_v27  ;;  %4915 = vpow2.f32 %v3720_v37  ;;  %v6854_v37 = vld [vmem:[#allocation35_spill] sm:$0xff] }
 0x376   :  { %v4898_v54 = vpop.eup %4897  ;;  %v1515_v24 = vmul.f32 %v4896_v58, %v1500_v35  ;;  %4917 = vpow2.f32 %v3721_v11  ;;  %v1506_v11 = vrot.slane %v1498_v27, 5 }
 0x377   :  { %v4900_v9 = vpop.eup %4899  ;;  %v1516_v17 = vmul.f32 %v4898_v54, %v1501_v50  ;;  %4919 = vrcp.f32 %v1474_v36  ;;  %v1525_v18 = vadd.f32 %v1517_v55, %v6833_v4 }
 0x378   :  { %v4902_v7 = vpop.eup %4901  ;;  %v1523_v62 = vadd.f32 %v1515_v24, %v6832_v44  ;;  %4921 = vrcp.f32 %v1475_v2  ;;  %v1518_v34 = vmul.f32 %v4900_v9, %v1502_v57 }
 0x379   :  { %v4904_v49 = vpop.eup %4903  ;;  %v1519_v41 = vmul.f32 %v4902_v7, %v1503_v13  ;;  %v1524_v0 = vadd.f32 %v1516_v17, %v6854_v37  ;;  %4923 = vrcp.f32 %v1476_v60 }
 0x37a   :  { %v4906_v35 = vpop.eup %4905  ;;  %4925 = vtanh.f32 %v1523_v62  ;;  %v1520_v58 = vmul.f32 %v4904_v49, %v1504_v12  ;;  %v1526_v50 = vadd.f32 %v1518_v34, %v6834_v5  ;;  %v1556_v34 = vrot.slane %v5966_v38, 7 }
 0x37b   :  { %v4908_v36 = vpop.eup %4907  ;;  %4927 = vtanh.f32 %v1524_v0  ;;  %v1521_v54 = vmul.f32 %v4906_v35, %v1505_v39  ;;  %v1527_v24 = vadd.f32 %v1519_v41, %v6835_v3  ;;  %v1555_v39 = vrot.slane %v5963_v47, 7  ;;  %v6855_v41 = vld [vmem:[#allocation41_spill] sm:$0xff] }
 0x37c   :  { %v4910_v2 = vpop.eup %4909  ;;  %v1522_v57 = vmul.f32 %v4908_v36, %v1506_v11  ;;  %4929 = vtanh.f32 %v1525_v18  ;;  %v1528_v12 = vadd.f32 %v1520_v58, %v6836_v48  ;;  %v6856_v11 = vld [vmem:[#allocation42_spill] sm:$0xff] }
 0x37d   :  { %v4912_v55 = vpop.eup %4911  ;;  %v1477_v9 = vadd.f32 1.0, %v4910_v2  ;;  %4931 = vtanh.f32 %v1526_v50  ;;  %v1529_v0 = vadd.f32 %v1521_v54, %v6855_v41 }
 0x37e   :  { %v4914_v13 = vpop.eup %4913  ;;  %v1478_v60 = vadd.f32 1.0, %v4912_v55  ;;  %4933 = vtanh.f32 %v1527_v24  ;;  %v1530_v50 = vadd.f32 %v1522_v57, %v6856_v11 }
 0x37f   :  { %v4916_v17 = vpop.eup %4915  ;;  %v1479_v7 = vadd.f32 1.0, %v4914_v13  ;;  %4935 = vrcp.f32 %v1477_v9 }
 0x380   :  { %v4918_v49 = vpop.eup %4917  ;;  %v1480_v27 = vadd.f32 1.0, %v4916_v17  ;;  %4937 = vrcp.f32 %v1478_v60 }
 0x381   :  { %v4920_v62 = vpop.eup %4919  ;;  %v1481_v18 = vadd.f32 1.0, %v4918_v49  ;;  %4939 = vrcp.f32 %v1479_v7  ;;  %v6857_v49 = vrot.slane %v5969_v30, 7  ;;  %v1559_v30 = vrot.slane %v5990_v1, 7 }
 0x382   :  { %v4922_v35 = vpop.eup %4921  ;;  %4941 = vrcp.f32 %v1480_v27  ;;  %v1570_v36 = vmul.f32 %v4920_v62, %v1555_v39  ;;  %v1539_v2 = vsub.f32 1.0, %v4920_v62  ;;  %v1557_v62 = vrot.slane %v5981_v52, 7 }
 0x383   :  { %v4924_v24 = vpop.eup %4923  ;;  %4943 = vrcp.f32 %v1481_v18  ;;  %v1571_v55 = vmul.f32 %v4922_v35, %v1556_v34  ;;  %v1540_v58 = vsub.f32 1.0, %v4922_v35  ;;  %v1558_v18 = vrot.slane %v5983_v43, 7 }
 0x384   :  { %v4926_v9 = vpop.eup %4925  ;;  %4945 = vtanh.f32 %v1528_v12  ;;  %v1541_v13 = vsub.f32 1.0, %v4924_v24  ;;  %v1572_v57 = vmul.f32 %v4924_v24, %v6857_v49 }
 0x385   :  { %v4928_v47 = vpop.eup %4927  ;;  %4947 = vtanh.f32 %v1529_v0  ;;  %v1547_v38 = vmul.f32 %v4926_v9, %v1539_v2  ;;  %v1560_v9 = vrot.slane %v5994_v14, 7 }
 0x386   :  { %v4930_v60 = vpop.eup %4929  ;;  %4949 = vtanh.f32 %v1530_v50  ;;  %v1548_v17 = vmul.f32 %v4928_v47, %v1540_v58 }
 0x387   :  { %v4932_v54 = vpop.eup %4931  ;;  %v1549_v7 = vmul.f32 %v4930_v60, %v1541_v13  ;;  %v6093_v27 = vadd.f32 %v1570_v36, %v1547_v38  ;;  %v1561_v13 = vrot.slane %v5997_v59, 7 }
 0x388   :  { %v4934_v39 = vpop.eup %4933  ;;  %v6096_v34 = vadd.f32 %v1571_v55, %v1548_v17 }
 0x389   :  { %v4936_v12 = vpop.eup %4935  ;;  %v6099_v0 = vadd.f32 %v1572_v57, %v1549_v7  ;;  %1586 = vst [vmem:[#allocation9] sm:$0x4] %v6093_v27  ;;  %v1602_v35 = vrot.slane %v6093_v27, 2 }
 0x38a   :  { %v4938_v50 = vpop.eup %4937  ;;  %v1542_v2 = vsub.f32 1.0, %v4936_v12  ;;  %v1573_v36 = vmul.f32 %v4936_v12, %v1557_v62  ;;  %1587 = vst [vmem:[#allocation9 + $0x8] sm:$0x4] %v6096_v34  ;;  %v1603_v52 = vrot.slane %v6096_v34, 1 }
 0x38b   :  { %v4940_v24 = vpop.eup %4939  ;;  %v1543_v55 = vsub.f32 1.0, %v4938_v50  ;;  %v1574_v43 = vmul.f32 %v4938_v50, %v1558_v18  ;;  %1588 = vst [vmem:[#allocation9 + $0x10] sm:$0x4] %v6099_v0 }
 0x38c   :  { %v4942_v58 = vpop.eup %4941  ;;  %v1550_v47 = vmul.f32 %v4932_v54, %v1542_v2  ;;  %v1575_v38 = vmul.f32 %v4940_v24, %v1559_v30  ;;  %v1604_v60 = vsel %vm788_vm2, %v1603_v52, %v1602_v35  ;;  %v1544_v17 = vsub.f32 1.0, %v4940_v24 }
 0x38d   :  { %v4944_v1 = vpop.eup %4943  ;;  %v1551_v7 = vmul.f32 %v4934_v39, %v1543_v55  ;;  %v1576_v49 = vmul.f32 %v4942_v58, %v1560_v9  ;;  %v1605_v57 = vsel %vm791_vm3, %v6099_v0, %v1604_v60  ;;  %v1545_v12 = vsub.f32 1.0, %v4942_v58 }
 0x38e   :  { %v4946_v62 = vpop.eup %4945  ;;  %v1577_v14 = vmul.f32 %v4944_v1, %v1561_v13  ;;  %v6112_v18 = vadd.f32 %v1573_v36, %v1550_v47  ;;  %v1546_v11 = vsub.f32 1.0, %v4944_v1  ;;  %v6859_v1 = vld [vmem:[#allocation19_spill] sm:$0xff] }
 0x38f   :  { %v4948_v50 = vpop.eup %4947  ;;  %v1552_v54 = vmul.f32 %v4946_v62, %v1544_v17  ;;  %v6114_v2 = vadd.f32 %v1574_v43, %v1551_v7  ;;  %v6860_v17 = vld [vmem:[#allocation16_spill] sm:$0xff]  ;;  %v6861_v7 = vld [vmem:[#allocation17_spill] sm:$0xff] }
 0x390   :  { %v4950_v59 = vpop.eup %4949  ;;  %v1553_v30 = vmul.f32 %v4948_v50, %v1545_v12  ;;  %1589 = vst [vmem:[#allocation9 + $0x18] sm:$0x4] %v6112_v18  ;;  %v6775_v39 = vrot.slane %v6112_v18, 7 }
 0x391   :  { %v1554_v35 = vmul.f32 %v4950_v59, %v1546_v11  ;;  %v6118_v52 = vadd.f32 %v1575_v38, %v1552_v54  ;;  %1590 = vst [vmem:[#allocation9 + $0x20] sm:$0x4] %v6114_v2  ;;  %v1608_v24 = vrot.slane %v6114_v2, 6 }
 0x392   :  { %v6122_v36 = vadd.f32 %v1576_v49, %v1553_v30  ;;  %v1607_v55 = vsel %vm794_vm4, %v6775_v39, %v1605_v57  ;;  %v6862_v49 = vld [vmem:[#allocation20_spill] sm:$0xff]  ;;  %v6863_v57 = vld [vmem:[#allocation13_spill] sm:$0xff] }
 0x393   :  { %v6127_v9 = vadd.f32 %v1577_v14, %v1554_v35  ;;  %1591 = vst [vmem:[#allocation9 + $0x28] sm:$0x4] %v6118_v52  ;;  %v1609_v43 = vsel %vm797_vm5, %v1608_v24, %v1607_v55  ;;  %v1610_v11 = vrot.slane %v6118_v52, 5 }
 0x394   :  { %1592 = vst [vmem:[#allocation9 + $0x30] sm:$0x4] %v6122_v36  ;;  %v1612_v58 = vrot.slane %v6122_v36, 4 }
 0x395   :  { %1593 = vst [vmem:[#allocation9 + $0x38] sm:$0x4] %v6127_v9  ;;  %v1611_v47 = vsel %vm800_vm6, %v1610_v11, %v1609_v43  ;;  %v1614_v13 = vrot.slane %v6127_v9, 3 }
 0x396   :  { %v1613_v38 = vsel %vm803_vm7, %v1612_v58, %v1611_v47 }
 0x397   :  { %v1615_v60 = vsel %vm806_vm8, %v1614_v13, %v1613_v38 }
 0x398   :  { %1682 = vmatmul.mubr.f32.vlgmr.msra.gmra.mrb[22].mxu0 %v1615_v60  ;;  %4102 = vmatmul.mubr.f32.vlgmr.msra.gmra.mrb[14].mxu1 %v1615_v60  ;;  %v6864_v60 = vld [vmem:[#allocation26_spill] sm:$0xff] }
 0x399   :  { %4479 = vmatpush1.bf16.msra.mxu0 %v5542_v15  ;;  %4510 = vmatpush3.bf16.msra.mxu1 %v5564_v40 }
 0x39a   :  { %4481 = vmatprep.subr.bf16.mxu0 %v5545_v16  ;;  %4511 = vmatprep.subr.bf16.mxu1 %v6820_v21 }
 0x39b   :  { %2085 = vmatprep.mubr.f32.mxu0 %v6013_v10  ;;  %4136 = vmatprep.mubr.msk.f32.mxu1 %vm5460_vm1, %v6013_v10  ;;  %v6858_v10 = vld [vmem:[#allocation15_spill] sm:$0xff] }
 0x39d   :  { %4483 = vmatpush1.bf16.msra.mxu0 %v5550_v22  ;;  %4513 = vmatpush3.bf16.msra.mxu1 %v5577_v51 }
 0x39e   :  { %4485 = vmatprep.subr.bf16.mxu0 %v5553_v23  ;;  %4514 = vmatprep.subr.bf16.mxu1 %v6820_v21 }
 0x3a1   :  { %4487 = vmatpush1.bf16.msra.mxu0 %v5558_v31  ;;  %4516 = vmatpush3.bf16.msra.mxu1 %v5590_v61 }
 0x3a2   :  { %4489 = vmatprep.subr.bf16.mxu0 %v5561_v33  ;;  %4517 = vmatprep.subr.bf16.mxu1 %v6820_v21 }
 0x3a5   :  { %4491 = vmatpush1.bf16.msra.mxu0 %v5568_v42  ;;  %4519 = vmatpush3.bf16.msra.mxu1 %v5603_v8 }
 0x3a6   :  { %4493 = vmatprep.subr.bf16.mxu0 %v5571_v45  ;;  %4520 = vmatprep.subr.bf16.mxu1 %v6820_v21 }
 0x3a9   :  { %4495 = vmatpush1.bf16.msra.mxu0 %v5581_v53  ;;  %4522 = vmatpush3.bf16.msra.mxu1 %v5616_v19 }
 0x3aa   :  { %4497 = vmatprep.subr.bf16.mxu0 %v5584_v56  ;;  %4523 = vmatprep.subr.bf16.mxu1 %v6820_v21 }
 0x3ad   :  { %4499 = vmatpush1.bf16.msra.mxu0 %v5594_v63  ;;  %4525 = vmatpush3.bf16.msra.mxu1 %v5627_v26 }
 0x3ae   :  { %4501 = vmatprep.subr.bf16.mxu0 %v6821_v6  ;;  %4526 = vmatprep.subr.bf16.mxu1 %v6820_v21 }
 0x3b1   :  { %4503 = vmatpush1.bf16.msra.mxu0 %v6858_v10  ;;  %4528 = vmatpush3.bf16.msra.mxu1 %v6859_v1 }
 0x3b2   :  { %4505 = vmatprep.subr.bf16.mxu0 %v6860_v17  ;;  %4529 = vmatprep.subr.bf16.mxu1 %v6820_v21 }
 0x3b5   :  { %4507 = vmatpush1.bf16.msra.mxu0 %v6861_v7  ;;  %4531 = vmatpush3.bf16.msra.mxu1 %v6862_v49  ;;  %v6866_v7 = vld [vmem:[#allocation28_spill] sm:$0xff] }
 0x3b6   :  { %4533 = vmatprep.subr.bf16.mxu0 %v6863_v57  ;;  %4564 = vmatprep.subr.bf16.mxu1 %v6820_v21  ;;  %v6865_v57 = vld [vmem:[#allocation27_spill] sm:$0xff] }
 0x46b   :  { %v1683_v62 = vpop.f32.mrb[22].mxu0  ;;  %v6174_v12 = vpop.f32.mrb[14].mxu1 }
 0x46c   :  { %v1759_v14 = vrot.slane %v1683_v62, 5  ;;  %v1760_v50 = vrot.slane %v1683_v62, 6  ;;  %v1761_v54 = vrot.slane %v1683_v62, 7  ;;  %v1762_v59 = vrot.slane %v1683_v62, 1  ;;  %v6176_v30 = vpop.f32.mrb[23].mxu0  ;;  %v4103_v35 = vpop.f32.mrb[15].mxu1 }
 0x46d   :  { %v1763_v24 = vrot.slane %v1683_v62, 2  ;;  %v1764_v55 = vrot.slane %v1683_v62, 3  ;;  %v1765_v43 = vrot.slane %v1683_v62, 4  ;;  %v1777_v11 = vadd.f32 %v1683_v62, %v5730_v28 }
 0x46e   :  { %v1774_v58 = vadd.f32 %v1759_v14, %v6828_v46  ;;  %v1775_v47 = vadd.f32 %v1760_v50, %v5720_v20  ;;  %v1776_v13 = vadd.f32 %v1761_v54, %v5725_v25  ;;  %v1778_v38 = vadd.f32 %v1762_v59, %v5734_v32 }
 0x46f   :  { %v1779_v39 = vadd.f32 %v1763_v24, %v6864_v60  ;;  %v1780_v49 = vadd.f32 %v1764_v55, %v6865_v57  ;;  %v1781_v17 = vadd.f32 %v1765_v43, %v6866_v7  ;;  %v3725_v35 = vmul.f32 -1.442695, %v1777_v11  ;;  %v6867_v55 = vld [vmem:[#allocation22_spill] sm:$0xff]  ;;  %v6868_v11 = vld [vmem:[#allocation23_spill] sm:$0xff]  ;;  %v6873_v57 = vld [vmem:[#allocation33_spill] sm:$0xff] }
 0x470   :  { %v3722_v1 = vmul.f32 -1.442695, %v1774_v58  ;;  %v3723_v10 = vmul.f32 -1.442695, %v1775_v47  ;;  %v3724_v6 = vmul.f32 -1.442695, %v1776_v13 }
 0x471   :  { %4951 = vpow2.f32 %v3725_v35  ;;  %v3726_v62 = vmul.f32 -1.442695, %v1778_v38  ;;  %v3727_v14 = vmul.f32 -1.442695, %v1779_v39  ;;  %v3728_v50 = vmul.f32 -1.442695, %v1780_v49 }
 0x472   :  { %4953 = vpow2.f32 %v3722_v1  ;;  %v3729_v28 = vmul.f32 -1.442695, %v1781_v17  ;;  %v1831_v54 = vrot.slane %v6176_v30, 5  ;;  %v1832_v59 = vrot.slane %v6176_v30, 6  ;;  %v6869_v47 = vld [vmem:[#allocation24_spill] sm:$0xff] }
 0x473   :  { %4955 = vpow2.f32 %v3723_v10  ;;  %v1833_v24 = vrot.slane %v6176_v30, 7  ;;  %v1834_v49 = vrot.slane %v6176_v30, 1  ;;  %v1835_v35 = vrot.slane %v6176_v30, 2 }
 0x474   :  { %4957 = vpow2.f32 %v3724_v6  ;;  %v1846_v43 = vadd.f32 %v1831_v54, %v6867_v55  ;;  %v1847_v58 = vadd.f32 %v1832_v59, %v6868_v11  ;;  %v1836_v54 = vrot.slane %v6176_v30, 3 }
 0x475   :  { %4959 = vpow2.f32 %v3726_v62  ;;  %v1848_v1 = vadd.f32 %v1833_v24, %v6869_v47  ;;  %v6870_v24 = vld [vmem:[#allocation29_spill] sm:$0xff] }
 0x476   :  { %4961 = vpow2.f32 %v3727_v14  ;;  %v3730_v39 = vmul.f32 -1.442695, %v1846_v43  ;;  %v3731_v10 = vmul.f32 -1.442695, %v1847_v58  ;;  %v1849_v43 = vadd.f32 %v6176_v30, %v6870_v24 }
 0x477   :  { %4963 = vpow2.f32 %v3728_v50  ;;  %v3732_v17 = vmul.f32 -1.442695, %v1848_v1 }
 0x478   :  { %4965 = vpow2.f32 %v3729_v28  ;;  %v1837_v28 = vrot.slane %v6176_v30, 4  ;;  %v3733_v24 = vmul.f32 -1.442695, %v1849_v43 }
 0x479   :  { %4967 = vpow2.f32 %v3730_v39  ;;  %v1850_v39 = vadd.f32 %v1834_v49, %v6849_v29  ;;  %v6874_v49 = vld [vmem:[#allocation21_spill] sm:$0xff] }
 0x47a   :  { %4969 = vpow2.f32 %v3731_v10  ;;  %v1853_v30 = vadd.f32 %v1837_v28, %v6873_v57 }
 0x47b   :  { %v4952_v6 = vpop.eup %4951  ;;  %4971 = vpow2.f32 %v3732_v17 }
 0x47c   :  { %v4954_v13 = vpop.eup %4953  ;;  %v1809_v38 = vadd.f32 1.0, %v4952_v6 }
 0x47d   :  { %v4956_v62 = vpop.eup %4955  ;;  %v1806_v14 = vadd.f32 1.0, %v4954_v13  ;;  %v6871_v13 = vld [vmem:[#allocation31_spill] sm:$0xff] }
 0x47e   :  { %v4958_v50 = vpop.eup %4957  ;;  %v1807_v59 = vadd.f32 1.0, %v4956_v62  ;;  %4973 = vrcp.f32 %v1809_v38  ;;  %v1851_v47 = vadd.f32 %v1835_v35, %v6871_v13  ;;  %v6872_v62 = vld [vmem:[#allocation32_spill] sm:$0xff] }
 0x47f   :  { %v4960_v58 = vpop.eup %4959  ;;  %v1808_v1 = vadd.f32 1.0, %v4958_v50  ;;  %4975 = vrcp.f32 %v1806_v14  ;;  %v1852_v38 = vadd.f32 %v1836_v54, %v6872_v62  ;;  %v3734_v14 = vmul.f32 -1.442695, %v1850_v39 }
 0x480   :  { %v4962_v6 = vpop.eup %4961  ;;  %v1810_v10 = vadd.f32 1.0, %v4960_v58  ;;  %4977 = vrcp.f32 %v1807_v59  ;;  %v1902_v59 = vadd.f32 %v6874_v49, %v6174_v12  ;;  %v3735_v58 = vmul.f32 -1.442695, %v1851_v47 }
 0x481   :  { %v4964_v11 = vpop.eup %4963  ;;  %v1811_v17 = vadd.f32 1.0, %v4962_v6  ;;  %4979 = vrcp.f32 %v1808_v1  ;;  %v3736_v6 = vmul.f32 -1.442695, %v1852_v38  ;;  %v3737_v54 = vmul.f32 -1.442695, %v1853_v30 }
 0x482   :  { %v4966_v55 = vpop.eup %4965  ;;  %v1812_v7 = vadd.f32 1.0, %v4964_v11  ;;  %4981 = vrcp.f32 %v1810_v10  ;;  %v1904_v28 = vrot.slane %v1902_v59, 5  ;;  %v1905_v39 = vrot.slane %v1902_v59, 6 }
 0x483   :  { %v1813_v50 = vadd.f32 1.0, %v4966_v55  ;;  %4983 = vrcp.f32 %v1811_v17  ;;  %v4968_v35 = vpop.eup %4967  ;;  %v1906_v47 = vrot.slane %v1902_v59, 7 }
 0x484   :  { %4985 = vrcp.f32 %v1812_v7  ;;  %v4970_v1 = vpop.eup %4969  ;;  %v1878_v11 = vadd.f32 1.0, %v4968_v35 }
 0x485   :  { %4987 = vrcp.f32 %v1813_v50  ;;  %v4972_v62 = vpop.eup %4971  ;;  %v1879_v55 = vadd.f32 1.0, %v4970_v1  ;;  %v1907_v50 = vrot.slane %v1902_v59, 1 }
 0x486   :  { %4989 = vpow2.f32 %v3733_v24  ;;  %v1880_v7 = vadd.f32 1.0, %v4972_v62  ;;  %v1908_v24 = vrot.slane %v1902_v59, 2 }
 0x487   :  { %4991 = vpow2.f32 %v3734_v14 }
 0x488   :  { %v4974_v10 = vpop.eup %4973  ;;  %4993 = vpow2.f32 %v3735_v58  ;;  %v1909_v58 = vrot.slane %v1902_v59, 3 }
 0x489   :  { %v4976_v43 = vpop.eup %4975  ;;  %4995 = vpow2.f32 %v3736_v6  ;;  %v1922_v17 = vmul.f32 %v4974_v10, %v1902_v59 }
 0x48a   :  { %v4978_v12 = vpop.eup %4977  ;;  %v1919_v49 = vmul.f32 %v4976_v43, %v1904_v28  ;;  %4997 = vpow2.f32 %v3737_v54  ;;  %v1910_v43 = vrot.slane %v1902_v59, 4 }
 0x48b   :  { %v4980_v38 = vpop.eup %4979  ;;  %v1920_v30 = vmul.f32 %v4978_v12, %v1905_v39  ;;  %4999 = vrcp.f32 %v1878_v11  ;;  %v1930_v10 = vadd.f32 %v1922_v17, %v6834_v5 }
 0x48c   :  { %v4982_v14 = vpop.eup %4981  ;;  %v1921_v35 = vmul.f32 %v4980_v38, %v1906_v47  ;;  %v1927_v57 = vadd.f32 %v1919_v49, %v6832_v44  ;;  %5001 = vrcp.f32 %v1879_v55 }
 0x48d   :  { %v4984_v1 = vpop.eup %4983  ;;  %v1928_v6 = vadd.f32 %v1920_v30, %v6854_v37  ;;  %5003 = vrcp.f32 %v1880_v7  ;;  %v1923_v62 = vmul.f32 %v4982_v14, %v1907_v50 }
 0x48e   :  { %v4986_v28 = vpop.eup %4985  ;;  %v1929_v54 = vadd.f32 %v1921_v35, %v6833_v4  ;;  %5005 = vtanh.f32 %v1927_v57  ;;  %v1924_v39 = vmul.f32 %v4984_v1, %v1908_v24  ;;  %v1959_v35 = vrot.slane %v6093_v27, 7 }
 0x48f   :  { %v4988_v11 = vpop.eup %4987  ;;  %5007 = vtanh.f32 %v1928_v6  ;;  %v1925_v12 = vmul.f32 %v4986_v28, %v1909_v58  ;;  %v1931_v47 = vadd.f32 %v1923_v62, %v6835_v3  ;;  %v1960_v62 = vrot.slane %v6096_v34, 7 }
 0x490   :  { %v4990_v55 = vpop.eup %4989  ;;  %v1926_v49 = vmul.f32 %v4988_v11, %v1910_v43  ;;  %5009 = vtanh.f32 %v1929_v54  ;;  %v1932_v24 = vadd.f32 %v1924_v39, %v6836_v48  ;;  %v1961_v28 = vrot.slane %v6099_v0, 7  ;;  %v6875_v54 = vld [vmem:[#allocation42_spill] sm:$0xff] }
 0x491   :  { %v4992_v38 = vpop.eup %4991  ;;  %v1881_v30 = vadd.f32 1.0, %v4990_v55  ;;  %5011 = vtanh.f32 %v1930_v10  ;;  %v1933_v6 = vadd.f32 %v1925_v12, %v6855_v41 }
 0x492   :  { %v4994_v7 = vpop.eup %4993  ;;  %v1882_v50 = vadd.f32 1.0, %v4992_v38  ;;  %5013 = vtanh.f32 %v1931_v47  ;;  %v1934_v43 = vadd.f32 %v1926_v49, %v6875_v54 }
 0x493   :  { %v4996_v17 = vpop.eup %4995  ;;  %v1883_v14 = vadd.f32 1.0, %v4994_v7  ;;  %5015 = vrcp.f32 %v1881_v30 }
 0x494   :  { %v4998_v57 = vpop.eup %4997  ;;  %v1884_v59 = vadd.f32 1.0, %v4996_v17  ;;  %5017 = vrcp.f32 %v1882_v50 }
 0x495   :  { %v5000_v58 = vpop.eup %4999  ;;  %v1885_v1 = vadd.f32 1.0, %v4998_v57  ;;  %5019 = vrcp.f32 %v1883_v14 }
 0x496   :  { %v5002_v10 = vpop.eup %5001  ;;  %5021 = vrcp.f32 %v1884_v59  ;;  %v1974_v11 = vmul.f32 %v5000_v58, %v1959_v35  ;;  %v1943_v55 = vsub.f32 1.0, %v5000_v58  ;;  %v1962_v58 = vrot.slane %v6114_v2, 7 }
 0x497   :  { %v5004_v47 = vpop.eup %5003  ;;  %5023 = vrcp.f32 %v1885_v1  ;;  %v1975_v39 = vmul.f32 %v5002_v10, %v1960_v62  ;;  %v1944_v27 = vsub.f32 1.0, %v5002_v10  ;;  %v1963_v10 = vrot.slane %v6118_v52, 7 }
 0x498   :  { %v5006_v38 = vpop.eup %5005  ;;  %5025 = vtanh.f32 %v1932_v24  ;;  %v1976_v30 = vmul.f32 %v5004_v47, %v1961_v28  ;;  %v1945_v12 = vsub.f32 1.0, %v5004_v47  ;;  %v1964_v28 = vrot.slane %v6122_v36, 7 }
 0x499   :  { %v5008_v7 = vpop.eup %5007  ;;  %5027 = vtanh.f32 %v1933_v6  ;;  %v1951_v50 = vmul.f32 %v5006_v38, %v1943_v55  ;;  %v1965_v2 = vrot.slane %v6127_v9, 7 }
 0x49a   :  { %v5010_v34 = vpop.eup %5009  ;;  %5029 = vtanh.f32 %v1934_v43  ;;  %v1952_v17 = vmul.f32 %v5008_v7, %v1944_v27 }
 0x49b   :  { %v5012_v0 = vpop.eup %5011  ;;  %v1953_v14 = vmul.f32 %v5010_v34, %v1945_v12  ;;  %v6215_v57 = vadd.f32 %v1974_v11, %v1951_v50 }
 0x49c   :  { %v5014_v49 = vpop.eup %5013  ;;  %v6217_v59 = vadd.f32 %v1975_v39, %v1952_v17 }
 0x49d   :  { %v5016_v35 = vpop.eup %5015  ;;  %v6220_v24 = vadd.f32 %v1976_v30, %v1953_v14  ;;  %1990 = vst [vmem:[#allocation9] sm:$0x8] %v6215_v57  ;;  %v2006_v1 = vrot.slane %v6215_v57, 3  ;;  %v6878_v30 = vrot.slane %v6112_v18, 7 }
 0x49e   :  { %6876 = vst [vmem:[#allocation34_spill] sm:$0xff] %v6217_v59  ;;  %v5018_v6 = vpop.eup %5017  ;;  %v1946_v62 = vsub.f32 1.0, %v5016_v35  ;;  %1991 = vst [vmem:[#allocation9 + $0x8] sm:$0x8] %v6217_v59  ;;  %v2007_v43 = vrot.slane %v6217_v59, 2 }
 0x49f   :  { %6877 = vst [vmem:[#allocation36_spill] sm:$0xff] %v6220_v24  ;;  %v5020_v11 = vpop.eup %5019  ;;  %v1947_v47 = vsub.f32 1.0, %v5018_v6  ;;  %v1978_v55 = vmul.f32 %v5018_v6, %v1962_v58  ;;  %1992 = vst [vmem:[#allocation9 + $0x10] sm:$0x8] %v6220_v24  ;;  %v2009_v39 = vrot.slane %v6220_v24, 1  ;;  %v1977_v52 = vmul.f32 %v5016_v35, %v6878_v30  ;;  %v6879_v30 = vld [vmem:[#allocation14_spill] sm:$0xff] }
 0x4a0   :  { %v5022_v38 = vpop.eup %5021  ;;  %v1954_v27 = vmul.f32 %v5012_v0, %v1946_v62  ;;  %v1979_v7 = vmul.f32 %v5020_v11, %v1963_v10  ;;  %v2008_v36 = vsel %vm788_vm2, %v2007_v43, %v2006_v1  ;;  %v1948_v50 = vsub.f32 1.0, %v5020_v11 }
 0x4a1   :  { %v5024_v12 = vpop.eup %5023  ;;  %v1955_v34 = vmul.f32 %v5014_v49, %v1947_v47  ;;  %v1980_v17 = vmul.f32 %v5022_v38, %v1964_v28  ;;  %v2010_v14 = vsel %vm791_vm3, %v2009_v39, %v2008_v36  ;;  %v1949_v58 = vsub.f32 1.0, %v5022_v38  ;;  %v6882_v36 = vld [vmem:[#allocation16_spill] sm:$0xff] }
 0x4a2   :  { %v5026_v9 = vpop.eup %5025  ;;  %v1981_v6 = vmul.f32 %v5024_v12, %v1965_v2  ;;  %v6235_v54 = vadd.f32 %v1977_v52, %v1954_v27  ;;  %v1950_v59 = vsub.f32 1.0, %v5024_v12  ;;  %v6266_v27 = vld [vmem:[#allocation2] sm:$0xff]  ;;  %v6880_v52 = vld [vmem:[#allocation15_spill] sm:$0xff]  ;;  %v6883_v12 = vld [vmem:[#allocation17_spill] sm:$0xff] }
 0x4a3   :  { %v5028_v24 = vpop.eup %5027  ;;  %v1956_v0 = vmul.f32 %v5026_v9, %v1948_v50  ;;  %v6237_v62 = vadd.f32 %v1978_v55, %v1955_v34  ;;  %v6884_v50 = vld [vmem:[#allocation20_spill] sm:$0xff]  ;;  %v6885_v34 = vld [vmem:[#allocation13_spill] sm:$0xff] }
 0x4a4   :  { %v5030_v18 = vpop.eup %5029  ;;  %v1957_v35 = vmul.f32 %v5028_v24, %v1949_v58  ;;  %1993 = vst [vmem:[#allocation9 + $0x18] sm:$0x8] %v6235_v54  ;;  %v2011_v49 = vsel %vm794_vm4, %v6235_v54, %v2010_v14 }
 0x4a5   :  { %v1958_v1 = vmul.f32 %v5030_v18, %v1950_v59  ;;  %v6242_v10 = vadd.f32 %v1979_v7, %v1956_v0  ;;  %1994 = vst [vmem:[#allocation9 + $0x20] sm:$0x8] %v6237_v62  ;;  %v6781_v28 = vrot.slane %v6237_v62, 7  ;;  %v6881_v7 = vld [vmem:[#allocation19_spill] sm:$0xff] }
 0x4a6   :  { %v6246_v43 = vadd.f32 %v1980_v17, %v1957_v35 }
 0x4a7   :  { %v6248_v11 = vadd.f32 %v1981_v6, %v1958_v1  ;;  %1995 = vst [vmem:[#allocation9 + $0x28] sm:$0x8] %v6242_v10  ;;  %v2013_v24 = vsel %vm797_vm5, %v6781_v28, %v2011_v49  ;;  %v2014_v47 = vrot.slane %v6242_v10, 6 }
 0x4a8   :  { %1996 = vst [vmem:[#allocation9 + $0x30] sm:$0x8] %v6246_v43  ;;  %v2016_v59 = vrot.slane %v6246_v43, 5 }
 0x4a9   :  { %1997 = vst [vmem:[#allocation9 + $0x38] sm:$0x8] %v6248_v11  ;;  %v2015_v2 = vsel %vm800_vm6, %v2014_v47, %v2013_v24  ;;  %v2018_v55 = vrot.slane %v6248_v11, 4 }
 0x4aa   :  { %v2017_v39 = vsel %vm803_vm7, %v2016_v59, %v2015_v2 }
 0x4ab   :  { %v2019_v38 = vsel %vm806_vm8, %v2018_v55, %v2017_v39  ;;  %v6886_v39 = vld [vmem:[#allocation25_spill] sm:$0xff] }
 0x4ac   :  { %2086 = vmatmul.mubr.f32.vlgmr.msra.gmra.mrb[24].mxu0 %v2019_v38  ;;  %4137 = vmatmul.mubr.f32.vlgmr.msra.gmra.mrb[16].mxu1 %v2019_v38 }
 0x4ad   :  { %4535 = vmatpush1.bf16.msra.mxu0 %v5542_v15  ;;  %4566 = vmatpush3.bf16.msra.mxu1 %v5564_v40 }
 0x4ae   :  { %4537 = vmatprep.subr.bf16.mxu0 %v5545_v16  ;;  %4567 = vmatprep.subr.bf16.mxu1 %v6820_v21 }
 0x4af   :  { %2489 = vmatprep.mubr.f32.mxu0 %v6266_v27  ;;  %4171 = vmatprep.mubr.msk.f32.mxu1 %vm5460_vm1, %v6266_v27 }
 0x4b1   :  { %4539 = vmatpush1.bf16.msra.mxu0 %v5550_v22  ;;  %4569 = vmatpush3.bf16.msra.mxu1 %v5577_v51 }
 0x4b2   :  { %4541 = vmatprep.subr.bf16.mxu0 %v5553_v23  ;;  %4570 = vmatprep.subr.bf16.mxu1 %v6820_v21 }
 0x4b5   :  { %4543 = vmatpush1.bf16.msra.mxu0 %v5558_v31  ;;  %4572 = vmatpush3.bf16.msra.mxu1 %v5590_v61 }
 0x4b6   :  { %4545 = vmatprep.subr.bf16.mxu0 %v5561_v33  ;;  %4573 = vmatprep.subr.bf16.mxu1 %v6820_v21 }
 0x4b9   :  { %4547 = vmatpush1.bf16.msra.mxu0 %v5568_v42  ;;  %4575 = vmatpush3.bf16.msra.mxu1 %v5603_v8 }
 0x4ba   :  { %4549 = vmatprep.subr.bf16.mxu0 %v5571_v45  ;;  %4576 = vmatprep.subr.bf16.mxu1 %v6820_v21 }
 0x4bd   :  { %4551 = vmatpush1.bf16.msra.mxu0 %v5581_v53  ;;  %4578 = vmatpush3.bf16.msra.mxu1 %v5616_v19 }
 0x4be   :  { %4553 = vmatprep.subr.bf16.mxu0 %v5584_v56  ;;  %4579 = vmatprep.subr.bf16.mxu1 %v6820_v21 }
 0x4c1   :  { %4555 = vmatpush1.bf16.msra.mxu0 %v5594_v63  ;;  %4581 = vmatpush3.bf16.msra.mxu1 %v5627_v26 }
 0x4c2   :  { %4557 = vmatprep.subr.bf16.mxu0 %v6879_v30  ;;  %4582 = vmatprep.subr.bf16.mxu1 %v6820_v21 }
 0x4c5   :  { %4559 = vmatpush1.bf16.msra.mxu0 %v6880_v52  ;;  %4584 = vmatpush3.bf16.msra.mxu1 %v6881_v7 }
 0x4c6   :  { %4561 = vmatprep.subr.bf16.mxu0 %v6882_v36  ;;  %4585 = vmatprep.subr.bf16.mxu1 %v6820_v21 }
 0x4c9   :  { %4563 = vmatpush1.bf16.msra.mxu0 %v6883_v12  ;;  %4587 = vmatpush3.bf16.msra.mxu1 %v6884_v50  ;;  %v6888_v12 = vld [vmem:[#allocation28_spill] sm:$0xff] }
 0x4ca   :  { %4589 = vmatprep.subr.bf16.mxu0 %v6885_v34  ;;  %4620 = vmatprep.subr.bf16.mxu1 %v6820_v21  ;;  %v6887_v34 = vld [vmem:[#allocation27_spill] sm:$0xff] }
 0x57f   :  { %v2087_v17 = vpop.f32.mrb[24].mxu0  ;;  %v6299_v14 = vpop.f32.mrb[16].mxu1 }
 0x580   :  { %v2163_v9 = vrot.slane %v2087_v17, 4  ;;  %v2164_v58 = vrot.slane %v2087_v17, 5  ;;  %v2165_v6 = vrot.slane %v2087_v17, 6  ;;  %v2166_v0 = vrot.slane %v2087_v17, 7  ;;  %v6301_v18 = vpop.f32.mrb[25].mxu0  ;;  %v4138_v35 = vpop.f32.mrb[17].mxu1 }
 0x581   :  { %v2167_v49 = vrot.slane %v2087_v17, 1  ;;  %v2168_v1 = vrot.slane %v2087_v17, 2  ;;  %v2169_v24 = vrot.slane %v2087_v17, 3  ;;  %v2182_v47 = vadd.f32 %v2087_v17, %v5734_v32 }
 0x582   :  { %v2178_v59 = vadd.f32 %v2163_v9, %v6828_v46  ;;  %v2179_v2 = vadd.f32 %v2164_v58, %v5720_v20  ;;  %v2180_v55 = vadd.f32 %v2165_v6, %v5725_v25  ;;  %v2181_v38 = vadd.f32 %v2166_v0, %v6886_v39 }
 0x583   :  { %v2183_v28 = vadd.f32 %v2167_v49, %v6864_v60  ;;  %v2184_v50 = vadd.f32 %v2168_v1, %v6887_v34  ;;  %v2185_v36 = vadd.f32 %v2169_v24, %v6888_v12  ;;  %v3742_v35 = vmul.f32 -1.442695, %v2182_v47  ;;  %v6889_v24 = vld [vmem:[#allocation22_spill] sm:$0xff] }
 0x584   :  { %v3738_v7 = vmul.f32 -1.442695, %v2178_v59  ;;  %v3739_v52 = vmul.f32 -1.442695, %v2179_v2  ;;  %v3740_v30 = vmul.f32 -1.442695, %v2180_v55 }
 0x585   :  { %v3741_v26 = vmul.f32 -1.442695, %v2181_v38  ;;  %5031 = vpow2.f32 %v3742_v35  ;;  %v3743_v17 = vmul.f32 -1.442695, %v2183_v28  ;;  %v3744_v9 = vmul.f32 -1.442695, %v2184_v50 }
 0x586   :  { %5033 = vpow2.f32 %v3738_v7  ;;  %v3745_v58 = vmul.f32 -1.442695, %v2185_v36  ;;  %v2235_v6 = vrot.slane %v6301_v18, 4  ;;  %v2236_v0 = vrot.slane %v6301_v18, 5  ;;  %v6890_v59 = vld [vmem:[#allocation23_spill] sm:$0xff]  ;;  %v6891_v7 = vld [vmem:[#allocation24_spill] sm:$0xff] }
 0x587   :  { %5035 = vpow2.f32 %v3739_v52  ;;  %v2237_v49 = vrot.slane %v6301_v18, 6  ;;  %v2238_v1 = vrot.slane %v6301_v18, 7  ;;  %v6892_v52 = vld [vmem:[#allocation29_spill] sm:$0xff]  ;;  %v2239_v12 = vrot.slane %v6301_v18, 1 }
 0x588   :  { %5037 = vpow2.f32 %v3740_v30  ;;  %v2250_v47 = vadd.f32 %v2235_v6, %v6889_v24  ;;  %v2251_v2 = vadd.f32 %v2236_v0, %v6890_v59  ;;  %v2240_v6 = vrot.slane %v6301_v18, 2 }
 0x589   :  { %5039 = vpow2.f32 %v3741_v26  ;;  %v2252_v28 = vadd.f32 %v2237_v49, %v6891_v7  ;;  %v2253_v36 = vadd.f32 %v2238_v1, %v6892_v52 }
 0x58a   :  { %5041 = vpow2.f32 %v3743_v17  ;;  %v3746_v50 = vmul.f32 -1.442695, %v2250_v47  ;;  %v3747_v30 = vmul.f32 -1.442695, %v2251_v2  ;;  %v2254_v47 = vadd.f32 %v6301_v18, %v6849_v29 }
 0x58b   :  { %5043 = vpow2.f32 %v3744_v9  ;;  %v3748_v55 = vmul.f32 -1.442695, %v2252_v28  ;;  %v3749_v38 = vmul.f32 -1.442695, %v2253_v36  ;;  %v2241_v9 = vrot.slane %v6301_v18, 3 }
 0x58c   :  { %5045 = vpow2.f32 %v3745_v58  ;;  %v2255_v36 = vadd.f32 %v2239_v12, %v6871_v13  ;;  %v3750_v59 = vmul.f32 -1.442695, %v2254_v47  ;;  %v6330_v12 = vld [vmem:[%s6711_s4] ss:$0 sm:$0xff] }
 0x58d   :  { %5047 = vpow2.f32 %v3746_v50  ;;  %6895 = vst [vmem:[#allocation38_spill] sm:$0xff] %v6330_v12 }
 0x58e   :  { %5049 = vpow2.f32 %v3747_v30 }
 0x58f   :  { %v5032_v35 = vpop.eup %5031  ;;  %5051 = vpow2.f32 %v3748_v55  ;;  %v6893_v55 = vld [vmem:[#allocation32_spill] sm:$0xff] }
 0x590   :  { %v5034_v26 = vpop.eup %5033  ;;  %v2214_v17 = vadd.f32 1.0, %v5032_v35  ;;  %5053 = vpow2.f32 %v3749_v38  ;;  %v2256_v35 = vadd.f32 %v2240_v6, %v6893_v55  ;;  %v6894_v38 = vld [vmem:[#allocation33_spill] sm:$0xff]  ;;  %v2306_v6 = vadd.f32 %v6330_v12, %v6299_v14 }
 0x591   :  { %v5036_v0 = vpop.eup %5035  ;;  %v2210_v49 = vadd.f32 1.0, %v5034_v26  ;;  %v2257_v7 = vadd.f32 %v2241_v9, %v6894_v38 }
 0x592   :  { %v5038_v58 = vpop.eup %5037  ;;  %v2211_v1 = vadd.f32 1.0, %v5036_v0  ;;  %5055 = vrcp.f32 %v2214_v17 }
 0x593   :  { %v5040_v2 = vpop.eup %5039  ;;  %v2212_v28 = vadd.f32 1.0, %v5038_v58  ;;  %5057 = vrcp.f32 %v2210_v49  ;;  %v3751_v58 = vmul.f32 -1.442695, %v2255_v36  ;;  %v3753_v9 = vmul.f32 -1.442695, %v2257_v7 }
 0x594   :  { %v5042_v50 = vpop.eup %5041  ;;  %v2213_v30 = vadd.f32 1.0, %v5040_v2  ;;  %5059 = vrcp.f32 %v2211_v1  ;;  %v3752_v1 = vmul.f32 -1.442695, %v2256_v35  ;;  %v2310_v35 = vrot.slane %v2306_v6, 6 }
 0x595   :  { %v5044_v26 = vpop.eup %5043  ;;  %v2215_v52 = vadd.f32 1.0, %v5042_v50  ;;  %5061 = vrcp.f32 %v2212_v28 }
 0x596   :  { %v5046_v0 = vpop.eup %5045  ;;  %v2216_v17 = vadd.f32 1.0, %v5044_v26  ;;  %5063 = vrcp.f32 %v2213_v30  ;;  %v2308_v30 = vrot.slane %v2306_v6, 4 }
 0x597   :  { %v2217_v18 = vadd.f32 1.0, %v5046_v0  ;;  %5065 = vrcp.f32 %v2215_v52  ;;  %v5048_v49 = vpop.eup %5047 }
 0x598   :  { %5067 = vrcp.f32 %v2216_v17  ;;  %v5050_v2 = vpop.eup %5049  ;;  %v2282_v47 = vadd.f32 1.0, %v5048_v49  ;;  %v2309_v17 = vrot.slane %v2306_v6, 5  ;;  %v2312_v49 = vrot.slane %v2306_v6, 1 }
 0x599   :  { %5069 = vrcp.f32 %v2217_v18  ;;  %v5052_v28 = vpop.eup %5051  ;;  %v2283_v52 = vadd.f32 1.0, %v5050_v2  ;;  %v2311_v18 = vrot.slane %v2306_v6, 7 }
 0x59a   :  { %5071 = vpow2.f32 %v3750_v59  ;;  %v5054_v50 = vpop.eup %5053  ;;  %v2284_v26 = vadd.f32 1.0, %v5052_v28 }
 0x59b   :  { %5073 = vpow2.f32 %v3751_v58  ;;  %v2285_v38 = vadd.f32 1.0, %v5054_v50  ;;  %v2314_v50 = vrot.slane %v2306_v6, 3 }
 0x59c   :  { %v5056_v36 = vpop.eup %5055  ;;  %5075 = vpow2.f32 %v3752_v1  ;;  %v2313_v1 = vrot.slane %v2306_v6, 2 }
 0x59d   :  { %v5058_v0 = vpop.eup %5057  ;;  %5077 = vpow2.f32 %v3753_v9  ;;  %v2327_v55 = vmul.f32 %v5056_v36, %v2306_v6 }
 0x59e   :  { %v5060_v14 = vpop.eup %5059  ;;  %v2323_v12 = vmul.f32 %v5058_v0, %v2308_v30  ;;  %5079 = vrcp.f32 %v2282_v47 }
 0x59f   :  { %v5062_v7 = vpop.eup %5061  ;;  %v2324_v59 = vmul.f32 %v5060_v14, %v2309_v17  ;;  %5081 = vrcp.f32 %v2283_v52  ;;  %v2335_v52 = vadd.f32 %v2327_v55, %v6835_v3  ;;  %v2363_v55 = vrot.slane %v6215_v57, 7 }
 0x5a0   :  { %v5064_v58 = vpop.eup %5063  ;;  %v2325_v2 = vmul.f32 %v5062_v7, %v2310_v35  ;;  %v2331_v13 = vadd.f32 %v2323_v12, %v6832_v44  ;;  %5083 = vrcp.f32 %v2284_v26 }
 0x5a1   :  { %v5066_v28 = vpop.eup %5065  ;;  %v2326_v29 = vmul.f32 %v5064_v58, %v2311_v18  ;;  %v2332_v9 = vadd.f32 %v2324_v59, %v6854_v37  ;;  %5085 = vrcp.f32 %v2285_v38 }
 0x5a2   :  { %v5068_v36 = vpop.eup %5067  ;;  %v2333_v47 = vadd.f32 %v2325_v2, %v6833_v4  ;;  %5087 = vtanh.f32 %v2331_v13  ;;  %v2328_v30 = vmul.f32 %v5066_v28, %v2312_v49  ;;  %v6896_v2 = vld [vmem:[#allocation34_spill] sm:$0xff] }
 0x5a3   :  { %v5070_v0 = vpop.eup %5069  ;;  %5089 = vtanh.f32 %v2332_v9  ;;  %v2329_v17 = vmul.f32 %v5068_v36, %v2313_v1  ;;  %v2334_v12 = vadd.f32 %v2326_v29, %v6834_v5  ;;  %v2364_v1 = vrot.slane %v6896_v2, 7  ;;  %v6897_v9 = vld [vmem:[#allocation42_spill] sm:$0xff]  ;;  %v6898_v36 = vld [vmem:[#allocation36_spill] sm:$0xff] }
 0x5a4   :  { %v5072_v26 = vpop.eup %5071  ;;  %v2330_v14 = vmul.f32 %v5070_v0, %v2314_v50  ;;  %5091 = vtanh.f32 %v2333_v47  ;;  %v2336_v13 = vadd.f32 %v2328_v30, %v6836_v48  ;;  %v2365_v47 = vrot.slane %v6898_v36, 7 }
 0x5a5   :  { %v5074_v35 = vpop.eup %5073  ;;  %v2286_v7 = vadd.f32 1.0, %v5072_v26  ;;  %5093 = vtanh.f32 %v2334_v12  ;;  %v2337_v29 = vadd.f32 %v2329_v17, %v6855_v41  ;;  %v2366_v12 = vrot.slane %v6235_v54, 7 }
 0x5a6   :  { %v5076_v38 = vpop.eup %5075  ;;  %v2287_v6 = vadd.f32 1.0, %v5074_v35  ;;  %5095 = vtanh.f32 %v2335_v52  ;;  %v2338_v50 = vadd.f32 %v2330_v14, %v6897_v9 }
 0x5a7   :  { %v5078_v18 = vpop.eup %5077  ;;  %v2288_v59 = vadd.f32 1.0, %v5076_v38  ;;  %5097 = vrcp.f32 %v2286_v7 }
 0x5a8   :  { %v5080_v49 = vpop.eup %5079  ;;  %v2289_v58 = vadd.f32 1.0, %v5078_v18  ;;  %5099 = vrcp.f32 %v2287_v6 }
 0x5a9   :  { %v5082_v28 = vpop.eup %5081  ;;  %5101 = vrcp.f32 %v2288_v59  ;;  %v2378_v52 = vmul.f32 %v5080_v49, %v2363_v55  ;;  %v2347_v26 = vsub.f32 1.0, %v5080_v49 }
 0x5aa   :  { %v5084_v0 = vpop.eup %5083  ;;  %5103 = vrcp.f32 %v2289_v58  ;;  %v2379_v30 = vmul.f32 %v5082_v28, %v2364_v1  ;;  %v2348_v17 = vsub.f32 1.0, %v5082_v28 }
 0x5ab   :  { %v5086_v57 = vpop.eup %5085  ;;  %5105 = vtanh.f32 %v2336_v13  ;;  %v2380_v35 = vmul.f32 %v5084_v0, %v2365_v47  ;;  %v2349_v18 = vsub.f32 1.0, %v5084_v0 }
 0x5ac   :  { %v5088_v7 = vpop.eup %5087  ;;  %5107 = vtanh.f32 %v2337_v29  ;;  %v2381_v38 = vmul.f32 %v5086_v57, %v2366_v12  ;;  %v2350_v2 = vsub.f32 1.0, %v5086_v57  ;;  %v2367_v29 = vrot.slane %v6242_v10, 7 }
 0x5ad   :  { %v5090_v6 = vpop.eup %5089  ;;  %5109 = vtanh.f32 %v2338_v50  ;;  %v2355_v14 = vmul.f32 %v5088_v7, %v2347_v26  ;;  %v2368_v12 = vrot.slane %v6246_v43, 7  ;;  %v2369_v26 = vrot.slane %v6248_v11, 7 }
 0x5ae   :  { %v5092_v59 = vpop.eup %5091  ;;  %v2356_v55 = vmul.f32 %v5090_v6, %v2348_v17  ;;  %v6899_v10 = vrot.slane %v6237_v62, 7 }
 0x5af   :  { %v5094_v36 = vpop.eup %5093  ;;  %v2357_v9 = vmul.f32 %v5092_v59, %v2349_v18  ;;  %v6346_v54 = vadd.f32 %v2378_v52, %v2355_v14 }
 0x5b0   :  { %v5096_v58 = vpop.eup %5095  ;;  %v2358_v1 = vmul.f32 %v5094_v36, %v2350_v2  ;;  %v6348_v13 = vadd.f32 %v2379_v30, %v2356_v55 }
 0x5b1   :  { %v5098_v49 = vpop.eup %5097  ;;  %v6351_v28 = vadd.f32 %v2380_v35, %v2357_v9  ;;  %2394 = vst [vmem:[#allocation9] sm:$0x10] %v6346_v54  ;;  %v2410_v50 = vrot.slane %v6346_v54, 4 }
 0x5b2   :  { %v5100_v47 = vpop.eup %5099  ;;  %v2351_v0 = vsub.f32 1.0, %v5098_v49  ;;  %v6356_v57 = vadd.f32 %v2381_v38, %v2358_v1  ;;  %2395 = vst [vmem:[#allocation9 + $0x8] sm:$0x10] %v6348_v13  ;;  %v2411_v52 = vrot.slane %v6348_v13, 3  ;;  %v2382_v9 = vmul.f32 %v5098_v49, %v6899_v10 }
 0x5b3   :  { %v5102_v30 = vpop.eup %5101  ;;  %v2383_v35 = vmul.f32 %v5100_v47, %v2367_v29  ;;  %2396 = vst [vmem:[#allocation9 + $0x10] sm:$0x10] %v6351_v28  ;;  %v2413_v7 = vrot.slane %v6351_v28, 2  ;;  %v2352_v6 = vsub.f32 1.0, %v5100_v47 }
 0x5b4   :  { %v5104_v17 = vpop.eup %5103  ;;  %v2359_v43 = vmul.f32 %v5096_v58, %v2351_v0  ;;  %v2384_v38 = vmul.f32 %v5102_v30, %v2368_v12  ;;  %2397 = vst [vmem:[#allocation9 + $0x18] sm:$0x10] %v6356_v57  ;;  %v2412_v18 = vsel %vm788_vm2, %v2411_v52, %v2410_v50  ;;  %v2353_v59 = vsub.f32 1.0, %v5102_v30 }
 0x5b5   :  { %v5106_v14 = vpop.eup %5105  ;;  %v2385_v2 = vmul.f32 %v5104_v17, %v2369_v26  ;;  %v2414_v11 = vsel %vm791_vm3, %v2413_v7, %v2412_v18  ;;  %v2415_v62 = vrot.slane %v6356_v57, 1  ;;  %v2354_v36 = vsub.f32 1.0, %v5104_v17  ;;  %v6904_v18 = vld [vmem:[#allocation16_spill] sm:$0xff] }
 0x5b6   :  { %v5108_v55 = vpop.eup %5107  ;;  %v2360_v1 = vmul.f32 %v5106_v14, %v2352_v6  ;;  %v6369_v49 = vadd.f32 %v2382_v9, %v2359_v43  ;;  %v6901_v6 = vld [vmem:[#allocation14_spill] sm:$0xff]  ;;  %v6902_v43 = vld [vmem:[#allocation15_spill] sm:$0xff]  ;;  %v6905_v14 = vld [vmem:[#allocation17_spill] sm:$0xff] }
 0x5b7   :  { %v5110_v29 = vpop.eup %5109  ;;  %v2361_v47 = vmul.f32 %v5108_v55, %v2353_v59  ;;  %v2416_v58 = vsel %vm794_vm4, %v2415_v62, %v2414_v11  ;;  %v6906_v59 = vld [vmem:[#allocation20_spill] sm:$0xff] }
 0x5b8   :  { %v2362_v0 = vmul.f32 %v5110_v29, %v2354_v36  ;;  %v6372_v12 = vadd.f32 %v2383_v35, %v2360_v1  ;;  %2398 = vst [vmem:[#allocation9 + $0x20] sm:$0x10] %v6369_v49  ;;  %v2417_v50 = vsel %vm797_vm5, %v6369_v49, %v2416_v58 }
 0x5b9   :  { %v6377_v52 = vadd.f32 %v2384_v38, %v2361_v47  ;;  %v6903_v38 = vld [vmem:[#allocation19_spill] sm:$0xff] }
 0x5ba   :  { %v6379_v30 = vadd.f32 %v2385_v2, %v2362_v0  ;;  %2399 = vst [vmem:[#allocation9 + $0x28] sm:$0x10] %v6372_v12  ;;  %v6787_v26 = vrot.slane %v6372_v12, 7  ;;  %v6907_v2 = vld [vmem:[#allocation13_spill] sm:$0xff] }
 0x5bb   :  { %2400 = vst [vmem:[#allocation9 + $0x30] sm:$0x10] %v6377_v52  ;;  %v2420_v10 = vrot.slane %v6377_v52, 6 }
 0x5bc   :  { %2401 = vst [vmem:[#allocation9 + $0x38] sm:$0x10] %v6379_v30  ;;  %v2419_v9 = vsel %vm800_vm6, %v6787_v26, %v2417_v50  ;;  %v2422_v35 = vrot.slane %v6379_v30, 5 }
 0x5bd   :  { %v2421_v7 = vsel %vm803_vm7, %v2420_v10, %v2419_v9 }
 0x5be   :  { %v2423_v17 = vsel %vm806_vm8, %v2422_v35, %v2421_v7 }
 0x5bf   :  { %2490 = vmatmul.mubr.f32.vlgmr.msra.gmra.mrb[26].mxu0 %v2423_v17  ;;  %4172 = vmatmul.mubr.f32.vlgmr.msra.gmra.mrb[18].mxu1 %v2423_v17 }
 0x5c0   :  { %4591 = vmatpush1.bf16.msra.mxu0 %v5542_v15  ;;  %4622 = vmatpush3.bf16.msra.mxu1 %v5564_v40 }
 0x5c1   :  { %4593 = vmatprep.subr.bf16.mxu0 %v5545_v16  ;;  %4623 = vmatprep.subr.bf16.mxu1 %v6820_v21 }
 0x5c2   :  { %2893 = vmatprep.mubr.f32.mxu0 %v6266_v27  ;;  %4206 = vmatprep.mubr.msk.f32.mxu1 %vm5460_vm1, %v6266_v27  ;;  %v6900_v27 = vld [vmem:[#allocation18_spill] sm:$0xff] }
 0x5c4   :  { %4595 = vmatpush1.bf16.msra.mxu0 %v5550_v22  ;;  %4625 = vmatpush3.bf16.msra.mxu1 %v5577_v51 }
 0x5c5   :  { %4597 = vmatprep.subr.bf16.mxu0 %v5553_v23  ;;  %4626 = vmatprep.subr.bf16.mxu1 %v6820_v21 }
 0x5c8   :  { %4599 = vmatpush1.bf16.msra.mxu0 %v5558_v31  ;;  %4628 = vmatpush3.bf16.msra.mxu1 %v5590_v61 }
 0x5c9   :  { %4601 = vmatprep.subr.bf16.mxu0 %v5561_v33  ;;  %4629 = vmatprep.subr.bf16.mxu1 %v6820_v21 }
 0x5cc   :  { %4603 = vmatpush1.bf16.msra.mxu0 %v5568_v42  ;;  %4631 = vmatpush3.bf16.msra.mxu1 %v5603_v8 }
 0x5cd   :  { %4605 = vmatprep.subr.bf16.mxu0 %v5571_v45  ;;  %4632 = vmatprep.subr.bf16.mxu1 %v6820_v21 }
 0x5d0   :  { %4607 = vmatpush1.bf16.msra.mxu0 %v5581_v53  ;;  %4634 = vmatpush3.bf16.msra.mxu1 %v5616_v19 }
 0x5d1   :  { %4609 = vmatprep.subr.bf16.mxu0 %v5584_v56  ;;  %4635 = vmatprep.subr.bf16.mxu1 %v6820_v21 }
 0x5d4   :  { %4611 = vmatpush1.bf16.msra.mxu0 %v5594_v63  ;;  %4637 = vmatpush3.bf16.msra.mxu1 %v6900_v27 }
 0x5d5   :  { %4613 = vmatprep.subr.bf16.mxu0 %v6901_v6  ;;  %4638 = vmatprep.subr.bf16.mxu1 %v6820_v21 }
 0x5d8   :  { %4615 = vmatpush1.bf16.msra.mxu0 %v6902_v43  ;;  %4640 = vmatpush3.bf16.msra.mxu1 %v6903_v38 }
 0x5d9   :  { %4617 = vmatprep.subr.bf16.mxu0 %v6904_v18  ;;  %4641 = vmatprep.subr.bf16.mxu1 %v6820_v21 }
 0x5dc   :  { %4619 = vmatpush1.bf16.msra.mxu0 %v6905_v14  ;;  %4643 = vmatpush3.bf16.msra.mxu1 %v6906_v59  ;;  %v6908_v14 = vld [vmem:[#allocation28_spill] sm:$0xff] }
 0x5dd   :  { %4645 = vmatprep.subr.bf16.mxu0 %v6907_v2  ;;  %4676 = vmatprep.subr.bf16.mxu1 %v6820_v21 }
 0x692   :  { %v2491_v11 = vpop.f32.mrb[26].mxu0  ;;  %v6427_v62 = vpop.f32.mrb[18].mxu1 }
 0x693   :  { %v2567_v55 = vrot.slane %v2491_v11, 3  ;;  %v2568_v36 = vrot.slane %v2491_v11, 4  ;;  %v2569_v1 = vrot.slane %v2491_v11, 5  ;;  %v2570_v29 = vrot.slane %v2491_v11, 6  ;;  %v6429_v47 = vpop.f32.mrb[27].mxu0  ;;  %v4173_v58 = vpop.f32.mrb[19].mxu1 }
 0x694   :  { %v2571_v0 = vrot.slane %v2491_v11, 7  ;;  %v2572_v50 = vrot.slane %v2491_v11, 1  ;;  %v2573_v10 = vrot.slane %v2491_v11, 2  ;;  %v2587_v9 = vadd.f32 %v2491_v11, %v6864_v60 }
 0x695   :  { %v2582_v35 = vadd.f32 %v2567_v55, %v6828_v46  ;;  %v2583_v7 = vadd.f32 %v2568_v36, %v5720_v20  ;;  %v2584_v17 = vadd.f32 %v2569_v1, %v5725_v25  ;;  %v2585_v2 = vadd.f32 %v2570_v29, %v6886_v39 }
 0x696   :  { %v2586_v26 = vadd.f32 %v2571_v0, %v5734_v32  ;;  %v2588_v59 = vadd.f32 %v2572_v50, %v6887_v34  ;;  %v2589_v18 = vadd.f32 %v2573_v10, %v6908_v14  ;;  %v3759_v58 = vmul.f32 -1.442695, %v2587_v9  ;;  %v6909_v10 = vld [vmem:[#allocation23_spill] sm:$0xff] }
 0x697   :  { %v3754_v38 = vmul.f32 -1.442695, %v2582_v35  ;;  %v3755_v43 = vmul.f32 -1.442695, %v2583_v7  ;;  %v3756_v6 = vmul.f32 -1.442695, %v2584_v17 }
 0x698   :  { %v3757_v27 = vmul.f32 -1.442695, %v2585_v2  ;;  %5111 = vpow2.f32 %v3759_v58  ;;  %v3758_v11 = vmul.f32 -1.442695, %v2586_v26  ;;  %v3760_v55 = vmul.f32 -1.442695, %v2588_v59 }
 0x699   :  { %5113 = vpow2.f32 %v3754_v38  ;;  %v3761_v36 = vmul.f32 -1.442695, %v2589_v18  ;;  %v2639_v1 = vrot.slane %v6429_v47, 3  ;;  %v2640_v29 = vrot.slane %v6429_v47, 4  ;;  %v6910_v35 = vld [vmem:[#allocation24_spill] sm:$0xff] }
 0x69a   :  { %5115 = vpow2.f32 %v3755_v43  ;;  %v2641_v0 = vrot.slane %v6429_v47, 5  ;;  %v2643_v7 = vrot.slane %v6429_v47, 7 }
 0x69b   :  { %5117 = vpow2.f32 %v3756_v6  ;;  %v2654_v50 = vadd.f32 %v2639_v1, %v6889_v24  ;;  %v2655_v9 = vadd.f32 %v2640_v29, %v6909_v10  ;;  %v2642_v6 = vrot.slane %v6429_v47, 6  ;;  %v6911_v29 = vld [vmem:[#allocation29_spill] sm:$0xff] }
 0x69c   :  { %5119 = vpow2.f32 %v3757_v27  ;;  %v2656_v38 = vadd.f32 %v2641_v0, %v6910_v35 }
 0x69d   :  { %5121 = vpow2.f32 %v3758_v11  ;;  %v3762_v26 = vmul.f32 -1.442695, %v2654_v50  ;;  %v3763_v43 = vmul.f32 -1.442695, %v2655_v9  ;;  %v2644_v11 = vrot.slane %v6429_v47, 1 }
 0x69e   :  { %5123 = vpow2.f32 %v3760_v55  ;;  %v3764_v18 = vmul.f32 -1.442695, %v2656_v38  ;;  %v2657_v0 = vadd.f32 %v2642_v6, %v6911_v29  ;;  %v6912_v38 = vld [vmem:[#allocation30_spill] sm:$0xff]  ;;  %v6915_v6 = vld [vmem:[#allocation33_spill] sm:$0xff] }
 0x69f   :  { %5125 = vpow2.f32 %v3761_v36  ;;  %v2645_v36 = vrot.slane %v6429_v47, 2 }
 0x6a0   :  { %5127 = vpow2.f32 %v3762_v26  ;;  %v2658_v26 = vadd.f32 %v2643_v7, %v6912_v38 }
 0x6a1   :  { %5129 = vpow2.f32 %v3763_v43  ;;  %v6913_v43 = vld [vmem:[#allocation31_spill] sm:$0xff]  ;;  %v2661_v29 = vadd.f32 %v2645_v36, %v6915_v6 }
 0x6a2   :  { %v5112_v59 = vpop.eup %5111  ;;  %5131 = vpow2.f32 %v3764_v18  ;;  %v3766_v7 = vmul.f32 -1.442695, %v2658_v26 }
 0x6a3   :  { %v5114_v17 = vpop.eup %5113  ;;  %v2619_v27 = vadd.f32 1.0, %v5112_v59 }
 0x6a4   :  { %v5116_v2 = vpop.eup %5115  ;;  %v2614_v58 = vadd.f32 1.0, %v5114_v17  ;;  %v2659_v17 = vadd.f32 %v6429_v47, %v6913_v43 }
 0x6a5   :  { %v5118_v55 = vpop.eup %5117  ;;  %v2615_v1 = vadd.f32 1.0, %v5116_v2  ;;  %5133 = vrcp.f32 %v2619_v27  ;;  %v6914_v2 = vld [vmem:[#allocation32_spill] sm:$0xff] }
 0x6a6   :  { %v5120_v50 = vpop.eup %5119  ;;  %v2616_v9 = vadd.f32 1.0, %v5118_v55  ;;  %5135 = vrcp.f32 %v2614_v58  ;;  %v2660_v27 = vadd.f32 %v2644_v11, %v6914_v2  ;;  %v3765_v55 = vmul.f32 -1.442695, %v2657_v0 }
 0x6a7   :  { %v5122_v35 = vpop.eup %5121  ;;  %v2617_v59 = vadd.f32 1.0, %v5120_v50  ;;  %5137 = vrcp.f32 %v2615_v1  ;;  %v6916_v1 = vld [vmem:[#allocation38_spill] sm:$0xff]  ;;  %v3767_v38 = vmul.f32 -1.442695, %v2659_v17  ;;  %v3769_v11 = vmul.f32 -1.442695, %v2661_v29 }
 0x6a8   :  { %v5124_v10 = vpop.eup %5123  ;;  %v2618_v18 = vadd.f32 1.0, %v5122_v35  ;;  %5139 = vrcp.f32 %v2616_v9  ;;  %v2710_v50 = vadd.f32 %v6916_v1, %v6427_v62  ;;  %v3768_v35 = vmul.f32 -1.442695, %v2660_v27 }
 0x6a9   :  { %v5126_v24 = vpop.eup %5125  ;;  %v2620_v14 = vadd.f32 1.0, %v5124_v10  ;;  %5141 = vrcp.f32 %v2617_v59 }
 0x6aa   :  { %v2621_v58 = vadd.f32 1.0, %v5126_v24  ;;  %5143 = vrcp.f32 %v2618_v18  ;;  %v5128_v47 = vpop.eup %5127  ;;  %v2712_v36 = vrot.slane %v2710_v50, 3  ;;  %v2713_v26 = vrot.slane %v2710_v50, 4 }
 0x6ab   :  { %5145 = vrcp.f32 %v2620_v14  ;;  %v5130_v9 = vpop.eup %5129  ;;  %v2686_v10 = vadd.f32 1.0, %v5128_v47  ;;  %v2714_v17 = vrot.slane %v2710_v50, 5 }
 0x6ac   :  { %5147 = vrcp.f32 %v2621_v58  ;;  %v5132_v2 = vpop.eup %5131  ;;  %v2687_v24 = vadd.f32 1.0, %v5130_v9  ;;  %v2715_v58 = vrot.slane %v2710_v50, 6 }
 0x6ad   :  { %5149 = vpow2.f32 %v3765_v55  ;;  %v2688_v14 = vadd.f32 1.0, %v5132_v2  ;;  %v2717_v2 = vrot.slane %v2710_v50, 1 }
 0x6ae   :  { %5151 = vpow2.f32 %v3766_v7  ;;  %v2716_v7 = vrot.slane %v2710_v50, 7 }
 0x6af   :  { %v5134_v59 = vpop.eup %5133  ;;  %5153 = vpow2.f32 %v3767_v38 }
 0x6b0   :  { %v5136_v0 = vpop.eup %5135  ;;  %5155 = vpow2.f32 %v3768_v35  ;;  %v2732_v18 = vmul.f32 %v5134_v59, %v2710_v50 }
 0x6b1   :  { %v5138_v62 = vpop.eup %5137  ;;  %v2727_v1 = vmul.f32 %v5136_v0, %v2712_v36  ;;  %5157 = vpow2.f32 %v3769_v11  ;;  %v2718_v36 = vrot.slane %v2710_v50, 2 }
 0x6b2   :  { %v5140_v27 = vpop.eup %5139  ;;  %v2728_v55 = vmul.f32 %v5138_v62, %v2713_v26  ;;  %5159 = vrcp.f32 %v2686_v10 }
 0x6b3   :  { %v5142_v29 = vpop.eup %5141  ;;  %v2729_v47 = vmul.f32 %v5140_v27, %v2714_v17  ;;  %v2735_v6 = vadd.f32 %v2727_v1, %v6832_v44  ;;  %5161 = vrcp.f32 %v2687_v24 }
 0x6b4   :  { %v5144_v38 = vpop.eup %5143  ;;  %v2730_v9 = vmul.f32 %v5142_v29, %v2715_v58  ;;  %v2736_v35 = vadd.f32 %v2728_v55, %v6854_v37  ;;  %5163 = vrcp.f32 %v2688_v14 }
 0x6b5   :  { %v5146_v59 = vpop.eup %5145  ;;  %v2731_v43 = vmul.f32 %v5144_v38, %v2716_v7  ;;  %v2737_v11 = vadd.f32 %v2729_v47, %v6833_v4  ;;  %5165 = vtanh.f32 %v2735_v6  ;;  %v2740_v7 = vadd.f32 %v2732_v18, %v6836_v48 }
 0x6b6   :  { %v5148_v0 = vpop.eup %5147  ;;  %5167 = vtanh.f32 %v2736_v35  ;;  %v2733_v10 = vmul.f32 %v5146_v59, %v2717_v2  ;;  %v2738_v26 = vadd.f32 %v2730_v9, %v6834_v5  ;;  %v2767_v47 = vrot.slane %v6346_v54, 7  ;;  %v6917_v59 = vld [vmem:[#allocation42_spill] sm:$0xff] }
 0x6b7   :  { %v5150_v62 = vpop.eup %5149  ;;  %v2734_v17 = vmul.f32 %v5148_v0, %v2718_v36  ;;  %v2739_v24 = vadd.f32 %v2731_v43, %v6835_v3  ;;  %5169 = vtanh.f32 %v2737_v11  ;;  %v2768_v35 = vrot.slane %v6348_v13, 7 }
 0x6b8   :  { %v5152_v1 = vpop.eup %5151  ;;  %v2689_v27 = vadd.f32 1.0, %v5150_v62  ;;  %5171 = vtanh.f32 %v2738_v26  ;;  %v2741_v43 = vadd.f32 %v2733_v10, %v6855_v41  ;;  %v2769_v36 = vrot.slane %v6351_v28, 7 }
 0x6b9   :  { %v5154_v14 = vpop.eup %5153  ;;  %v2690_v58 = vadd.f32 1.0, %v5152_v1  ;;  %5173 = vtanh.f32 %v2739_v24  ;;  %v2742_v11 = vadd.f32 %v2734_v17, %v6917_v59 }
 0x6ba   :  { %v5156_v55 = vpop.eup %5155  ;;  %v2691_v29 = vadd.f32 1.0, %v5154_v14  ;;  %5175 = vrcp.f32 %v2689_v27 }
 0x6bb   :  { %v5158_v6 = vpop.eup %5157  ;;  %v2692_v50 = vadd.f32 1.0, %v5156_v55  ;;  %5177 = vrcp.f32 %v2690_v58 }
 0x6bc   :  { %v5160_v38 = vpop.eup %5159  ;;  %v2693_v9 = vadd.f32 1.0, %v5158_v6  ;;  %5179 = vrcp.f32 %v2691_v29  ;;  %v2770_v6 = vrot.slane %v6356_v57, 7 }
 0x6bd   :  { %v5162_v2 = vpop.eup %5161  ;;  %5181 = vrcp.f32 %v2692_v50  ;;  %v2782_v0 = vmul.f32 %v5160_v38, %v2767_v47  ;;  %v2751_v62 = vsub.f32 1.0, %v5160_v38 }
 0x6be   :  { %v5164_v26 = vpop.eup %5163  ;;  %5183 = vrcp.f32 %v2693_v9  ;;  %v2783_v18 = vmul.f32 %v5162_v2, %v2768_v35  ;;  %v2752_v54 = vsub.f32 1.0, %v5162_v2 }
 0x6bf   :  { %v5166_v24 = vpop.eup %5165  ;;  %5185 = vtanh.f32 %v2740_v7  ;;  %v2784_v1 = vmul.f32 %v5164_v26, %v2769_v36  ;;  %v2753_v10 = vsub.f32 1.0, %v5164_v26  ;;  %v2771_v7 = vrot.slane %v6369_v49, 7 }
 0x6c0   :  { %v5168_v27 = vpop.eup %5167  ;;  %5187 = vtanh.f32 %v2741_v43  ;;  %v2759_v14 = vmul.f32 %v5166_v24, %v2751_v62  ;;  %v2773_v24 = vrot.slane %v6379_v30, 7 }
 0x6c1   :  { %v5170_v13 = vpop.eup %5169  ;;  %5189 = vtanh.f32 %v2742_v11  ;;  %v2760_v58 = vmul.f32 %v5168_v27, %v2752_v54 }
 0x6c2   :  { %v5172_v55 = vpop.eup %5171  ;;  %v2761_v17 = vmul.f32 %v5170_v13, %v2753_v10  ;;  %v6468_v29 = vadd.f32 %v2782_v0, %v2759_v14  ;;  %v2772_v0 = vrot.slane %v6377_v52, 7 }
 0x6c3   :  { %v5174_v28 = vpop.eup %5173  ;;  %v6471_v50 = vadd.f32 %v2783_v18, %v2760_v58 }
 0x6c4   :  { %v5176_v47 = vpop.eup %5175  ;;  %v6474_v38 = vadd.f32 %v2784_v1, %v2761_v17  ;;  %2798 = vst [vmem:[#allocation9] sm:$0x20] %v6468_v29  ;;  %v2814_v9 = vrot.slane %v6468_v29, 5 }
 0x6c5   :  { %v5178_v43 = vpop.eup %5177  ;;  %v2754_v35 = vsub.f32 1.0, %v5176_v47  ;;  %v2785_v2 = vmul.f32 %v5176_v47, %v2770_v6  ;;  %2799 = vst [vmem:[#allocation9 + $0x8] sm:$0x20] %v6471_v50  ;;  %v2815_v11 = vrot.slane %v6471_v50, 4 }
 0x6c6   :  { %v5180_v36 = vpop.eup %5179  ;;  %v2755_v57 = vsub.f32 1.0, %v5178_v43  ;;  %v2786_v26 = vmul.f32 %v5178_v43, %v2771_v7  ;;  %2800 = vst [vmem:[#allocation9 + $0x10] sm:$0x20] %v6474_v38  ;;  %v2817_v49 = vrot.slane %v6474_v38, 3 }
 0x6c7   :  { %v5182_v62 = vpop.eup %5181  ;;  %v2762_v18 = vmul.f32 %v5172_v55, %v2754_v35  ;;  %v2816_v54 = vsel %vm788_vm2, %v2815_v11, %v2814_v9  ;;  %v2756_v27 = vsub.f32 1.0, %v5180_v36  ;;  %v6918_v55 = vrot.slane %v6372_v12, 7 }
 0x6c8   :  { %v5184_v1 = vpop.eup %5183  ;;  %v2763_v10 = vmul.f32 %v5174_v28, %v2755_v57  ;;  %v2788_v14 = vmul.f32 %v5182_v62, %v2772_v0  ;;  %v2818_v13 = vsel %vm791_vm3, %v2817_v49, %v2816_v54  ;;  %v2757_v17 = vsub.f32 1.0, %v5182_v62 }
 0x6c9   :  { %v5186_v58 = vpop.eup %5185  ;;  %v2789_v52 = vmul.f32 %v5184_v1, %v2773_v24  ;;  %v6486_v6 = vadd.f32 %v2785_v2, %v2762_v18  ;;  %v2758_v7 = vsub.f32 1.0, %v5184_v1  ;;  %v2787_v35 = vmul.f32 %v5180_v36, %v6918_v55  ;;  %v6926_v55 = vld [vmem:[#allocation28_spill] sm:$0xff] }
 0x6ca   :  { %v5188_v47 = vpop.eup %5187  ;;  %v2764_v43 = vmul.f32 %v5186_v58, %v2756_v27  ;;  %v6490_v30 = vadd.f32 %v2786_v26, %v2763_v10  ;;  %v5355_v27 = vld [vmem:[#allocation2] sm:$0xff] }
 0x6cb   :  { %v5190_v9 = vpop.eup %5189  ;;  %v2765_v11 = vmul.f32 %v5188_v47, %v2757_v17  ;;  %2801 = vst [vmem:[#allocation9 + $0x18] sm:$0x20] %v6486_v6  ;;  %v2819_v28 = vrot.slane %v6486_v6, 2 }
 0x6cc   :  { %v2766_v57 = vmul.f32 %v5190_v9, %v2758_v7  ;;  %v6494_v0 = vadd.f32 %v2787_v35, %v2764_v43  ;;  %2802 = vst [vmem:[#allocation9 + $0x20] sm:$0x20] %v6490_v30  ;;  %v2821_v2 = vrot.slane %v6490_v30, 1 }
 0x6cd   :  { %v6498_v49 = vadd.f32 %v2788_v14, %v2765_v11  ;;  %v2820_v12 = vsel %vm794_vm4, %v2819_v28, %v2818_v13 }
 0x6ce   :  { %v6501_v36 = vadd.f32 %v2789_v52, %v2766_v57  ;;  %2803 = vst [vmem:[#allocation9 + $0x28] sm:$0x20] %v6494_v0  ;;  %v2822_v26 = vsel %vm797_vm5, %v2821_v2, %v2820_v12 }
 0x6cf   :  { %2804 = vst [vmem:[#allocation9 + $0x30] sm:$0x20] %v6498_v49  ;;  %v2823_v62 = vsel %vm800_vm6, %v6494_v0, %v2822_v26  ;;  %v2824_v18 = vrot.slane %v6498_v49, 7 }
 0x6d0   :  { %2805 = vst [vmem:[#allocation9 + $0x38] sm:$0x20] %v6501_v36  ;;  %v2826_v24 = vrot.slane %v6501_v36, 6 }
 0x6d1   :  { %v2825_v54 = vsel %vm803_vm7, %v2824_v18, %v2823_v62 }
 0x6d2   :  { %v2827_v1 = vsel %vm806_vm8, %v2826_v24, %v2825_v54 }
 0x6d3   :  { %2894 = vmatmul.mubr.f32.vlgmr.msra.gmra.mrb[28].mxu0 %v2827_v1  ;;  %4207 = vmatmul.mubr.f32.vlgmr.msra.gmra.mrb[20].mxu1 %v2827_v1  ;;  %v6927_v1 = vld [vmem:[#allocation22_spill] sm:$0xff] }
 0x6d4   :  { %4647 = vmatpush1.bf16.msra.mxu0 %v5542_v15  ;;  %4678 = vmatpush3.bf16.msra.mxu1 %v5564_v40  ;;  %v6919_v15 = vld [vmem:[#allocation18_spill] sm:$0xff]  ;;  %v6925_v40 = vld [vmem:[#allocation20_spill] sm:$0xff] }
 0x6d5   :  { %4649 = vmatprep.subr.bf16.mxu0 %v5545_v16  ;;  %4679 = vmatprep.subr.bf16.mxu1 %v6820_v21  ;;  %v6920_v16 = vld [vmem:[#allocation14_spill] sm:$0xff] }
 0x6d6   :  { %3297 = vmatprep.mubr.f32.mxu0 %v5355_v27  ;;  %4241 = vmatprep.mubr.msk.f32.mxu1 %vm5460_vm1, %v5355_v27 }
 0x6d8   :  { %4651 = vmatpush1.bf16.msra.mxu0 %v5550_v22  ;;  %4681 = vmatpush3.bf16.msra.mxu1 %v5577_v51  ;;  %v6921_v22 = vld [vmem:[#allocation15_spill] sm:$0xff] }
 0x6d9   :  { %4653 = vmatprep.subr.bf16.mxu0 %v5553_v23  ;;  %4682 = vmatprep.subr.bf16.mxu1 %v6820_v21  ;;  %v6922_v23 = vld [vmem:[#allocation19_spill] sm:$0xff] }
 0x6dc   :  { %4655 = vmatpush1.bf16.msra.mxu0 %v5558_v31  ;;  %4684 = vmatpush3.bf16.msra.mxu1 %v5590_v61  ;;  %v6923_v31 = vld [vmem:[#allocation16_spill] sm:$0xff] }
 0x6dd   :  { %4657 = vmatprep.subr.bf16.mxu0 %v5561_v33  ;;  %4685 = vmatprep.subr.bf16.mxu1 %v6820_v21  ;;  %v6924_v33 = vld [vmem:[#allocation17_spill] sm:$0xff] }
 0x6e0   :  { %4659 = vmatpush1.bf16.msra.mxu0 %v5568_v42  ;;  %4687 = vmatpush3.bf16.msra.mxu1 %v5603_v8 }
 0x6e1   :  { %4661 = vmatprep.subr.bf16.mxu0 %v5571_v45  ;;  %4688 = vmatprep.subr.bf16.mxu1 %v6820_v21 }
 0x6e4   :  { %4663 = vmatpush1.bf16.msra.mxu0 %v5581_v53  ;;  %4690 = vmatpush3.bf16.msra.mxu1 %v5616_v19 }
 0x6e5   :  { %4665 = vmatprep.subr.bf16.mxu0 %v5584_v56  ;;  %4691 = vmatprep.subr.bf16.mxu1 %v6820_v21 }
 0x6e8   :  { %4667 = vmatpush1.bf16.msra.mxu0 %v5594_v63  ;;  %4693 = vmatpush3.bf16.msra.mxu1 %v6919_v15  ;;  %v6928_v15 = vld [vmem:[#allocation23_spill] sm:$0xff] }
 0x6e9   :  { %4669 = vmatprep.subr.bf16.mxu0 %v6920_v16  ;;  %4694 = vmatprep.subr.bf16.mxu1 %v6820_v21 }
 0x6ec   :  { %4671 = vmatpush1.bf16.msra.mxu0 %v6921_v22  ;;  %4696 = vmatpush3.bf16.msra.mxu1 %v6922_v23  ;;  %v6929_v22 = vld [vmem:[#allocation24_spill] sm:$0xff] }
 0x6ed   :  { %4673 = vmatprep.subr.bf16.mxu0 %v6923_v31  ;;  %4697 = vmatprep.subr.bf16.mxu1 %v6820_v21 }
 0x6f0   :  { %4675 = vmatpush1.bf16.msra.mxu0 %v6924_v33  ;;  %4699 = vmatpush3.bf16.msra.mxu1 %v6925_v40 }
 0x7a6   :  { %v2895_v42 = vpop.f32.mrb[28].mxu0  ;;  %v6546_v45 = vpop.f32.mrb[20].mxu1 }
 0x7a7   :  { %v2971_v51 = vrot.slane %v2895_v42, 2  ;;  %v2972_v53 = vrot.slane %v2895_v42, 3  ;;  %v2973_v56 = vrot.slane %v2895_v42, 4  ;;  %v2974_v61 = vrot.slane %v2895_v42, 5  ;;  %v6548_v63 = vpop.f32.mrb[29].mxu0  ;;  %v4208_v8 = vpop.f32.mrb[21].mxu1 }
 0x7a8   :  { %v2975_v19 = vrot.slane %v2895_v42, 6  ;;  %v2976_v10 = vrot.slane %v2895_v42, 7  ;;  %v2977_v14 = vrot.slane %v2895_v42, 1  ;;  %v2992_v13 = vadd.f32 %v2895_v42, %v6887_v34 }
 0x7a9   :  { %v2986_v21 = vadd.f32 %v2971_v51, %v6828_v46  ;;  %v2987_v58 = vadd.f32 %v2972_v53, %v5720_v20  ;;  %v2988_v17 = vadd.f32 %v2973_v56, %v5725_v25  ;;  %v2989_v52 = vadd.f32 %v2974_v61, %v6886_v39 }
 0x7aa   :  { %v2990_v47 = vadd.f32 %v2975_v19, %v5734_v32  ;;  %v2991_v7 = vadd.f32 %v2976_v10, %v6864_v60  ;;  %v3776_v43 = vmul.f32 -1.442695, %v2992_v13  ;;  %v2993_v35 = vadd.f32 %v2977_v14, %v6926_v55 }
 0x7ab   :  { %v3770_v9 = vmul.f32 -1.442695, %v2986_v21  ;;  %v3771_v11 = vmul.f32 -1.442695, %v2987_v58  ;;  %v3772_v28 = vmul.f32 -1.442695, %v2988_v17 }
 0x7ac   :  { %v3773_v57 = vmul.f32 -1.442695, %v2989_v52  ;;  %5191 = vpow2.f32 %v3776_v43  ;;  %v3774_v2 = vmul.f32 -1.442695, %v2990_v47  ;;  %v3775_v12 = vmul.f32 -1.442695, %v2991_v7 }
 0x7ad   :  { %5193 = vpow2.f32 %v3770_v9  ;;  %v3777_v26 = vmul.f32 -1.442695, %v2993_v35  ;;  %v3043_v62 = vrot.slane %v6548_v63, 2  ;;  %v3044_v24 = vrot.slane %v6548_v63, 3  ;;  %v6930_v58 = vld [vmem:[#allocation29_spill] sm:$0xff]  ;;  %v6931_v7 = vld [vmem:[#allocation30_spill] sm:$0xff] }
 0x7ae   :  { %5195 = vpow2.f32 %v3771_v11  ;;  %v3045_v54 = vrot.slane %v6548_v63, 4  ;;  %v3046_v42 = vrot.slane %v6548_v63, 5  ;;  %v3047_v53 = vrot.slane %v6548_v63, 6  ;;  %v6932_v11 = vld [vmem:[#allocation31_spill] sm:$0xff] }
 0x7af   :  { %5197 = vpow2.f32 %v3772_v28  ;;  %v3058_v27 = vadd.f32 %v3043_v62, %v6927_v1  ;;  %v3059_v16 = vadd.f32 %v3044_v24, %v6928_v15  ;;  %v3048_v8 = vrot.slane %v6548_v63, 7 }
 0x7b0   :  { %5199 = vpow2.f32 %v3773_v57  ;;  %v3060_v23 = vadd.f32 %v3045_v54, %v6929_v22  ;;  %v3049_v21 = vrot.slane %v6548_v63, 1  ;;  %v3061_v17 = vadd.f32 %v3046_v42, %v6930_v58  ;;  %v6934_v54 = vld [vmem:[#allocation33_spill] sm:$0xff] }
 0x7b1   :  { %5201 = vpow2.f32 %v3774_v2  ;;  %v3778_v31 = vmul.f32 -1.442695, %v3058_v27  ;;  %v3779_v33 = vmul.f32 -1.442695, %v3059_v16  ;;  %v3062_v43 = vadd.f32 %v3047_v53, %v6931_v7 }
 0x7b2   :  { %5203 = vpow2.f32 %v3775_v12  ;;  %v3780_v40 = vmul.f32 -1.442695, %v3060_v23  ;;  %v3063_v28 = vadd.f32 %v3048_v8, %v6932_v11  ;;  %v6933_v12 = vld [vmem:[#allocation32_spill] sm:$0xff]  ;;  %v3065_v27 = vadd.f32 %v3049_v21, %v6934_v54 }
 0x7b3   :  { %5205 = vpow2.f32 %v3777_v26  ;;  %v3064_v26 = vadd.f32 %v6548_v63, %v6933_v12  ;;  %v3781_v16 = vmul.f32 -1.442695, %v3061_v17 }
 0x7b4   :  { %5207 = vpow2.f32 %v3778_v31  ;;  %v3782_v31 = vmul.f32 -1.442695, %v3062_v43  ;;  %v3783_v42 = vmul.f32 -1.442695, %v3063_v28 }
 0x7b5   :  { %5209 = vpow2.f32 %v3779_v33  ;;  %v6577_v33 = vld [vmem:[%s6711_s4] ss:$0 sm:$0xff]  ;;  %s5461_s4 = smov [#allocation9]  }
 0x7b6   :  { %v5192_v51 = vpop.eup %5191  ;;  %5211 = vpow2.f32 %v3780_v40  ;;  %v3114_v40 = vadd.f32 %v6577_v33, %v6546_v45  ;;  %s3644_s14 = sshll.u32 %s5461_s4, 4  ;;  %s3645_s14 = int_to_ptr.vmem [resolvable:$true] %s3644_s14 }
 0x7b7   :  { %v5194_v56 = vpop.eup %5193  ;;  %v3024_v61 = vadd.f32 1.0, %v5192_v51  ;;  %v3784_v51 = vmul.f32 -1.442695, %v3064_v26  ;;  %s5423_s15 = scalar_lea.vmem %s3645_s14, 1024  ;;  %p5428_p11 = scmp.lt.s32.totalorder %s3645_s14, %s3645_s14 }
 0x7b8   :  { %v5196_v19 = vpop.eup %5195  ;;  %v3018_v10 = vadd.f32 1.0, %v5194_v56  ;;  %v3785_v56 = vmul.f32 -1.442695, %v3065_v27  ;;  %v3117_v21 = vrot.slane %v3114_v40, 3  ;;  %v3121_v27 = vrot.slane %v3114_v40, 7  ;;  %p5424_p10 = scmp.ne.s32.totalorder %s3645_s14, %s5423_s15  ;;  %p5429_p12 = scmp.lt.s32.totalorder %s5423_s15, %s5423_s15 }
 0x7b9   :  { %v5198_v14 = vpop.eup %5197  ;;  %v3019_v13 = vadd.f32 1.0, %v5196_v19  ;;  %5213 = vrcp.f32 %v3024_v61 }
 0x7ba   :  { %v5200_v52 = vpop.eup %5199  ;;  %v3020_v47 = vadd.f32 1.0, %v5198_v14  ;;  %5215 = vrcp.f32 %v3018_v10  ;;  %v3116_v10 = vrot.slane %v3114_v40, 2  ;;  %p5430_p13 = por %p5429_p12, %p5428_p11 }
 0x7bb   :  { %v5202_v35 = vpop.eup %5201  ;;  %v3021_v9 = vadd.f32 1.0, %v5200_v52  ;;  %5217 = vrcp.f32 %v3019_v13 }
 0x7bc   :  { %v5204_v57 = vpop.eup %5203  ;;  %v3022_v2 = vadd.f32 1.0, %v5202_v35  ;;  %5219 = vrcp.f32 %v3020_v47  ;;  %v3118_v47 = vrot.slane %v3114_v40, 4  ;;  %p5431_p0 = pnand %p5430_p13, %p5424_p10 }
 0x7bd   :  { %v5206_v62 = vpop.eup %5205  ;;  %v3023_v24 = vadd.f32 1.0, %v5204_v57  ;;  %5221 = vrcp.f32 %v3021_v9  ;;  %v3119_v9 = vrot.slane %v3114_v40, 5 }
 0x7be   :  { %v3025_v23 = vadd.f32 1.0, %v5206_v62  ;;  %5223 = vrcp.f32 %v3022_v2  ;;  %v5208_v63 = vpop.eup %5207  ;;  %v3120_v2 = vrot.slane %v3114_v40, 6 }
 0x7bf   :  { %5225 = vrcp.f32 %v3023_v24  ;;  %v5210_v53 = vpop.eup %5209  ;;  %v3090_v8 = vadd.f32 1.0, %v5208_v63 }
 0x7c0   :  { %5227 = vrcp.f32 %v3025_v23  ;;  %v5212_v61 = vpop.eup %5211  ;;  %v3091_v14 = vadd.f32 1.0, %v5210_v53 }
 0x7c1   :  { %5229 = vpow2.f32 %v3781_v16  ;;  %v3092_v17 = vadd.f32 1.0, %v5212_v61 }
 0x7c2   :  { %5231 = vpow2.f32 %v3782_v31 }
 0x7c3   :  { %v5214_v19 = vpop.eup %5213  ;;  %5233 = vpow2.f32 %v3783_v42 }
 0x7c4   :  { %v5216_v13 = vpop.eup %5215  ;;  %5235 = vpow2.f32 %v3784_v51  ;;  %v3137_v52 = vmul.f32 %v5214_v19, %v3114_v40  ;;  %v3122_v51 = vrot.slane %v3114_v40, 1 }
 0x7c5   :  { %v5218_v45 = vpop.eup %5217  ;;  %v3131_v43 = vmul.f32 %v5216_v13, %v3116_v10  ;;  %5237 = vpow2.f32 %v3785_v56 }
 0x7c6   :  { %v5220_v35 = vpop.eup %5219  ;;  %v3132_v28 = vmul.f32 %v5218_v45, %v3117_v21  ;;  %5239 = vrcp.f32 %v3090_v8 }
 0x7c7   :  { %v5222_v57 = vpop.eup %5221  ;;  %v3133_v26 = vmul.f32 %v5220_v35, %v3118_v47  ;;  %v3139_v62 = vadd.f32 %v3131_v43, %v6832_v44  ;;  %5241 = vrcp.f32 %v3091_v14 }
 0x7c8   :  { %v5224_v24 = vpop.eup %5223  ;;  %v3134_v16 = vmul.f32 %v5222_v57, %v3119_v9  ;;  %v3140_v23 = vadd.f32 %v3132_v28, %v6854_v37  ;;  %5243 = vrcp.f32 %v3092_v17  ;;  %v3171_v9 = vrot.slane %v6468_v29, 7 }
 0x7c9   :  { %v5226_v31 = vpop.eup %5225  ;;  %v3135_v42 = vmul.f32 %v5224_v24, %v3120_v2  ;;  %v3141_v63 = vadd.f32 %v3133_v26, %v6833_v4  ;;  %5245 = vtanh.f32 %v3139_v62  ;;  %v3145_v2 = vadd.f32 %v3137_v52, %v6855_v41 }
 0x7ca   :  { %v5228_v53 = vpop.eup %5227  ;;  %5247 = vtanh.f32 %v3140_v23  ;;  %v3136_v56 = vmul.f32 %v5226_v31, %v3121_v27  ;;  %v3142_v61 = vadd.f32 %v3134_v16, %v6834_v5  ;;  %v3172_v26 = vrot.slane %v6471_v50, 7 }
 0x7cb   :  { %v5230_v8 = vpop.eup %5229  ;;  %v3138_v19 = vmul.f32 %v5228_v53, %v3122_v51  ;;  %v3143_v10 = vadd.f32 %v3135_v42, %v6835_v3  ;;  %5249 = vtanh.f32 %v3141_v63  ;;  %v3173_v27 = vrot.slane %v6474_v38, 7 }
 0x7cc   :  { %v5232_v14 = vpop.eup %5231  ;;  %v3093_v13 = vadd.f32 1.0, %v5230_v8  ;;  %5251 = vtanh.f32 %v3142_v61  ;;  %v3144_v35 = vadd.f32 %v3136_v56, %v6836_v48 }
 0x7cd   :  { %v5234_v21 = vpop.eup %5233  ;;  %v3094_v17 = vadd.f32 1.0, %v5232_v14  ;;  %5253 = vtanh.f32 %v3143_v10  ;;  %v3146_v24 = vadd.f32 %v3138_v19, %v6917_v59  ;;  %v3174_v14 = vrot.slane %v6486_v6, 7 }
 0x7ce   :  { %v5236_v45 = vpop.eup %5235  ;;  %v3095_v47 = vadd.f32 1.0, %v5234_v21  ;;  %5255 = vrcp.f32 %v3093_v13 }
 0x7cf   :  { %v5238_v40 = vpop.eup %5237  ;;  %v3096_v43 = vadd.f32 1.0, %v5236_v45  ;;  %5257 = vrcp.f32 %v3094_v17  ;;  %v3175_v17 = vrot.slane %v6490_v30, 7 }
 0x7d0   :  { %v5240_v28 = vpop.eup %5239  ;;  %5259 = vrcp.f32 %v3095_v47  ;;  %v3097_v57 = vadd.f32 1.0, %v5238_v40 }
 0x7d1   :  { %v5242_v62 = vpop.eup %5241  ;;  %5261 = vrcp.f32 %v3096_v43  ;;  %v3186_v16 = vmul.f32 %v5240_v28, %v3171_v9  ;;  %v3155_v31 = vsub.f32 1.0, %v5240_v28  ;;  %v3176_v43 = vrot.slane %v6494_v0, 7 }
 0x7d2   :  { %v5244_v23 = vpop.eup %5243  ;;  %5263 = vrcp.f32 %v3097_v57  ;;  %v3187_v42 = vmul.f32 %v5242_v62, %v3172_v26  ;;  %v3156_v29 = vsub.f32 1.0, %v5242_v62 }
 0x7d3   :  { %v5246_v63 = vpop.eup %5245  ;;  %5265 = vtanh.f32 %v3144_v35  ;;  %v3188_v51 = vmul.f32 %v5244_v23, %v3173_v27  ;;  %v3157_v52 = vsub.f32 1.0, %v5244_v23 }
 0x7d4   :  { %v5248_v53 = vpop.eup %5247  ;;  %5267 = vtanh.f32 %v3145_v2  ;;  %v3163_v56 = vmul.f32 %v5246_v63, %v3155_v31 }
 0x7d5   :  { %v5250_v50 = vpop.eup %5249  ;;  %5269 = vtanh.f32 %v3146_v24  ;;  %v3164_v61 = vmul.f32 %v5248_v53, %v3156_v29  ;;  %v3177_v24 = vrot.slane %v6501_v36, 7 }
 0x7d6   :  { %v5252_v8 = vpop.eup %5251  ;;  %v3165_v19 = vmul.f32 %v5250_v50, %v3157_v52  ;;  %v6592_v10 = vadd.f32 %v3186_v16, %v3163_v56 }
 0x7d7   :  { %v5254_v38 = vpop.eup %5253  ;;  %v6595_v13 = vadd.f32 %v3187_v42, %v3164_v61 }
 0x7d8   :  { %v5256_v21 = vpop.eup %5255  ;;  %v6598_v45 = vadd.f32 %v3188_v51, %v3165_v19  ;;  %3202 = vst [vmem:[#allocation9] sm:$0x40] %v6592_v10  ;;  %v3218_v47 = vrot.slane %v6592_v10, 6 }
 0x7d9   :  { %v5258_v40 = vpop.eup %5257  ;;  %v3158_v35 = vsub.f32 1.0, %v5256_v21  ;;  %v3189_v9 = vmul.f32 %v5256_v21, %v3174_v14  ;;  %3203 = vst [vmem:[#allocation9 + $0x8] sm:$0x40] %v6595_v13  ;;  %v3219_v6 = vrot.slane %v6595_v13, 5 }
 0x7da   :  { %v5260_v28 = vpop.eup %5259  ;;  %v3159_v57 = vsub.f32 1.0, %v5258_v40  ;;  %v3190_v2 = vmul.f32 %v5258_v40, %v3175_v17  ;;  %3204 = vst [vmem:[#allocation9 + $0x10] sm:$0x40] %v6598_v45  ;;  %v3221_v30 = vrot.slane %v6598_v45, 4 }
 0x7db   :  { %v5262_v26 = vpop.eup %5261  ;;  %v3166_v62 = vmul.f32 %v5252_v8, %v3158_v35  ;;  %v3191_v27 = vmul.f32 %v5260_v28, %v3176_v43  ;;  %v3220_v0 = vsel %vm788_vm2, %v3219_v6, %v3218_v47  ;;  %v3160_v23 = vsub.f32 1.0, %v5260_v28 }
 0x7dc   :  { %v5264_v16 = vpop.eup %5263  ;;  %v3167_v31 = vmul.f32 %v5254_v38, %v3159_v57  ;;  %v3222_v42 = vsel %vm791_vm3, %v3221_v30, %v3220_v0  ;;  %v3161_v29 = vsub.f32 1.0, %v5262_v26  ;;  %v3192_v19 = vmul.f32 %v5262_v26, %v2824_v18 }
 0x7dd   :  { %v5266_v63 = vpop.eup %5265  ;;  %v3193_v51 = vmul.f32 %v5264_v16, %v3177_v24  ;;  %v6610_v53 = vadd.f32 %v3189_v9, %v3166_v62  ;;  %v3162_v56 = vsub.f32 1.0, %v5264_v16 }
 0x7de   :  { %v5268_v52 = vpop.eup %5267  ;;  %v3168_v50 = vmul.f32 %v5266_v63, %v3160_v23  ;;  %v6612_v61 = vadd.f32 %v3190_v2, %v3167_v31 }
 0x7df   :  { %v5270_v8 = vpop.eup %5269  ;;  %v3169_v36 = vmul.f32 %v5268_v52, %v3161_v29  ;;  %3205 = vst [vmem:[#allocation9 + $0x18] sm:$0x40] %v6610_v53  ;;  %v3223_v38 = vrot.slane %v6610_v53, 3 }
 0x7e0   :  { %v3170_v14 = vmul.f32 %v5270_v8, %v3162_v56  ;;  %v6618_v21 = vadd.f32 %v3191_v27, %v3168_v50  ;;  %3206 = vst [vmem:[#allocation9 + $0x20] sm:$0x40] %v6612_v61  ;;  %v3225_v17 = vrot.slane %v6612_v61, 2 }
 0x7e1   :  { %v6622_v47 = vadd.f32 %v3192_v19, %v3169_v36  ;;  %v3224_v40 = vsel %vm794_vm4, %v3223_v38, %v3222_v42 }
 0x7e2   :  { %v6625_v43 = vadd.f32 %v3193_v51, %v3170_v14  ;;  %3207 = vst [vmem:[#allocation9 + $0x28] sm:$0x40] %v6618_v21  ;;  %v3226_v49 = vsel %vm797_vm5, %v3225_v17, %v3224_v40  ;;  %v3227_v18 = vrot.slane %v6618_v21, 1 }
 0x7e3   :  { %3208 = vst [vmem:[#allocation9 + $0x30] sm:$0x40] %v6622_v47 }
 0x7e4   :  { %3209 = vst [vmem:[#allocation9 + $0x38] sm:$0x40] %v6625_v43  ;;  %v3228_v35 = vsel %vm800_vm6, %v3227_v18, %v3226_v49  ;;  %v3230_v9 = vrot.slane %v6625_v43, 7 }
 0x7e5   :  { %v3229_v6 = vsel %vm803_vm7, %v6622_v47, %v3228_v35 }
 0x7e6   :  { %v3231_v28 = vsel %vm806_vm8, %v3230_v9, %v3229_v6 }
 0x7e7   :  { %3298 = vmatmul.mubr.f32.vlgmr.msra.gmra.mrb[30].mxu0 %v3231_v28  ;;  %4242 = vmatmul.mubr.f32.vlgmr.msra.gmra.mrb[22].mxu1 %v3231_v28 }
 0x8ba   :  { %v3299_v57 = vpop.f32.mrb[30].mxu0  ;;  %v6639_v2 = vpop.f32.mrb[22].mxu1 }
 0x8bb   :  { %v3375_v30 = vrot.slane %v3299_v57, 1  ;;  %v3376_v26 = vrot.slane %v3299_v57, 2  ;;  %v3377_v62 = vrot.slane %v3299_v57, 3  ;;  %v3378_v24 = vrot.slane %v3299_v57, 4  ;;  %v6641_v27 = vpop.f32.mrb[31].mxu0  ;;  %v4243_v0 = vpop.f32.mrb[23].mxu1 }
 0x8bc   :  { %v3379_v16 = vrot.slane %v3299_v57, 5  ;;  %v3380_v23 = vrot.slane %v3299_v57, 6  ;;  %v3381_v31 = vrot.slane %v3299_v57, 7  ;;  %v3397_v42 = vadd.f32 %v3299_v57, %v6926_v55 }
 0x8bd   :  { %v3390_v63 = vadd.f32 %v3375_v30, %v6828_v46  ;;  %v3391_v29 = vadd.f32 %v3376_v26, %v5720_v20  ;;  %v3392_v51 = vadd.f32 %v3377_v62, %v5725_v25  ;;  %v3393_v52 = vadd.f32 %v3378_v24, %v6886_v39 }
 0x8be   :  { %v3394_v56 = vadd.f32 %v3379_v16, %v5734_v32  ;;  %v3395_v50 = vadd.f32 %v3380_v23, %v6864_v60  ;;  %v3793_v8 = vmul.f32 -1.442695, %v3397_v42  ;;  %v3396_v36 = vadd.f32 %v3381_v31, %v6887_v34 }
 0x8bf   :  { %v3786_v19 = vmul.f32 -1.442695, %v3390_v63  ;;  %v3787_v38 = vmul.f32 -1.442695, %v3391_v29  ;;  %v3788_v14 = vmul.f32 -1.442695, %v3392_v51 }
 0x8c0   :  { %v3789_v17 = vmul.f32 -1.442695, %v3393_v52  ;;  %5271 = vpow2.f32 %v3793_v8  ;;  %v3790_v46 = vmul.f32 -1.442695, %v3394_v56  ;;  %v3791_v20 = vmul.f32 -1.442695, %v3395_v50 }
 0x8c1   :  { %5273 = vpow2.f32 %v3786_v19  ;;  %v3792_v25 = vmul.f32 -1.442695, %v3396_v36  ;;  %v3447_v39 = vrot.slane %v6641_v27, 1  ;;  %v3448_v32 = vrot.slane %v6641_v27, 2 }
 0x8c2   :  { %5275 = vpow2.f32 %v3787_v38  ;;  %v3449_v60 = vrot.slane %v6641_v27, 3  ;;  %v3450_v35 = vrot.slane %v6641_v27, 4  ;;  %v3451_v57 = vrot.slane %v6641_v27, 5 }
 0x8c3   :  { %5277 = vpow2.f32 %v3788_v14  ;;  %v3462_v34 = vadd.f32 %v3447_v39, %v6927_v1  ;;  %v3463_v55 = vadd.f32 %v3448_v32, %v6928_v15  ;;  %v3452_v62 = vrot.slane %v6641_v27, 6 }
 0x8c4   :  { %5279 = vpow2.f32 %v3789_v17  ;;  %v3464_v40 = vadd.f32 %v3449_v60, %v6929_v22  ;;  %v3453_v15 = vrot.slane %v6641_v27, 7  ;;  %v3465_v16 = vadd.f32 %v3450_v35, %v6930_v58 }
 0x8c5   :  { %5281 = vpow2.f32 %v3790_v46  ;;  %v3794_v49 = vmul.f32 -1.442695, %v3462_v34  ;;  %v3795_v18 = vmul.f32 -1.442695, %v3463_v55  ;;  %v3466_v42 = vadd.f32 %v3451_v57, %v6931_v7 }
 0x8c6   :  { %5283 = vpow2.f32 %v3791_v20  ;;  %v3796_v6 = vmul.f32 -1.442695, %v3464_v40  ;;  %v3467_v51 = vadd.f32 %v3452_v62, %v6932_v11  ;;  %v3468_v50 = vadd.f32 %v3453_v15, %v6933_v12 }
 0x8c7   :  { %5285 = vpow2.f32 %v3792_v25  ;;  %v3469_v58 = vadd.f32 %v6641_v27, %v6934_v54  ;;  %v3797_v19 = vmul.f32 -1.442695, %v3465_v16  ;;  %v3798_v7 = vmul.f32 -1.442695, %v3466_v42 }
 0x8c8   :  { %5287 = vpow2.f32 %v3794_v49  ;;  %v3518_v14 = vadd.f32 %v6577_v33, %v6639_v2  ;;  %v3799_v11 = vmul.f32 -1.442695, %v3467_v51  ;;  %v3800_v46 = vmul.f32 -1.442695, %v3468_v50 }
 0x8c9   :  { %5289 = vpow2.f32 %v3795_v18  ;;  %v3801_v12 = vmul.f32 -1.442695, %v3469_v58  ;;  %v3575_v58 = vrot.slane %v6592_v10, 7 }
 0x8ca   :  { %v5272_v28 = vpop.eup %5271  ;;  %5291 = vpow2.f32 %v3796_v6  ;;  %v3520_v54 = vrot.slane %v3518_v14, 1  ;;  %v3521_v34 = vrot.slane %v3518_v14, 2  ;;  %v3522_v33 = vrot.slane %v3518_v14, 3 }
 0x8cb   :  { %v5274_v30 = vpop.eup %5273  ;;  %v3429_v26 = vadd.f32 1.0, %v5272_v28  ;;  %v3523_v18 = vrot.slane %v3518_v14, 4  ;;  %v3524_v57 = vrot.slane %v3518_v14, 5 }
 0x8cc   :  { %v5276_v1 = vpop.eup %5275  ;;  %v3422_v24 = vadd.f32 1.0, %v5274_v30 }
 0x8cd   :  { %v5278_v22 = vpop.eup %5277  ;;  %v3423_v0 = vadd.f32 1.0, %v5276_v1  ;;  %5293 = vrcp.f32 %v3429_v26  ;;  %v3525_v1 = vrot.slane %v3518_v14, 6 }
 0x8ce   :  { %v5280_v23 = vpop.eup %5279  ;;  %v3424_v31 = vadd.f32 1.0, %v5278_v22  ;;  %5295 = vrcp.f32 %v3422_v24 }
 0x8cf   :  { %v5282_v63 = vpop.eup %5281  ;;  %v3425_v29 = vadd.f32 1.0, %v5280_v23  ;;  %5297 = vrcp.f32 %v3423_v0  ;;  %v3526_v0 = vrot.slane %v3518_v14, 7 }
 0x8d0   :  { %v5284_v52 = vpop.eup %5283  ;;  %v3426_v56 = vadd.f32 1.0, %v5282_v63  ;;  %5299 = vrcp.f32 %v3424_v31 }
 0x8d1   :  { %v5286_v8 = vpop.eup %5285  ;;  %v3427_v36 = vadd.f32 1.0, %v5284_v52  ;;  %5301 = vrcp.f32 %v3425_v29 }
 0x8d2   :  { %v3428_v38 = vadd.f32 1.0, %v5286_v8  ;;  %5303 = vrcp.f32 %v3426_v56  ;;  %v5288_v17 = vpop.eup %5287 }
 0x8d3   :  { %5305 = vrcp.f32 %v3427_v36  ;;  %v5290_v20 = vpop.eup %5289  ;;  %v3494_v39 = vadd.f32 1.0, %v5288_v17 }
 0x8d4   :  { %5307 = vrcp.f32 %v3428_v38  ;;  %v5292_v25 = vpop.eup %5291  ;;  %v3495_v27 = vadd.f32 1.0, %v5290_v20  ;;  %v3576_v38 = vrot.slane %v6595_v13, 7 }
 0x8d5   :  { %5309 = vpow2.f32 %v3797_v19  ;;  %v3496_v52 = vadd.f32 1.0, %v5292_v25 }
 0x8d6   :  { %5311 = vpow2.f32 %v3798_v7 }
 0x8d7   :  { %v5294_v32 = vpop.eup %5293  ;;  %5313 = vpow2.f32 %v3799_v11 }
 0x8d8   :  { %v5296_v60 = vpop.eup %5295  ;;  %v3542_v55 = vmul.f32 %v5294_v32, %v3518_v14  ;;  %5315 = vpow2.f32 %v3800_v46 }
 0x8d9   :  { %v5298_v40 = vpop.eup %5297  ;;  %v3535_v2 = vmul.f32 %v5296_v60, %v3520_v54  ;;  %5317 = vpow2.f32 %v3801_v12 }
 0x8da   :  { %v5300_v49 = vpop.eup %5299  ;;  %v3536_v35 = vmul.f32 %v5298_v40, %v3521_v34  ;;  %v3550_v6 = vadd.f32 %v3542_v55, %v6917_v59  ;;  %5319 = vrcp.f32 %v3494_v39  ;;  %v3577_v40 = vrot.slane %v6598_v45, 7 }
 0x8db   :  { %v5302_v28 = vpop.eup %5301  ;;  %v3537_v30 = vmul.f32 %v5300_v49, %v3522_v33  ;;  %v3543_v26 = vadd.f32 %v3535_v2, %v6832_v44  ;;  %5321 = vrcp.f32 %v3495_v27  ;;  %v3578_v2 = vrot.slane %v6610_v53, 7 }
 0x8dc   :  { %v5304_v62 = vpop.eup %5303  ;;  %v3538_v24 = vmul.f32 %v5302_v28, %v3523_v18  ;;  %v3544_v15 = vadd.f32 %v3536_v35, %v6854_v37  ;;  %5323 = vtanh.f32 %v3550_v6  ;;  %v3579_v18 = vrot.slane %v6612_v61, 7 }
 0x8dd   :  { %v5306_v22 = vpop.eup %5305  ;;  %v3539_v16 = vmul.f32 %v5304_v62, %v3524_v57  ;;  %v3545_v23 = vadd.f32 %v3537_v30, %v6833_v4  ;;  %5325 = vtanh.f32 %v3543_v26  ;;  %v3580_v57 = vrot.slane %v6618_v21, 7 }
 0x8de   :  { %v5308_v59 = vpop.eup %5307  ;;  %v3540_v31 = vmul.f32 %v5306_v22, %v3525_v1  ;;  %v3546_v42 = vadd.f32 %v3538_v24, %v6834_v5  ;;  %5327 = vtanh.f32 %v3544_v15  ;;  %v3581_v1 = vrot.slane %v6622_v47, 7 }
 0x8df   :  { %v5310_v63 = vpop.eup %5309  ;;  %v3541_v44 = vmul.f32 %v5308_v59, %v3526_v0  ;;  %v3547_v29 = vadd.f32 %v3539_v16, %v6835_v3  ;;  %5329 = vtanh.f32 %v3545_v23 }
 0x8e0   :  { %v5312_v51 = vpop.eup %5311  ;;  %v3548_v37 = vadd.f32 %v3540_v31, %v6836_v48  ;;  %5331 = vtanh.f32 %v3546_v42  ;;  %v3497_v4 = vadd.f32 1.0, %v5310_v63 }
 0x8e1   :  { %v5314_v56 = vpop.eup %5313  ;;  %v3549_v50 = vadd.f32 %v3541_v44, %v6855_v41  ;;  %5333 = vtanh.f32 %v3547_v29  ;;  %v3498_v36 = vadd.f32 1.0, %v5312_v51 }
 0x8e2   :  { %v5316_v8 = vpop.eup %5315  ;;  %5335 = vtanh.f32 %v3548_v37  ;;  %v3499_v19 = vadd.f32 1.0, %v5314_v56 }
 0x8e3   :  { %v5318_v5 = vpop.eup %5317  ;;  %5337 = vtanh.f32 %v3549_v50  ;;  %v3500_v7 = vadd.f32 1.0, %v5316_v8 }
 0x8e4   :  { %v5320_v3 = vpop.eup %5319  ;;  %5339 = vrcp.f32 %v3496_v52  ;;  %v3501_v14 = vadd.f32 1.0, %v5318_v5 }
 0x8e5   :  { %v5322_v48 = vpop.eup %5321  ;;  %5341 = vrcp.f32 %v3497_v4  ;;  %v3590_v11 = vmul.f32 %v5320_v3, %v3575_v58  ;;  %v3559_v17 = vsub.f32 1.0, %v5320_v3 }
 0x8e6   :  { %v5324_v41 = vpop.eup %5323  ;;  %5343 = vrcp.f32 %v3498_v36  ;;  %v3591_v46 = vmul.f32 %v5322_v48, %v3576_v38  ;;  %v3560_v12 = vsub.f32 1.0, %v5322_v48 }
 0x8e7   :  { %v5326_v20 = vpop.eup %5325  ;;  %5345 = vrcp.f32 %v3499_v19 }
 0x8e8   :  { %v5328_v25 = vpop.eup %5327  ;;  %5347 = vrcp.f32 %v3500_v7  ;;  %v3567_v10 = vmul.f32 %v5326_v20, %v3559_v17 }
 0x8e9   :  { %v5330_v39 = vpop.eup %5329  ;;  %5349 = vrcp.f32 %v3501_v14  ;;  %v3568_v32 = vmul.f32 %v5328_v25, %v3560_v12 }
 0x8ea   :  { %v5332_v13 = vpop.eup %5331  ;;  %v3598_v54 = vadd.f32 %v3590_v11, %v3567_v10 }
 0x8eb   :  { %v5334_v27 = vpop.eup %5333  ;;  %v3599_v60 = vadd.f32 %v3591_v46, %v3568_v32 }
 0x8ec   :  { %v5336_v34 = vpop.eup %5335  ;;  %3606 = vst [vmem:[#allocation9] sm:$0x80] %v3598_v54  ;;  %3637 = vst [vmem:[#allocation2 - $0x7] sm:$0x80] %v3598_v54 }
 0x8ed   :  { %v5338_v55 = vpop.eup %5337  ;;  %3607 = vst [vmem:[#allocation9 + $0x8] sm:$0x80] %v3599_v60  ;;  %v3622_v23 = vrot.slane %v3599_v60, 7 }
 0x8ee   :  { %v5340_v33 = vpop.eup %5339 }
 0x8ef   :  { %v5342_v49 = vpop.eup %5341  ;;  %v3561_v35 = vsub.f32 1.0, %v5340_v33  ;;  %v3592_v6 = vmul.f32 %v5340_v33, %v3577_v40 }
 0x8f0   :  { %v5344_v28 = vpop.eup %5343  ;;  %v3562_v30 = vsub.f32 1.0, %v5342_v49  ;;  %v3593_v26 = vmul.f32 %v5342_v49, %v3578_v2 }
 0x8f1   :  { %v5346_v62 = vpop.eup %5345  ;;  %v3563_v24 = vsub.f32 1.0, %v5344_v28  ;;  %v3569_v15 = vmul.f32 %v5330_v39, %v3561_v35  ;;  %v3594_v45 = vmul.f32 %v5344_v28, %v3579_v18 }
 0x8f2   :  { %v5348_v22 = vpop.eup %5347  ;;  %v3564_v0 = vsub.f32 1.0, %v5346_v62  ;;  %v3570_v16 = vmul.f32 %v5332_v13, %v3562_v30  ;;  %v3595_v53 = vmul.f32 %v5346_v62, %v3580_v57 }
 0x8f3   :  { %v5350_v59 = vpop.eup %5349  ;;  %v3565_v61 = vsub.f32 1.0, %v5348_v22  ;;  %v3571_v31 = vmul.f32 %v5334_v27, %v3563_v24  ;;  %v3596_v42 = vmul.f32 %v5348_v22, %v3581_v1  ;;  %v3600_v63 = vadd.f32 %v3592_v6, %v3569_v15 }
 0x8f4   :  { %v3566_v44 = vsub.f32 1.0, %v5350_v59  ;;  %v3572_v21 = vmul.f32 %v5336_v34, %v3564_v0  ;;  %v3601_v29 = vadd.f32 %v3593_v26, %v3570_v16  ;;  %v3597_v56 = vmul.f32 %v5350_v59, %v3230_v9 }
 0x8f5   :  { %v3573_v51 = vmul.f32 %v5338_v55, %v3565_v61  ;;  %v3602_v37 = vadd.f32 %v3594_v45, %v3571_v31  ;;  %3608 = vst [vmem:[#allocation9 + $0x10] sm:$0x80] %v3600_v63  ;;  %v3623_v47 = vrot.slane %v3600_v63, 6 }
 0x8f6   :  { %v3574_v52 = vmul.f32 %v5324_v41, %v3566_v44  ;;  %v3603_v50 = vadd.f32 %v3595_v53, %v3572_v21  ;;  %3609 = vst [vmem:[#allocation9 + $0x18] sm:$0x80] %v3601_v29  ;;  %v3625_v4 = vrot.slane %v3601_v29, 5 }
 0x8f7   :  { %v3604_v8 = vadd.f32 %v3596_v42, %v3573_v51  ;;  %3610 = vst [vmem:[#allocation9 + $0x20] sm:$0x80] %v3602_v37  ;;  %v3624_v36 = vsel %vm788_vm2, %v3623_v47, %v3622_v23  ;;  %v3627_v5 = vrot.slane %v3602_v37, 4 }
 0x8f8   :  { %v3605_v58 = vadd.f32 %v3597_v56, %v3574_v52  ;;  %3611 = vst [vmem:[#allocation9 + $0x28] sm:$0x80] %v3603_v50  ;;  %v3626_v19 = vsel %vm791_vm3, %v3625_v4, %v3624_v36  ;;  %v3629_v3 = vrot.slane %v3603_v50, 3 }
 0x8f9   :  { %3612 = vst [vmem:[#allocation9 + $0x30] sm:$0x80] %v3604_v8  ;;  %v3628_v38 = vsel %vm794_vm4, %v3627_v5, %v3626_v19  ;;  %v3631_v7 = vrot.slane %v3604_v8, 2 }
 0x8fa   :  { %3613 = vst [vmem:[#allocation9 + $0x38] sm:$0x80] %v3605_v58  ;;  %v3630_v43 = vsel %vm797_vm5, %v3629_v3, %v3628_v38  ;;  %v3633_v9 = vrot.slane %v3605_v58, 1 }
 0x8fb   :  { %v3632_v48 = vsel %vm800_vm6, %v3631_v7, %v3630_v43 }
 0x8fc   :  { %5434 = shalt.err (!%p5431_p0)
}
 0x8fd   :  { %s5435_s19 = scalar_lea.hbm %s6712_s5, 1024 }
 0x8fe   :  { %p5436_p1 = scmp.ne.s32.totalorder %s6712_s5, %s5435_s19  ;;  %p5439_p2 = scmp.lt.u32.totalorder %s5435_s19, %s6712_s5 }
 0x900   :  { %p5441_p3 = pnand %p5439_p2, %p5436_p1 }
 0x902   :  { %5444 = shalt.err (!%p5441_p3)
}
 0x903   :  { %3650 = dma.vmem_to_hbm [thread:$0]  %s3645_s14, 1024, %s6712_s5, [#allocation5], %s5455_s1, %s5455_s1, %s5456_s17   ;;  %v3634_v14 = vsel %vm803_vm7, %v3633_v9, %v3632_v48 }
 0x904   :  { %3638 = vst [vmem:[#allocation2 + $0x1] sm:$0x7f] %v3634_v14 }
 0x905   :  { %5449 = dma.done.wait [#allocation5], 1024  }
 0x906   :  { %5450 = vsyncadd [#allocation5], 4294966272 }
 0x907   :  { %3654 = vsyncpa [#allocation4], 1 }
 0x908   :  { %3655 = vsyncpa [#allocation7], 1 }
 0x909   :  { %3656 = vsyncpa [#allocation5], 1 }

</bundles_post_ra>
